<compile_context>
chip_gen: v7x
topology: tpu7x:2x2x1
jax: 0.10.0
libtpu: 0.0.40
codegen_flags: <defaults>
</compile_context>

<pallas_src>
import functools

import numpy as np
import jax
import jax.numpy as jnp
from jax.experimental import pallas as pl

# ----- small synthetic config (consistent with the module's constructor) -----
B = 2                # batch
ENC_HW = 4           # encoded image size (feature-map side)
P = ENC_HW * ENC_HW  # num_pixels = 16
E = 32               # encoder_dim
A = 32               # attention_dim
D = 32               # decoder_dim
EMB = 16             # embedding_dim
V = 64               # vocab_size
VP = 128             # vocab padded to a full 128-lane store (sliced back in the wrapper)
L = 8                # caption token length


# ---------------------------------------------------------------------------
# Fused kernel: encoder_att precompute + init hidden states + full T-step decode loop.
# Per-row masking reproduces the batch_size_t truncation of the PyTorch loop
# (caption lengths are sorted descending, so inactive rows are simply frozen).
# ---------------------------------------------------------------------------
def _decoder_kernel(T,
                    enc_ref, emb_ref, dl_ref,
                    Wea_ref, bea_ref,
                    Wih0_ref, bih0_ref, Wic0_ref, bic0_ref,
                    Wda_ref, bda_ref, wfa_ref, bfa_ref,
                    Wfb_ref, bfb_ref,
                    Wx_ref, bx_ref,
                    Wfc_ref, bfc_ref,
                    preds_ref, alphas_ref):
    # ---- one-time work (was a separate kernel before) ----
    enc3 = enc_ref[...]                                   # [B, P, E]
    enc2 = enc3.reshape(B * P, E)
    eatt = (jnp.dot(enc2, Wea_ref[...], preferred_element_type=jnp.float32)
            + bea_ref[...]).reshape(B, P, A)              # encoder_att(enc)  [B, P, A]
    mean_enc = jnp.mean(enc3, axis=1)                     # [B, E]
    h = (jnp.dot(mean_enc, Wih0_ref[...], preferred_element_type=jnp.float32)
         + bih0_ref[...])                                 # init_h
    c = (jnp.dot(mean_enc, Wic0_ref[...], preferred_element_type=jnp.float32)
         + bic0_ref[...])                                 # init_c

    # ---- hoisted loop-invariant loads ----
    Wda = Wda_ref[...]; bda = bda_ref[...]
    wfa = wfa_ref[...].reshape(1, 1, A)
    bfa = bfa_ref[0, 0]
    Wfb = Wfb_ref[...]; bfb = bfb_ref[...]
    Wx = Wx_ref[...];   bx = bx_ref[...]                  # fused LSTM input weight / bias
    Wfc = Wfc_ref[...]; bfc = bfc_ref[...]                # fc weight padded to VP lanes
    dl = dl_ref[...]                                      # [B, 1] int32 decode lengths

    # ---- decode loop, statically unrolled (T known at trace time) ----
    for t in range(T):
        # Attention
        att2 = jnp.dot(h, Wda, preferred_element_type=jnp.float32) + bda     # [B, A]
        e = jnp.maximum(eatt + att2[:, None, :], 0.0)                        # ReLU  [B, P, A]
        scores = jnp.sum(e * wfa, axis=-1) + bfa                             # [B, P]
        m = jnp.max(scores, axis=-1, keepdims=True)
        ex = jnp.exp(scores - m)
        alpha = ex / jnp.sum(ex, axis=-1, keepdims=True)                     # softmax over pixels
        awe = jnp.sum(enc3 * alpha[:, :, None], axis=1)                      # [B, E]

        # Gating
        gate = jax.nn.sigmoid(jnp.dot(h, Wfb, preferred_element_type=jnp.float32) + bfb)
        awe = gate * awe

        # LSTMCell with fused input matmul (PyTorch gate order i, f, g, o)
        x = jnp.concatenate([emb_ref[t], awe, h], axis=-1)                   # [B, EMB+E+D]
        gates = jnp.dot(x, Wx, preferred_element_type=jnp.float32) + bx      # [B, 4D]
        i_g = jax.nn.sigmoid(gates[:, 0:D])
        f_g = jax.nn.sigmoid(gates[:, D:2 * D])
        g_g = jnp.tanh(gates[:, 2 * D:3 * D])
        o_g = jax.nn.sigmoid(gates[:, 3 * D:4 * D])
        c_new = f_g * c + i_g * g_g
        h_new = o_g * jnp.tanh(c_new)

        preds = jnp.dot(h_new, Wfc, preferred_element_type=jnp.float32) + bfc  # [B, VP]

        # rows with decode_len <= t are inactive (PyTorch writes only [:batch_size_t])
        mask = dl > t                                                        # [B, 1] bool
        preds_ref[t] = jnp.where(mask, preds, 0.0)
        alphas_ref[t] = jnp.where(mask, alpha, 0.0)
        h = jnp.where(mask, h_new, h)
        c = jnp.where(mask, c_new, c)


# ---------------------------------------------------------------------------
# Parameter init (deterministic, matches the module's layer shapes / init_weights)
# ---------------------------------------------------------------------------
def init_params(key):
    def u(k, shape, lo=-0.1, hi=0.1):
        return jax.random.uniform(k, shape, jnp.float32, lo, hi)

    ks = jax.random.split(key, 20)
    p = {}
    p["Wea"] = u(ks[0], (E, A));   p["bea"] = u(ks[1], (1, A))      # attention.encoder_att
    p["Wda"] = u(ks[2], (D, A));   p["bda"] = u(ks[3], (1, A))      # attention.decoder_att
    p["wfa"] = u(ks[4], (1, A));   p["bfa"] = u(ks[5], (1, 1))      # attention.full_att
    p["Wih0"] = u(ks[6], (E, D));  p["bih0"] = u(ks[7], (1, D))     # init_h
    p["Wic0"] = u(ks[8], (E, D));  p["bic0"] = u(ks[9], (1, D))     # init_c
    p["Wfb"] = u(ks[10], (D, E));  p["bfb"] = u(ks[11], (1, E))     # f_beta
    p["Wih_e"] = u(ks[12], (EMB, 4 * D))                            # LSTMCell W_ih (emb part)
    p["Wih_a"] = u(ks[13], (E, 4 * D))                              # LSTMCell W_ih (att part)
    p["bih"] = u(ks[14], (1, 4 * D))
    p["Whh"] = u(ks[15], (D, 4 * D))
    p["bhh"] = u(ks[16], (1, 4 * D))
    p["Wfc"] = u(ks[17], (D, V))                                    # fc.weight uniform(-0.1,0.1)
    p["bfc"] = jnp.zeros((1, V), jnp.float32)                       # fc.bias = 0
    p["emb_table"] = u(ks[18], (V, EMB))                            # embedding uniform(-0.1,0.1)
    return p


# ---------------------------------------------------------------------------
# Forward wrapper (glue: sorting, embedding gather, weight stacking, transposes)
# ---------------------------------------------------------------------------
def decoder_attention_forward(encoder_outputs, encoded_captions, caption_len, params):
    """Mirrors DecoderAttention.forward(encoder_outputs, encoded_captions, caption_len)."""
    cap_np = np.asarray(caption_len).reshape(-1)
    sorted_idx = np.argsort(-cap_np, kind="stable")               # descending sort (host glue)
    cap_sorted = cap_np[sorted_idx]
    decode_len = (cap_sorted - 1).tolist()
    T = int(max(decode_len))

    enc = encoder_outputs.reshape(B, -1, E)[sorted_idx]           # [B, P, E]
    caps_sorted = encoded_captions[sorted_idx]

    # embedding lookup (glue), time-major so the kernel reads one static slice per step
    emb = params["emb_table"][caps_sorted].astype(jnp.float32)    # [B, L, EMB]
    emb_tm = jnp.transpose(emb[:, :T, :], (1, 0, 2))              # [T, B, EMB]
    dl = jnp.asarray(decode_len, jnp.int32).reshape(B, 1)

    # one-time parameter transforms for the fused kernel
    Wx = jnp.concatenate([params["Wih_e"], params["Wih_a"], params["Whh"]],
                         axis=0)                                  # [EMB+E+D, 4D]
    bx = params["bih"] + params["bhh"]                            # [1, 4D]
    Wfc_pad = jnp.zeros((D, VP), jnp.float32).at[:, :V].set(params["Wfc"])
    bfc_pad = jnp.zeros((1, VP), jnp.float32).at[:, :V].set(params["bfc"])

    preds_tm, alphas_tm = pl.pallas_call(
        functools.partial(_decoder_kernel, T),
        out_shape=(jax.ShapeDtypeStruct((T, B, VP), jnp.float32),
                   jax.ShapeDtypeStruct((T, B, P), jnp.float32)),
    )(enc, emb_tm, dl,
      params["Wea"], params["bea"],
      params["Wih0"], params["bih0"], params["Wic0"], params["bic0"],
      params["Wda"], params["bda"], params["wfa"], params["bfa"],
      params["Wfb"], params["bfb"],
      Wx, bx, Wfc_pad, bfc_pad)

    predictions = jnp.transpose(preds_tm, (1, 0, 2))[:, :, :V]    # [B, T, V]
    alphas = jnp.transpose(alphas_tm, (1, 0, 2))                  # [B, T, P]
    return predictions, caps_sorted, decode_len, alphas, sorted_idx


# ---------------------------------------------------------------------------
# Pure-numpy reference (mirrors the PyTorch forward semantics)
# ---------------------------------------------------------------------------
def reference_forward(encoder_outputs, encoded_captions, caption_len, params):
    p = {k: np.asarray(v) for k, v in params.items()}
    sig = lambda z: 1.0 / (1.0 + np.exp(-z))

    cap_np = np.asarray(caption_len).reshape(-1)
    sorted_idx = np.argsort(-cap_np, kind="stable")
    decode_len = np.asarray(cap_np[sorted_idx] - 1, np.int32)
    T = int(decode_len.max())

    enc = np.asarray(encoder_outputs).reshape(B, -1, E)[sorted_idx]
    caps = np.asarray(encoded_captions)[sorted_idx]

    enc2d = enc.reshape(B * P, E)
    eatt = (enc2d @ p["Wea"] + p["bea"]).reshape(B, P, A)
    mean_enc = enc.mean(axis=1)
    h = mean_enc @ p["Wih0"] + p["bih0"]
    c = mean_enc @ p["Wic0"] + p["bic0"]

    emb = p["emb_table"][caps]                                   # [B, L, EMB]
    preds_all = np.zeros((B, T, V), np.float32)
    alphas_all = np.zeros((B, T, P), np.float32)
    for t in range(T):
        att2 = h @ p["Wda"] + p["bda"]
        e = np.maximum(eatt + att2[:, None, :], 0.0)
        scores = (e * p["wfa"].reshape(1, 1, A)).sum(-1) + float(p["bfa"][0, 0])
        ex = np.exp(scores - scores.max(-1, keepdims=True))
        alpha = ex / ex.sum(-1, keepdims=True)
        awe = (enc * alpha[:, :, None]).sum(1)
        gate = sig(h @ p["Wfb"] + p["bfb"])
        awe = gate * awe
        gates = (emb[:, t, :] @ p["Wih_e"] + awe @ p["Wih_a"] + p["bih"]
                 + h @ p["Whh"] + p["bhh"])
        i_g = sig(gates[:, 0:D]); f_g = sig(gates[:, D:2 * D])
        g_g = np.tanh(gates[:, 2 * D:3 * D]); o_g = sig(gates[:, 3 * D:4 * D])
        c_new = f_g * c + i_g * g_g
        h_new = o_g * np.tanh(c_new)
        preds = h_new @ p["Wfc"] + p["bfc"]
        mask = (decode_len > t)[:, None]
        preds_all[:, t] = np.where(mask, preds, 0.0)
        alphas_all[:, t] = np.where(mask, alpha, 0.0)
        h = np.where(mask, h_new, h)
        c = np.where(mask, c_new, c)
    return preds_all, alphas_all


if __name__ == "__main__":
    key = jax.random.PRNGKey(0)
    k_enc, k_cap, k_par = jax.random.split(key, 3)

    encoder_outputs = jax.random.normal(k_enc, (B, ENC_HW, ENC_HW, E), jnp.float32)
    encoded_captions = jax.random.randint(k_cap, (B, L), 0, V, dtype=jnp.int32)
    caption_len = jnp.array([[6], [8]], dtype=jnp.int32)
    params = init_params(k_par)

    predictions, caps_sorted, decode_len, alphas, sorted_idx = decoder_attention_forward(
        encoder_outputs, encoded_captions, caption_len, params)
    jax.block_until_ready((predictions, alphas))

    ref_preds, ref_alphas = reference_forward(encoder_outputs, encoded_captions,
                                              caption_len, params)
    np.testing.assert_allclose(np.asarray(predictions), ref_preds, rtol=1e-2, atol=1e-2)
    np.testing.assert_allclose(np.asarray(alphas), ref_alphas, rtol=1e-2, atol=1e-2)

    print("KERNEL_OK")
</pallas_src>

<mosaic_0001>
module attributes {stable_mosaic.version = 11 : i64} {
  func.func @_decoder_kernel(%arg0: memref<2x16x32xf32, #tpu.memory_space<vmem>>, %arg1: memref<7x2x16xf32, #tpu.memory_space<vmem>>, %arg2: memref<2x1xi32, #tpu.memory_space<vmem>>, %arg3: memref<32x32xf32, #tpu.memory_space<vmem>>, %arg4: memref<1x32xf32, #tpu.memory_space<vmem>>, %arg5: memref<32x32xf32, #tpu.memory_space<vmem>>, %arg6: memref<1x32xf32, #tpu.memory_space<vmem>>, %arg7: memref<32x32xf32, #tpu.memory_space<vmem>>, %arg8: memref<1x32xf32, #tpu.memory_space<vmem>>, %arg9: memref<32x32xf32, #tpu.memory_space<vmem>>, %arg10: memref<1x32xf32, #tpu.memory_space<vmem>>, %arg11: memref<1x32xf32, #tpu.memory_space<vmem>>, %arg12: memref<1x1xf32, #tpu.memory_space<vmem>>, %arg13: memref<32x32xf32, #tpu.memory_space<vmem>>, %arg14: memref<1x32xf32, #tpu.memory_space<vmem>>, %arg15: memref<80x128xf32, #tpu.memory_space<vmem>>, %arg16: memref<1x128xf32, #tpu.memory_space<vmem>>, %arg17: memref<32x128xf32, #tpu.memory_space<vmem>>, %arg18: memref<1x128xf32, #tpu.memory_space<vmem>>, %arg19: memref<7x2x128xf32, #tpu.memory_space<vmem>>, %arg20: memref<7x2x16xf32, #tpu.memory_space<vmem>>) attributes {dimension_semantics = [], scalar_prefetch = 0 : i64, scratch_operands = 0 : i64, tpu.core_type = #tpu.core_type<tc>} {
    %c0 = arith.constant 0 : index
    %c0_0 = arith.constant 0 : index
    %c0_1 = arith.constant 0 : index
    %0 = vector.load %arg0[%c0, %c0_0, %c0_1] : memref<2x16x32xf32, #tpu.memory_space<vmem>>, vector<2x16x32xf32>
    %1 = vector.shape_cast %0 : vector<2x16x32xf32> to vector<32x32xf32>
    %c0_2 = arith.constant 0 : index
    %c0_3 = arith.constant 0 : index
    %2 = vector.load %arg3[%c0_2, %c0_3] : memref<32x32xf32, #tpu.memory_space<vmem>>, vector<32x32xf32>
    %cst = arith.constant dense<0.000000e+00> : vector<32x32xf32>
    %3 = tpu.matmul %1, %2, %cst {dimension_numbers = #tpu.dot_dimension_numbers<[1], [0], [0], [1], [0, 0, 1, 1], [], []>} : vector<32x32xf32>, vector<32x32xf32>, vector<32x32xf32> -> vector<32x32xf32>
    %c0_4 = arith.constant 0 : index
    %c0_5 = arith.constant 0 : index
    %4 = vector.load %arg4[%c0_4, %c0_5] : memref<1x32xf32, #tpu.memory_space<vmem>>, vector<1x32xf32>
    %5 = vector.broadcast %4 : vector<1x32xf32> to vector<32x32xf32>
    %6 = arith.addf %3, %5 : vector<32x32xf32>
    %7 = vector.shape_cast %6 : vector<32x32xf32> to vector<2x16x32xf32>
    %cst_6 = arith.constant dense<0.000000e+00> : vector<2x32xf32>
    %8 = vector.multi_reduction <add>, %0, %cst_6 [1] : vector<2x16x32xf32> to vector<2x32xf32>
    %cst_7 = arith.constant 1.600000e+01 : f32
    %9 = vector.broadcast %cst_7 : f32 to vector<2x32xf32>
    %10 = arith.divf %8, %9 : vector<2x32xf32>
    %c0_8 = arith.constant 0 : index
    %c0_9 = arith.constant 0 : index
    %11 = vector.load %arg5[%c0_8, %c0_9] : memref<32x32xf32, #tpu.memory_space<vmem>>, vector<32x32xf32>
    %cst_10 = arith.constant dense<0.000000e+00> : vector<2x32xf32>
    %12 = tpu.matmul %10, %11, %cst_10 {dimension_numbers = #tpu.dot_dimension_numbers<[1], [0], [0], [1], [0, 0, 1, 1], [], []>} : vector<2x32xf32>, vector<32x32xf32>, vector<2x32xf32> -> vector<2x32xf32>
    %c0_11 = arith.constant 0 : index
    %c0_12 = arith.constant 0 : index
    %13 = vector.load %arg6[%c0_11, %c0_12] : memref<1x32xf32, #tpu.memory_space<vmem>>, vector<1x32xf32>
    %14 = vector.broadcast %13 : vector<1x32xf32> to vector<2x32xf32>
    %15 = arith.addf %12, %14 : vector<2x32xf32>
    %c0_13 = arith.constant 0 : index
    %c0_14 = arith.constant 0 : index
    %16 = vector.load %arg7[%c0_13, %c0_14] : memref<32x32xf32, #tpu.memory_space<vmem>>, vector<32x32xf32>
    %cst_15 = arith.constant dense<0.000000e+00> : vector<2x32xf32>
    %17 = tpu.matmul %10, %16, %cst_15 {dimension_numbers = #tpu.dot_dimension_numbers<[1], [0], [0], [1], [0, 0, 1, 1], [], []>} : vector<2x32xf32>, vector<32x32xf32>, vector<2x32xf32> -> vector<2x32xf32>
    %c0_16 = arith.constant 0 : index
    %c0_17 = arith.constant 0 : index
    %18 = vector.load %arg8[%c0_16, %c0_17] : memref<1x32xf32, #tpu.memory_space<vmem>>, vector<1x32xf32>
    %19 = vector.broadcast %18 : vector<1x32xf32> to vector<2x32xf32>
    %20 = arith.addf %17, %19 : vector<2x32xf32>
    %c0_18 = arith.constant 0 : index
    %c0_19 = arith.constant 0 : index
    %21 = vector.load %arg9[%c0_18, %c0_19] : memref<32x32xf32, #tpu.memory_space<vmem>>, vector<32x32xf32>
    %c0_20 = arith.constant 0 : index
    %c0_21 = arith.constant 0 : index
    %22 = vector.load %arg10[%c0_20, %c0_21] : memref<1x32xf32, #tpu.memory_space<vmem>>, vector<1x32xf32>
    %c0_22 = arith.constant 0 : index
    %c0_23 = arith.constant 0 : index
    %23 = vector.load %arg11[%c0_22, %c0_23] : memref<1x32xf32, #tpu.memory_space<vmem>>, vector<1x32xf32>
    %24 = vector.shape_cast %23 : vector<1x32xf32> to vector<1x1x32xf32>
    %c0_24 = arith.constant 0 : index
    %c0_25 = arith.constant 0 : index
    %25 = vector.load %arg12[%c0_24, %c0_25] : memref<1x1xf32, #tpu.memory_space<vmem>>, vector<1x1xf32>
    %26 = vector.extract %25[0, 0] : f32 from vector<1x1xf32>
    %c0_26 = arith.constant 0 : index
    %c0_27 = arith.constant 0 : index
    %27 = vector.load %arg13[%c0_26, %c0_27] : memref<32x32xf32, #tpu.memory_space<vmem>>, vector<32x32xf32>
    %c0_28 = arith.constant 0 : index
    %c0_29 = arith.constant 0 : index
    %28 = vector.load %arg14[%c0_28, %c0_29] : memref<1x32xf32, #tpu.memory_space<vmem>>, vector<1x32xf32>
    %c0_30 = arith.constant 0 : index
    %c0_31 = arith.constant 0 : index
    %29 = vector.load %arg15[%c0_30, %c0_31] : memref<80x128xf32, #tpu.memory_space<vmem>>, vector<80x128xf32>
    %c0_32 = arith.constant 0 : index
    %c0_33 = arith.constant 0 : index
    %30 = vector.load %arg16[%c0_32, %c0_33] : memref<1x128xf32, #tpu.memory_space<vmem>>, vector<1x128xf32>
    %c0_34 = arith.constant 0 : index
    %c0_35 = arith.constant 0 : index
    %31 = vector.load %arg17[%c0_34, %c0_35] : memref<32x128xf32, #tpu.memory_space<vmem>>, vector<32x128xf32>
    %c0_36 = arith.constant 0 : index
    %c0_37 = arith.constant 0 : index
    %32 = vector.load %arg18[%c0_36, %c0_37] : memref<1x128xf32, #tpu.memory_space<vmem>>, vector<1x128xf32>
    %c0_38 = arith.constant 0 : index
    %c0_39 = arith.constant 0 : index
    %33 = vector.load %arg2[%c0_38, %c0_39] : memref<2x1xi32, #tpu.memory_space<vmem>>, vector<2x1xi32>
    %cst_40 = arith.constant dense<0.000000e+00> : vector<2x32xf32>
    %34 = tpu.matmul %15, %21, %cst_40 {dimension_numbers = #tpu.dot_dimension_numbers<[1], [0], [0], [1], [0, 0, 1, 1], [], []>} : vector<2x32xf32>, vector<32x32xf32>, vector<2x32xf32> -> vector<2x32xf32>
    %35 = vector.broadcast %22 : vector<1x32xf32> to vector<2x32xf32>
    %36 = arith.addf %34, %35 : vector<2x32xf32>
    %37 = vector.shape_cast %36 : vector<2x32xf32> to vector<2x1x32xf32>
    %38 = vector.broadcast %37 : vector<2x1x32xf32> to vector<2x16x32xf32>
    %39 = arith.addf %7, %38 : vector<2x16x32xf32>
    %cst_41 = arith.constant 0.000000e+00 : f32
    %40 = vector.broadcast %cst_41 : f32 to vector<2x16x32xf32>
    %41 = arith.maximumf %39, %40 : vector<2x16x32xf32>
    %42 = vector.broadcast %24 : vector<1x1x32xf32> to vector<2x16x32xf32>
    %43 = arith.mulf %41, %42 : vector<2x16x32xf32>
    %cst_42 = arith.constant dense<0.000000e+00> : vector<2x16xf32>
    %44 = vector.multi_reduction <add>, %43, %cst_42 [2] : vector<2x16x32xf32> to vector<2x16xf32>
    %45 = vector.broadcast %26 : f32 to vector<2x16xf32>
    %46 = arith.addf %44, %45 : vector<2x16xf32>
    %cst_43 = arith.constant dense<0xFF800000> : vector<2xf32>
    %47 = vector.multi_reduction <maximumf>, %46, %cst_43 [1] : vector<2x16xf32> to vector<2xf32>
    %48 = vector.shape_cast %47 : vector<2xf32> to vector<2x1xf32>
    %49 = vector.broadcast %48 : vector<2x1xf32> to vector<2x16xf32>
    %50 = arith.subf %46, %49 : vector<2x16xf32>
    %51 = math.exp %50 : vector<2x16xf32>
    %cst_44 = arith.constant dense<0.000000e+00> : vector<2xf32>
    %52 = vector.multi_reduction <add>, %51, %cst_44 [1] : vector<2x16xf32> to vector<2xf32>
    %53 = vector.shape_cast %52 : vector<2xf32> to vector<2x1xf32>
    %54 = vector.broadcast %53 : vector<2x1xf32> to vector<2x16xf32>
    %55 = arith.divf %51, %54 : vector<2x16xf32>
    %56 = vector.shape_cast %55 : vector<2x16xf32> to vector<2x16x1xf32>
    %57 = vector.broadcast %56 : vector<2x16x1xf32> to vector<2x16x32xf32>
    %58 = arith.mulf %0, %57 : vector<2x16x32xf32>
    %cst_45 = arith.constant dense<0.000000e+00> : vector<2x32xf32>
    %59 = vector.multi_reduction <add>, %58, %cst_45 [1] : vector<2x16x32xf32> to vector<2x32xf32>
    %cst_46 = arith.constant dense<0.000000e+00> : vector<2x32xf32>
    %60 = tpu.matmul %15, %27, %cst_46 {dimension_numbers = #tpu.dot_dimension_numbers<[1], [0], [0], [1], [0, 0, 1, 1], [], []>} : vector<2x32xf32>, vector<32x32xf32>, vector<2x32xf32> -> vector<2x32xf32>
    %61 = vector.broadcast %28 : vector<1x32xf32> to vector<2x32xf32>
    %62 = arith.addf %60, %61 : vector<2x32xf32>
    %63 = arith.negf %62 : vector<2x32xf32>
    %64 = math.exp %63 : vector<2x32xf32>
    %cst_47 = arith.constant 1.000000e+00 : f32
    %65 = vector.broadcast %cst_47 : f32 to vector<2x32xf32>
    %66 = arith.addf %65, %64 : vector<2x32xf32>
    %67 = arith.divf %65, %66 : vector<2x32xf32>
    %68 = arith.mulf %67, %59 : vector<2x32xf32>
    %c0_48 = arith.constant 0 : index
    %c0_49 = arith.constant 0 : index
    %c0_50 = arith.constant 0 : index
    %69 = vector.load %arg1[%c0_48, %c0_49, %c0_50] : memref<7x2x16xf32, #tpu.memory_space<vmem>>, vector<1x2x16xf32>
    %70 = vector.shape_cast %69 : vector<1x2x16xf32> to vector<2x16xf32>
    %71 = tpu.concatenate %70, %68, %15 in 1 : vector<2x16xf32>, vector<2x32xf32>, vector<2x32xf32> -> vector<2x80xf32>
    %cst_51 = arith.constant dense<0.000000e+00> : vector<2x128xf32>
    %72 = tpu.matmul %71, %29, %cst_51 {dimension_numbers = #tpu.dot_dimension_numbers<[1], [0], [0], [1], [0, 0, 1, 1], [], []>} : vector<2x80xf32>, vector<80x128xf32>, vector<2x128xf32> -> vector<2x128xf32>
    %73 = vector.broadcast %30 : vector<1x128xf32> to vector<2x128xf32>
    %74 = arith.addf %72, %73 : vector<2x128xf32>
    %75 = vector.extract_strided_slice %74 {offsets = [0, 0], sizes = [2, 32], strides = [1, 1]} : vector<2x128xf32> to vector<2x32xf32>
    %76 = arith.negf %75 : vector<2x32xf32>
    %77 = math.exp %76 : vector<2x32xf32>
    %cst_52 = arith.constant 1.000000e+00 : f32
    %78 = vector.broadcast %cst_52 : f32 to vector<2x32xf32>
    %79 = arith.addf %78, %77 : vector<2x32xf32>
    %80 = arith.divf %78, %79 : vector<2x32xf32>
    %81 = vector.extract_strided_slice %74 {offsets = [0, 32], sizes = [2, 32], strides = [1, 1]} : vector<2x128xf32> to vector<2x32xf32>
    %82 = arith.negf %81 : vector<2x32xf32>
    %83 = math.exp %82 : vector<2x32xf32>
    %cst_53 = arith.constant 1.000000e+00 : f32
    %84 = vector.broadcast %cst_53 : f32 to vector<2x32xf32>
    %85 = arith.addf %84, %83 : vector<2x32xf32>
    %86 = arith.divf %84, %85 : vector<2x32xf32>
    %87 = vector.extract_strided_slice %74 {offsets = [0, 64], sizes = [2, 32], strides = [1, 1]} : vector<2x128xf32> to vector<2x32xf32>
    %88 = math.tanh %87 : vector<2x32xf32>
    %89 = vector.extract_strided_slice %74 {offsets = [0, 96], sizes = [2, 32], strides = [1, 1]} : vector<2x128xf32> to vector<2x32xf32>
    %90 = arith.negf %89 : vector<2x32xf32>
    %91 = math.exp %90 : vector<2x32xf32>
    %cst_54 = arith.constant 1.000000e+00 : f32
    %92 = vector.broadcast %cst_54 : f32 to vector<2x32xf32>
    %93 = arith.addf %92, %91 : vector<2x32xf32>
    %94 = arith.divf %92, %93 : vector<2x32xf32>
    %95 = arith.mulf %86, %20 : vector<2x32xf32>
    %96 = arith.mulf %80, %88 : vector<2x32xf32>
    %97 = arith.addf %95, %96 : vector<2x32xf32>
    %98 = math.tanh %97 : vector<2x32xf32>
    %99 = arith.mulf %94, %98 : vector<2x32xf32>
    %cst_55 = arith.constant dense<0.000000e+00> : vector<2x128xf32>
    %100 = tpu.matmul %99, %31, %cst_55 {dimension_numbers = #tpu.dot_dimension_numbers<[1], [0], [0], [1], [0, 0, 1, 1], [], []>} : vector<2x32xf32>, vector<32x128xf32>, vector<2x128xf32> -> vector<2x128xf32>
    %101 = vector.broadcast %32 : vector<1x128xf32> to vector<2x128xf32>
    %102 = arith.addf %100, %101 : vector<2x128xf32>
    %c0_i32 = arith.constant 0 : i32
    %103 = vector.broadcast %c0_i32 : i32 to vector<2x1xi32>
    %104 = arith.cmpi sgt, %33, %103 : vector<2x1xi32>
    %cst_56 = arith.constant 0.000000e+00 : f32
    %105 = vector.shape_cast %104 : vector<2x1xi1> to vector<2x1xi1>
    %106 = vector.broadcast %105 : vector<2x1xi1> to vector<2x128xi1>
    %107 = vector.broadcast %cst_56 : f32 to vector<2x128xf32>
    %108 = arith.select %106, %102, %107 : vector<2x128xi1>, vector<2x128xf32>
    %c0_57 = arith.constant 0 : index
    %c0_58 = arith.constant 0 : index
    %c0_59 = arith.constant 0 : index
    %109 = vector.load %arg19[%c0_57, %c0_58, %c0_59] : memref<7x2x128xf32, #tpu.memory_space<vmem>>, vector<1x2x128xf32>
    %110 = vector.shape_cast %109 : vector<1x2x128xf32> to vector<2x128xf32>
    %111 = vector.shape_cast %108 : vector<2x128xf32> to vector<1x2x128xf32>
    tpu.vector_store %arg19[%c0_57, %c0_58, %c0_59], %111 {strides = array<i32>} : memref<7x2x128xf32, #tpu.memory_space<vmem>>, vector<1x2x128xf32>,
    %cst_60 = arith.constant 0.000000e+00 : f32
    %112 = vector.shape_cast %104 : vector<2x1xi1> to vector<2x1xi1>
    %113 = vector.broadcast %112 : vector<2x1xi1> to vector<2x16xi1>
    %114 = vector.broadcast %cst_60 : f32 to vector<2x16xf32>
    %115 = arith.select %113, %55, %114 : vector<2x16xi1>, vector<2x16xf32>
    %c0_61 = arith.constant 0 : index
    %c0_62 = arith.constant 0 : index
    %c0_63 = arith.constant 0 : index
    %116 = vector.load %arg20[%c0_61, %c0_62, %c0_63] : memref<7x2x16xf32, #tpu.memory_space<vmem>>, vector<1x2x16xf32>
    %117 = vector.shape_cast %116 : vector<1x2x16xf32> to vector<2x16xf32>
    %118 = vector.shape_cast %115 : vector<2x16xf32> to vector<1x2x16xf32>
    tpu.vector_store %arg20[%c0_61, %c0_62, %c0_63], %118 {strides = array<i32>} : memref<7x2x16xf32, #tpu.memory_space<vmem>>, vector<1x2x16xf32>,
    %119 = vector.shape_cast %104 : vector<2x1xi1> to vector<2x1xi1>
    %120 = vector.broadcast %119 : vector<2x1xi1> to vector<2x32xi1>
    %121 = arith.select %120, %99, %15 : vector<2x32xi1>, vector<2x32xf32>
    %122 = vector.shape_cast %104 : vector<2x1xi1> to vector<2x1xi1>
    %123 = vector.broadcast %122 : vector<2x1xi1> to vector<2x32xi1>
    %124 = arith.select %123, %97, %20 : vector<2x32xi1>, vector<2x32xf32>
    %cst_64 = arith.constant dense<0.000000e+00> : vector<2x32xf32>
    %125 = tpu.matmul %121, %21, %cst_64 {dimension_numbers = #tpu.dot_dimension_numbers<[1], [0], [0], [1], [0, 0, 1, 1], [], []>} : vector<2x32xf32>, vector<32x32xf32>, vector<2x32xf32> -> vector<2x32xf32>
    %126 = vector.broadcast %22 : vector<1x32xf32> to vector<2x32xf32>
    %127 = arith.addf %125, %126 : vector<2x32xf32>
    %128 = vector.shape_cast %127 : vector<2x32xf32> to vector<2x1x32xf32>
    %129 = vector.broadcast %128 : vector<2x1x32xf32> to vector<2x16x32xf32>
    %130 = arith.addf %7, %129 : vector<2x16x32xf32>
    %cst_65 = arith.constant 0.000000e+00 : f32
    %131 = vector.broadcast %cst_65 : f32 to vector<2x16x32xf32>
    %132 = arith.maximumf %130, %131 : vector<2x16x32xf32>
    %133 = vector.broadcast %24 : vector<1x1x32xf32> to vector<2x16x32xf32>
    %134 = arith.mulf %132, %133 : vector<2x16x32xf32>
    %cst_66 = arith.constant dense<0.000000e+00> : vector<2x16xf32>
    %135 = vector.multi_reduction <add>, %134, %cst_66 [2] : vector<2x16x32xf32> to vector<2x16xf32>
    %136 = vector.broadcast %26 : f32 to vector<2x16xf32>
    %137 = arith.addf %135, %136 : vector<2x16xf32>
    %cst_67 = arith.constant dense<0xFF800000> : vector<2xf32>
    %138 = vector.multi_reduction <maximumf>, %137, %cst_67 [1] : vector<2x16xf32> to vector<2xf32>
    %139 = vector.shape_cast %138 : vector<2xf32> to vector<2x1xf32>
    %140 = vector.broadcast %139 : vector<2x1xf32> to vector<2x16xf32>
    %141 = arith.subf %137, %140 : vector<2x16xf32>
    %142 = math.exp %141 : vector<2x16xf32>
    %cst_68 = arith.constant dense<0.000000e+00> : vector<2xf32>
    %143 = vector.multi_reduction <add>, %142, %cst_68 [1] : vector<2x16xf32> to vector<2xf32>
    %144 = vector.shape_cast %143 : vector<2xf32> to vector<2x1xf32>
    %145 = vector.broadcast %144 : vector<2x1xf32> to vector<2x16xf32>
    %146 = arith.divf %142, %145 : vector<2x16xf32>
    %147 = vector.shape_cast %146 : vector<2x16xf32> to vector<2x16x1xf32>
    %148 = vector.broadcast %147 : vector<2x16x1xf32> to vector<2x16x32xf32>
    %149 = arith.mulf %0, %148 : vector<2x16x32xf32>
    %cst_69 = arith.constant dense<0.000000e+00> : vector<2x32xf32>
    %150 = vector.multi_reduction <add>, %149, %cst_69 [1] : vector<2x16x32xf32> to vector<2x32xf32>
    %cst_70 = arith.constant dense<0.000000e+00> : vector<2x32xf32>
    %151 = tpu.matmul %121, %27, %cst_70 {dimension_numbers = #tpu.dot_dimension_numbers<[1], [0], [0], [1], [0, 0, 1, 1], [], []>} : vector<2x32xf32>, vector<32x32xf32>, vector<2x32xf32> -> vector<2x32xf32>
    %152 = vector.broadcast %28 : vector<1x32xf32> to vector<2x32xf32>
    %153 = arith.addf %151, %152 : vector<2x32xf32>
    %154 = arith.negf %153 : vector<2x32xf32>
    %155 = math.exp %154 : vector<2x32xf32>
    %cst_71 = arith.constant 1.000000e+00 : f32
    %156 = vector.broadcast %cst_71 : f32 to vector<2x32xf32>
    %157 = arith.addf %156, %155 : vector<2x32xf32>
    %158 = arith.divf %156, %157 : vector<2x32xf32>
    %159 = arith.mulf %158, %150 : vector<2x32xf32>
    %c1 = arith.constant 1 : index
    %c0_72 = arith.constant 0 : index
    %c0_73 = arith.constant 0 : index
    %160 = vector.load %arg1[%c1, %c0_72, %c0_73] : memref<7x2x16xf32, #tpu.memory_space<vmem>>, vector<1x2x16xf32>
    %161 = vector.shape_cast %160 : vector<1x2x16xf32> to vector<2x16xf32>
    %162 = tpu.concatenate %161, %159, %121 in 1 : vector<2x16xf32>, vector<2x32xf32>, vector<2x32xf32> -> vector<2x80xf32>
    %cst_74 = arith.constant dense<0.000000e+00> : vector<2x128xf32>
    %163 = tpu.matmul %162, %29, %cst_74 {dimension_numbers = #tpu.dot_dimension_numbers<[1], [0], [0], [1], [0, 0, 1, 1], [], []>} : vector<2x80xf32>, vector<80x128xf32>, vector<2x128xf32> -> vector<2x128xf32>
    %164 = vector.broadcast %30 : vector<1x128xf32> to vector<2x128xf32>
    %165 = arith.addf %163, %164 : vector<2x128xf32>
    %166 = vector.extract_strided_slice %165 {offsets = [0, 0], sizes = [2, 32], strides = [1, 1]} : vector<2x128xf32> to vector<2x32xf32>
    %167 = arith.negf %166 : vector<2x32xf32>
    %168 = math.exp %167 : vector<2x32xf32>
    %cst_75 = arith.constant 1.000000e+00 : f32
    %169 = vector.broadcast %cst_75 : f32 to vector<2x32xf32>
    %170 = arith.addf %169, %168 : vector<2x32xf32>
    %171 = arith.divf %169, %170 : vector<2x32xf32>
    %172 = vector.extract_strided_slice %165 {offsets = [0, 32], sizes = [2, 32], strides = [1, 1]} : vector<2x128xf32> to vector<2x32xf32>
    %173 = arith.negf %172 : vector<2x32xf32>
    %174 = math.exp %173 : vector<2x32xf32>
    %cst_76 = arith.constant 1.000000e+00 : f32
    %175 = vector.broadcast %cst_76 : f32 to vector<2x32xf32>
    %176 = arith.addf %175, %174 : vector<2x32xf32>
    %177 = arith.divf %175, %176 : vector<2x32xf32>
    %178 = vector.extract_strided_slice %165 {offsets = [0, 64], sizes = [2, 32], strides = [1, 1]} : vector<2x128xf32> to vector<2x32xf32>
    %179 = math.tanh %178 : vector<2x32xf32>
    %180 = vector.extract_strided_slice %165 {offsets = [0, 96], sizes = [2, 32], strides = [1, 1]} : vector<2x128xf32> to vector<2x32xf32>
    %181 = arith.negf %180 : vector<2x32xf32>
    %182 = math.exp %181 : vector<2x32xf32>
    %cst_77 = arith.constant 1.000000e+00 : f32
    %183 = vector.broadcast %cst_77 : f32 to vector<2x32xf32>
    %184 = arith.addf %183, %182 : vector<2x32xf32>
    %185 = arith.divf %183, %184 : vector<2x32xf32>
    %186 = arith.mulf %177, %124 : vector<2x32xf32>
    %187 = arith.mulf %171, %179 : vector<2x32xf32>
    %188 = arith.addf %186, %187 : vector<2x32xf32>
    %189 = math.tanh %188 : vector<2x32xf32>
    %190 = arith.mulf %185, %189 : vector<2x32xf32>
    %cst_78 = arith.constant dense<0.000000e+00> : vector<2x128xf32>
    %191 = tpu.matmul %190, %31, %cst_78 {dimension_numbers = #tpu.dot_dimension_numbers<[1], [0], [0], [1], [0, 0, 1, 1], [], []>} : vector<2x32xf32>, vector<32x128xf32>, vector<2x128xf32> -> vector<2x128xf32>
    %192 = vector.broadcast %32 : vector<1x128xf32> to vector<2x128xf32>
    %193 = arith.addf %191, %192 : vector<2x128xf32>
    %c1_i32 = arith.constant 1 : i32
    %194 = vector.broadcast %c1_i32 : i32 to vector<2x1xi32>
    %195 = arith.cmpi sgt, %33, %194 : vector<2x1xi32>
    %cst_79 = arith.constant 0.000000e+00 : f32
    %196 = vector.shape_cast %195 : vector<2x1xi1> to vector<2x1xi1>
    %197 = vector.broadcast %196 : vector<2x1xi1> to vector<2x128xi1>
    %198 = vector.broadcast %cst_79 : f32 to vector<2x128xf32>
    %199 = arith.select %197, %193, %198 : vector<2x128xi1>, vector<2x128xf32>
    %c1_80 = arith.constant 1 : index
    %c0_81 = arith.constant 0 : index
    %c0_82 = arith.constant 0 : index
    %200 = vector.load %arg19[%c1_80, %c0_81, %c0_82] : memref<7x2x128xf32, #tpu.memory_space<vmem>>, vector<1x2x128xf32>
    %201 = vector.shape_cast %200 : vector<1x2x128xf32> to vector<2x128xf32>
    %202 = vector.shape_cast %199 : vector<2x128xf32> to vector<1x2x128xf32>
    tpu.vector_store %arg19[%c1_80, %c0_81, %c0_82], %202 {strides = array<i32>} : memref<7x2x128xf32, #tpu.memory_space<vmem>>, vector<1x2x128xf32>,
    %cst_83 = arith.constant 0.000000e+00 : f32
    %203 = vector.shape_cast %195 : vector<2x1xi1> to vector<2x1xi1>
    %204 = vector.broadcast %203 : vector<2x1xi1> to vector<2x16xi1>
    %205 = vector.broadcast %cst_83 : f32 to vector<2x16xf32>
    %206 = arith.select %204, %146, %205 : vector<2x16xi1>, vector<2x16xf32>
    %c1_84 = arith.constant 1 : index
    %c0_85 = arith.constant 0 : index
    %c0_86 = arith.constant 0 : index
    %207 = vector.load %arg20[%c1_84, %c0_85, %c0_86] : memref<7x2x16xf32, #tpu.memory_space<vmem>>, vector<1x2x16xf32>
    %208 = vector.shape_cast %207 : vector<1x2x16xf32> to vector<2x16xf32>
    %209 = vector.shape_cast %206 : vector<2x16xf32> to vector<1x2x16xf32>
    tpu.vector_store %arg20[%c1_84, %c0_85, %c0_86], %209 {strides = array<i32>} : memref<7x2x16xf32, #tpu.memory_space<vmem>>, vector<1x2x16xf32>,
    %210 = vector.shape_cast %195 : vector<2x1xi1> to vector<2x1xi1>
    %211 = vector.broadcast %210 : vector<2x1xi1> to vector<2x32xi1>
    %212 = arith.select %211, %190, %121 : vector<2x32xi1>, vector<2x32xf32>
    %213 = vector.shape_cast %195 : vector<2x1xi1> to vector<2x1xi1>
    %214 = vector.broadcast %213 : vector<2x1xi1> to vector<2x32xi1>
    %215 = arith.select %214, %188, %124 : vector<2x32xi1>, vector<2x32xf32>
    %cst_87 = arith.constant dense<0.000000e+00> : vector<2x32xf32>
    %216 = tpu.matmul %212, %21, %cst_87 {dimension_numbers = #tpu.dot_dimension_numbers<[1], [0], [0], [1], [0, 0, 1, 1], [], []>} : vector<2x32xf32>, vector<32x32xf32>, vector<2x32xf32> -> vector<2x32xf32>
    %217 = vector.broadcast %22 : vector<1x32xf32> to vector<2x32xf32>
    %218 = arith.addf %216, %217 : vector<2x32xf32>
    %219 = vector.shape_cast %218 : vector<2x32xf32> to vector<2x1x32xf32>
    %220 = vector.broadcast %219 : vector<2x1x32xf32> to vector<2x16x32xf32>
    %221 = arith.addf %7, %220 : vector<2x16x32xf32>
    %cst_88 = arith.constant 0.000000e+00 : f32
    %222 = vector.broadcast %cst_88 : f32 to vector<2x16x32xf32>
    %223 = arith.maximumf %221, %222 : vector<2x16x32xf32>
    %224 = vector.broadcast %24 : vector<1x1x32xf32> to vector<2x16x32xf32>
    %225 = arith.mulf %223, %224 : vector<2x16x32xf32>
    %cst_89 = arith.constant dense<0.000000e+00> : vector<2x16xf32>
    %226 = vector.multi_reduction <add>, %225, %cst_89 [2] : vector<2x16x32xf32> to vector<2x16xf32>
    %227 = vector.broadcast %26 : f32 to vector<2x16xf32>
    %228 = arith.addf %226, %227 : vector<2x16xf32>
    %cst_90 = arith.constant dense<0xFF800000> : vector<2xf32>
    %229 = vector.multi_reduction <maximumf>, %228, %cst_90 [1] : vector<2x16xf32> to vector<2xf32>
    %230 = vector.shape_cast %229 : vector<2xf32> to vector<2x1xf32>
    %231 = vector.broadcast %230 : vector<2x1xf32> to vector<2x16xf32>
    %232 = arith.subf %228, %231 : vector<2x16xf32>
    %233 = math.exp %232 : vector<2x16xf32>
    %cst_91 = arith.constant dense<0.000000e+00> : vector<2xf32>
    %234 = vector.multi_reduction <add>, %233, %cst_91 [1] : vector<2x16xf32> to vector<2xf32>
    %235 = vector.shape_cast %234 : vector<2xf32> to vector<2x1xf32>
    %236 = vector.broadcast %235 : vector<2x1xf32> to vector<2x16xf32>
    %237 = arith.divf %233, %236 : vector<2x16xf32>
    %238 = vector.shape_cast %237 : vector<2x16xf32> to vector<2x16x1xf32>
    %239 = vector.broadcast %238 : vector<2x16x1xf32> to vector<2x16x32xf32>
    %240 = arith.mulf %0, %239 : vector<2x16x32xf32>
    %cst_92 = arith.constant dense<0.000000e+00> : vector<2x32xf32>
    %241 = vector.multi_reduction <add>, %240, %cst_92 [1] : vector<2x16x32xf32> to vector<2x32xf32>
    %cst_93 = arith.constant dense<0.000000e+00> : vector<2x32xf32>
    %242 = tpu.matmul %212, %27, %cst_93 {dimension_numbers = #tpu.dot_dimension_numbers<[1], [0], [0], [1], [0, 0, 1, 1], [], []>} : vector<2x32xf32>, vector<32x32xf32>, vector<2x32xf32> -> vector<2x32xf32>
    %243 = vector.broadcast %28 : vector<1x32xf32> to vector<2x32xf32>
    %244 = arith.addf %242, %243 : vector<2x32xf32>
    %245 = arith.negf %244 : vector<2x32xf32>
    %246 = math.exp %245 : vector<2x32xf32>
    %cst_94 = arith.constant 1.000000e+00 : f32
    %247 = vector.broadcast %cst_94 : f32 to vector<2x32xf32>
    %248 = arith.addf %247, %246 : vector<2x32xf32>
    %249 = arith.divf %247, %248 : vector<2x32xf32>
    %250 = arith.mulf %249, %241 : vector<2x32xf32>
    %c2 = arith.constant 2 : index
    %c0_95 = arith.constant 0 : index
    %c0_96 = arith.constant 0 : index
    %251 = vector.load %arg1[%c2, %c0_95, %c0_96] : memref<7x2x16xf32, #tpu.memory_space<vmem>>, vector<1x2x16xf32>
    %252 = vector.shape_cast %251 : vector<1x2x16xf32> to vector<2x16xf32>
    %253 = tpu.concatenate %252, %250, %212 in 1 : vector<2x16xf32>, vector<2x32xf32>, vector<2x32xf32> -> vector<2x80xf32>
    %cst_97 = arith.constant dense<0.000000e+00> : vector<2x128xf32>
    %254 = tpu.matmul %253, %29, %cst_97 {dimension_numbers = #tpu.dot_dimension_numbers<[1], [0], [0], [1], [0, 0, 1, 1], [], []>} : vector<2x80xf32>, vector<80x128xf32>, vector<2x128xf32> -> vector<2x128xf32>
    %255 = vector.broadcast %30 : vector<1x128xf32> to vector<2x128xf32>
    %256 = arith.addf %254, %255 : vector<2x128xf32>
    %257 = vector.extract_strided_slice %256 {offsets = [0, 0], sizes = [2, 32], strides = [1, 1]} : vector<2x128xf32> to vector<2x32xf32>
    %258 = arith.negf %257 : vector<2x32xf32>
    %259 = math.exp %258 : vector<2x32xf32>
    %cst_98 = arith.constant 1.000000e+00 : f32
    %260 = vector.broadcast %cst_98 : f32 to vector<2x32xf32>
    %261 = arith.addf %260, %259 : vector<2x32xf32>
    %262 = arith.divf %260, %261 : vector<2x32xf32>
    %263 = vector.extract_strided_slice %256 {offsets = [0, 32], sizes = [2, 32], strides = [1, 1]} : vector<2x128xf32> to vector<2x32xf32>
    %264 = arith.negf %263 : vector<2x32xf32>
    %265 = math.exp %264 : vector<2x32xf32>
    %cst_99 = arith.constant 1.000000e+00 : f32
    %266 = vector.broadcast %cst_99 : f32 to vector<2x32xf32>
    %267 = arith.addf %266, %265 : vector<2x32xf32>
    %268 = arith.divf %266, %267 : vector<2x32xf32>
    %269 = vector.extract_strided_slice %256 {offsets = [0, 64], sizes = [2, 32], strides = [1, 1]} : vector<2x128xf32> to vector<2x32xf32>
    %270 = math.tanh %269 : vector<2x32xf32>
    %271 = vector.extract_strided_slice %256 {offsets = [0, 96], sizes = [2, 32], strides = [1, 1]} : vector<2x128xf32> to vector<2x32xf32>
    %272 = arith.negf %271 : vector<2x32xf32>
    %273 = math.exp %272 : vector<2x32xf32>
    %cst_100 = arith.constant 1.000000e+00 : f32
    %274 = vector.broadcast %cst_100 : f32 to vector<2x32xf32>
    %275 = arith.addf %274, %273 : vector<2x32xf32>
    %276 = arith.divf %274, %275 : vector<2x32xf32>
    %277 = arith.mulf %268, %215 : vector<2x32xf32>
    %278 = arith.mulf %262, %270 : vector<2x32xf32>
    %279 = arith.addf %277, %278 : vector<2x32xf32>
    %280 = math.tanh %279 : vector<2x32xf32>
    %281 = arith.mulf %276, %280 : vector<2x32xf32>
    %cst_101 = arith.constant dense<0.000000e+00> : vector<2x128xf32>
    %282 = tpu.matmul %281, %31, %cst_101 {dimension_numbers = #tpu.dot_dimension_numbers<[1], [0], [0], [1], [0, 0, 1, 1], [], []>} : vector<2x32xf32>, vector<32x128xf32>, vector<2x128xf32> -> vector<2x128xf32>
    %283 = vector.broadcast %32 : vector<1x128xf32> to vector<2x128xf32>
    %284 = arith.addf %282, %283 : vector<2x128xf32>
    %c2_i32 = arith.constant 2 : i32
    %285 = vector.broadcast %c2_i32 : i32 to vector<2x1xi32>
    %286 = arith.cmpi sgt, %33, %285 : vector<2x1xi32>
    %cst_102 = arith.constant 0.000000e+00 : f32
    %287 = vector.shape_cast %286 : vector<2x1xi1> to vector<2x1xi1>
    %288 = vector.broadcast %287 : vector<2x1xi1> to vector<2x128xi1>
    %289 = vector.broadcast %cst_102 : f32 to vector<2x128xf32>
    %290 = arith.select %288, %284, %289 : vector<2x128xi1>, vector<2x128xf32>
    %c2_103 = arith.constant 2 : index
    %c0_104 = arith.constant 0 : index
    %c0_105 = arith.constant 0 : index
    %291 = vector.load %arg19[%c2_103, %c0_104, %c0_105] : memref<7x2x128xf32, #tpu.memory_space<vmem>>, vector<1x2x128xf32>
    %292 = vector.shape_cast %291 : vector<1x2x128xf32> to vector<2x128xf32>
    %293 = vector.shape_cast %290 : vector<2x128xf32> to vector<1x2x128xf32>
    tpu.vector_store %arg19[%c2_103, %c0_104, %c0_105], %293 {strides = array<i32>} : memref<7x2x128xf32, #tpu.memory_space<vmem>>, vector<1x2x128xf32>,
    %cst_106 = arith.constant 0.000000e+00 : f32
    %294 = vector.shape_cast %286 : vector<2x1xi1> to vector<2x1xi1>
    %295 = vector.broadcast %294 : vector<2x1xi1> to vector<2x16xi1>
    %296 = vector.broadcast %cst_106 : f32 to vector<2x16xf32>
    %297 = arith.select %295, %237, %296 : vector<2x16xi1>, vector<2x16xf32>
    %c2_107 = arith.constant 2 : index
    %c0_108 = arith.constant 0 : index
    %c0_109 = arith.constant 0 : index
    %298 = vector.load %arg20[%c2_107, %c0_108, %c0_109] : memref<7x2x16xf32, #tpu.memory_space<vmem>>, vector<1x2x16xf32>
    %299 = vector.shape_cast %298 : vector<1x2x16xf32> to vector<2x16xf32>
    %300 = vector.shape_cast %297 : vector<2x16xf32> to vector<1x2x16xf32>
    tpu.vector_store %arg20[%c2_107, %c0_108, %c0_109], %300 {strides = array<i32>} : memref<7x2x16xf32, #tpu.memory_space<vmem>>, vector<1x2x16xf32>,
    %301 = vector.shape_cast %286 : vector<2x1xi1> to vector<2x1xi1>
    %302 = vector.broadcast %301 : vector<2x1xi1> to vector<2x32xi1>
    %303 = arith.select %302, %281, %212 : vector<2x32xi1>, vector<2x32xf32>
    %304 = vector.shape_cast %286 : vector<2x1xi1> to vector<2x1xi1>
    %305 = vector.broadcast %304 : vector<2x1xi1> to vector<2x32xi1>
    %306 = arith.select %305, %279, %215 : vector<2x32xi1>, vector<2x32xf32>
    %cst_110 = arith.constant dense<0.000000e+00> : vector<2x32xf32>
    %307 = tpu.matmul %303, %21, %cst_110 {dimension_numbers = #tpu.dot_dimension_numbers<[1], [0], [0], [1], [0, 0, 1, 1], [], []>} : vector<2x32xf32>, vector<32x32xf32>, vector<2x32xf32> -> vector<2x32xf32>
    %308 = vector.broadcast %22 : vector<1x32xf32> to vector<2x32xf32>
    %309 = arith.addf %307, %308 : vector<2x32xf32>
    %310 = vector.shape_cast %309 : vector<2x32xf32> to vector<2x1x32xf32>
    %311 = vector.broadcast %310 : vector<2x1x32xf32> to vector<2x16x32xf32>
    %312 = arith.addf %7, %311 : vector<2x16x32xf32>
    %cst_111 = arith.constant 0.000000e+00 : f32
    %313 = vector.broadcast %cst_111 : f32 to vector<2x16x32xf32>
    %314 = arith.maximumf %312, %313 : vector<2x16x32xf32>
    %315 = vector.broadcast %24 : vector<1x1x32xf32> to vector<2x16x32xf32>
    %316 = arith.mulf %314, %315 : vector<2x16x32xf32>
    %cst_112 = arith.constant dense<0.000000e+00> : vector<2x16xf32>
    %317 = vector.multi_reduction <add>, %316, %cst_112 [2] : vector<2x16x32xf32> to vector<2x16xf32>
    %318 = vector.broadcast %26 : f32 to vector<2x16xf32>
    %319 = arith.addf %317, %318 : vector<2x16xf32>
    %cst_113 = arith.constant dense<0xFF800000> : vector<2xf32>
    %320 = vector.multi_reduction <maximumf>, %319, %cst_113 [1] : vector<2x16xf32> to vector<2xf32>
    %321 = vector.shape_cast %320 : vector<2xf32> to vector<2x1xf32>
    %322 = vector.broadcast %321 : vector<2x1xf32> to vector<2x16xf32>
    %323 = arith.subf %319, %322 : vector<2x16xf32>
    %324 = math.exp %323 : vector<2x16xf32>
    %cst_114 = arith.constant dense<0.000000e+00> : vector<2xf32>
    %325 = vector.multi_reduction <add>, %324, %cst_114 [1] : vector<2x16xf32> to vector<2xf32>
    %326 = vector.shape_cast %325 : vector<2xf32> to vector<2x1xf32>
    %327 = vector.broadcast %326 : vector<2x1xf32> to vector<2x16xf32>
    %328 = arith.divf %324, %327 : vector<2x16xf32>
    %329 = vector.shape_cast %328 : vector<2x16xf32> to vector<2x16x1xf32>
    %330 = vector.broadcast %329 : vector<2x16x1xf32> to vector<2x16x32xf32>
    %331 = arith.mulf %0, %330 : vector<2x16x32xf32>
    %cst_115 = arith.constant dense<0.000000e+00> : vector<2x32xf32>
    %332 = vector.multi_reduction <add>, %331, %cst_115 [1] : vector<2x16x32xf32> to vector<2x32xf32>
    %cst_116 = arith.constant dense<0.000000e+00> : vector<2x32xf32>
    %333 = tpu.matmul %303, %27, %cst_116 {dimension_numbers = #tpu.dot_dimension_numbers<[1], [0], [0], [1], [0, 0, 1, 1], [], []>} : vector<2x32xf32>, vector<32x32xf32>, vector<2x32xf32> -> vector<2x32xf32>
    %334 = vector.broadcast %28 : vector<1x32xf32> to vector<2x32xf32>
    %335 = arith.addf %333, %334 : vector<2x32xf32>
    %336 = arith.negf %335 : vector<2x32xf32>
    %337 = math.exp %336 : vector<2x32xf32>
    %cst_117 = arith.constant 1.000000e+00 : f32
    %338 = vector.broadcast %cst_117 : f32 to vector<2x32xf32>
    %339 = arith.addf %338, %337 : vector<2x32xf32>
    %340 = arith.divf %338, %339 : vector<2x32xf32>
    %341 = arith.mulf %340, %332 : vector<2x32xf32>
    %c3 = arith.constant 3 : index
    %c0_118 = arith.constant 0 : index
    %c0_119 = arith.constant 0 : index
    %342 = vector.load %arg1[%c3, %c0_118, %c0_119] : memref<7x2x16xf32, #tpu.memory_space<vmem>>, vector<1x2x16xf32>
    %343 = vector.shape_cast %342 : vector<1x2x16xf32> to vector<2x16xf32>
    %344 = tpu.concatenate %343, %341, %303 in 1 : vector<2x16xf32>, vector<2x32xf32>, vector<2x32xf32> -> vector<2x80xf32>
    %cst_120 = arith.constant dense<0.000000e+00> : vector<2x128xf32>
    %345 = tpu.matmul %344, %29, %cst_120 {dimension_numbers = #tpu.dot_dimension_numbers<[1], [0], [0], [1], [0, 0, 1, 1], [], []>} : vector<2x80xf32>, vector<80x128xf32>, vector<2x128xf32> -> vector<2x128xf32>
    %346 = vector.broadcast %30 : vector<1x128xf32> to vector<2x128xf32>
    %347 = arith.addf %345, %346 : vector<2x128xf32>
    %348 = vector.extract_strided_slice %347 {offsets = [0, 0], sizes = [2, 32], strides = [1, 1]} : vector<2x128xf32> to vector<2x32xf32>
    %349 = arith.negf %348 : vector<2x32xf32>
    %350 = math.exp %349 : vector<2x32xf32>
    %cst_121 = arith.constant 1.000000e+00 : f32
    %351 = vector.broadcast %cst_121 : f32 to vector<2x32xf32>
    %352 = arith.addf %351, %350 : vector<2x32xf32>
    %353 = arith.divf %351, %352 : vector<2x32xf32>
    %354 = vector.extract_strided_slice %347 {offsets = [0, 32], sizes = [2, 32], strides = [1, 1]} : vector<2x128xf32> to vector<2x32xf32>
    %355 = arith.negf %354 : vector<2x32xf32>
    %356 = math.exp %355 : vector<2x32xf32>
    %cst_122 = arith.constant 1.000000e+00 : f32
    %357 = vector.broadcast %cst_122 : f32 to vector<2x32xf32>
    %358 = arith.addf %357, %356 : vector<2x32xf32>
    %359 = arith.divf %357, %358 : vector<2x32xf32>
    %360 = vector.extract_strided_slice %347 {offsets = [0, 64], sizes = [2, 32], strides = [1, 1]} : vector<2x128xf32> to vector<2x32xf32>
    %361 = math.tanh %360 : vector<2x32xf32>
    %362 = vector.extract_strided_slice %347 {offsets = [0, 96], sizes = [2, 32], strides = [1, 1]} : vector<2x128xf32> to vector<2x32xf32>
    %363 = arith.negf %362 : vector<2x32xf32>
    %364 = math.exp %363 : vector<2x32xf32>
    %cst_123 = arith.constant 1.000000e+00 : f32
    %365 = vector.broadcast %cst_123 : f32 to vector<2x32xf32>
    %366 = arith.addf %365, %364 : vector<2x32xf32>
    %367 = arith.divf %365, %366 : vector<2x32xf32>
    %368 = arith.mulf %359, %306 : vector<2x32xf32>
    %369 = arith.mulf %353, %361 : vector<2x32xf32>
    %370 = arith.addf %368, %369 : vector<2x32xf32>
    %371 = math.tanh %370 : vector<2x32xf32>
    %372 = arith.mulf %367, %371 : vector<2x32xf32>
    %cst_124 = arith.constant dense<0.000000e+00> : vector<2x128xf32>
    %373 = tpu.matmul %372, %31, %cst_124 {dimension_numbers = #tpu.dot_dimension_numbers<[1], [0], [0], [1], [0, 0, 1, 1], [], []>} : vector<2x32xf32>, vector<32x128xf32>, vector<2x128xf32> -> vector<2x128xf32>
    %374 = vector.broadcast %32 : vector<1x128xf32> to vector<2x128xf32>
    %375 = arith.addf %373, %374 : vector<2x128xf32>
    %c3_i32 = arith.constant 3 : i32
    %376 = vector.broadcast %c3_i32 : i32 to vector<2x1xi32>
    %377 = arith.cmpi sgt, %33, %376 : vector<2x1xi32>
    %cst_125 = arith.constant 0.000000e+00 : f32
    %378 = vector.shape_cast %377 : vector<2x1xi1> to vector<2x1xi1>
    %379 = vector.broadcast %378 : vector<2x1xi1> to vector<2x128xi1>
    %380 = vector.broadcast %cst_125 : f32 to vector<2x128xf32>
    %381 = arith.select %379, %375, %380 : vector<2x128xi1>, vector<2x128xf32>
    %c3_126 = arith.constant 3 : index
    %c0_127 = arith.constant 0 : index
    %c0_128 = arith.constant 0 : index
    %382 = vector.load %arg19[%c3_126, %c0_127, %c0_128] : memref<7x2x128xf32, #tpu.memory_space<vmem>>, vector<1x2x128xf32>
    %383 = vector.shape_cast %382 : vector<1x2x128xf32> to vector<2x128xf32>
    %384 = vector.shape_cast %381 : vector<2x128xf32> to vector<1x2x128xf32>
    tpu.vector_store %arg19[%c3_126, %c0_127, %c0_128], %384 {strides = array<i32>} : memref<7x2x128xf32, #tpu.memory_space<vmem>>, vector<1x2x128xf32>,
    %cst_129 = arith.constant 0.000000e+00 : f32
    %385 = vector.shape_cast %377 : vector<2x1xi1> to vector<2x1xi1>
    %386 = vector.broadcast %385 : vector<2x1xi1> to vector<2x16xi1>
    %387 = vector.broadcast %cst_129 : f32 to vector<2x16xf32>
    %388 = arith.select %386, %328, %387 : vector<2x16xi1>, vector<2x16xf32>
    %c3_130 = arith.constant 3 : index
    %c0_131 = arith.constant 0 : index
    %c0_132 = arith.constant 0 : index
    %389 = vector.load %arg20[%c3_130, %c0_131, %c0_132] : memref<7x2x16xf32, #tpu.memory_space<vmem>>, vector<1x2x16xf32>
    %390 = vector.shape_cast %389 : vector<1x2x16xf32> to vector<2x16xf32>
    %391 = vector.shape_cast %388 : vector<2x16xf32> to vector<1x2x16xf32>
    tpu.vector_store %arg20[%c3_130, %c0_131, %c0_132], %391 {strides = array<i32>} : memref<7x2x16xf32, #tpu.memory_space<vmem>>, vector<1x2x16xf32>,
    %392 = vector.shape_cast %377 : vector<2x1xi1> to vector<2x1xi1>
    %393 = vector.broadcast %392 : vector<2x1xi1> to vector<2x32xi1>
    %394 = arith.select %393, %372, %303 : vector<2x32xi1>, vector<2x32xf32>
    %395 = vector.shape_cast %377 : vector<2x1xi1> to vector<2x1xi1>
    %396 = vector.broadcast %395 : vector<2x1xi1> to vector<2x32xi1>
    %397 = arith.select %396, %370, %306 : vector<2x32xi1>, vector<2x32xf32>
    %cst_133 = arith.constant dense<0.000000e+00> : vector<2x32xf32>
    %398 = tpu.matmul %394, %21, %cst_133 {dimension_numbers = #tpu.dot_dimension_numbers<[1], [0], [0], [1], [0, 0, 1, 1], [], []>} : vector<2x32xf32>, vector<32x32xf32>, vector<2x32xf32> -> vector<2x32xf32>
    %399 = vector.broadcast %22 : vector<1x32xf32> to vector<2x32xf32>
    %400 = arith.addf %398, %399 : vector<2x32xf32>
    %401 = vector.shape_cast %400 : vector<2x32xf32> to vector<2x1x32xf32>
    %402 = vector.broadcast %401 : vector<2x1x32xf32> to vector<2x16x32xf32>
    %403 = arith.addf %7, %402 : vector<2x16x32xf32>
    %cst_134 = arith.constant 0.000000e+00 : f32
    %404 = vector.broadcast %cst_134 : f32 to vector<2x16x32xf32>
    %405 = arith.maximumf %403, %404 : vector<2x16x32xf32>
    %406 = vector.broadcast %24 : vector<1x1x32xf32> to vector<2x16x32xf32>
    %407 = arith.mulf %405, %406 : vector<2x16x32xf32>
    %cst_135 = arith.constant dense<0.000000e+00> : vector<2x16xf32>
    %408 = vector.multi_reduction <add>, %407, %cst_135 [2] : vector<2x16x32xf32> to vector<2x16xf32>
    %409 = vector.broadcast %26 : f32 to vector<2x16xf32>
    %410 = arith.addf %408, %409 : vector<2x16xf32>
    %cst_136 = arith.constant dense<0xFF800000> : vector<2xf32>
    %411 = vector.multi_reduction <maximumf>, %410, %cst_136 [1] : vector<2x16xf32> to vector<2xf32>
    %412 = vector.shape_cast %411 : vector<2xf32> to vector<2x1xf32>
    %413 = vector.broadcast %412 : vector<2x1xf32> to vector<2x16xf32>
    %414 = arith.subf %410, %413 : vector<2x16xf32>
    %415 = math.exp %414 : vector<2x16xf32>
    %cst_137 = arith.constant dense<0.000000e+00> : vector<2xf32>
    %416 = vector.multi_reduction <add>, %415, %cst_137 [1] : vector<2x16xf32> to vector<2xf32>
    %417 = vector.shape_cast %416 : vector<2xf32> to vector<2x1xf32>
    %418 = vector.broadcast %417 : vector<2x1xf32> to vector<2x16xf32>
    %419 = arith.divf %415, %418 : vector<2x16xf32>
    %420 = vector.shape_cast %419 : vector<2x16xf32> to vector<2x16x1xf32>
    %421 = vector.broadcast %420 : vector<2x16x1xf32> to vector<2x16x32xf32>
    %422 = arith.mulf %0, %421 : vector<2x16x32xf32>
    %cst_138 = arith.constant dense<0.000000e+00> : vector<2x32xf32>
    %423 = vector.multi_reduction <add>, %422, %cst_138 [1] : vector<2x16x32xf32> to vector<2x32xf32>
    %cst_139 = arith.constant dense<0.000000e+00> : vector<2x32xf32>
    %424 = tpu.matmul %394, %27, %cst_139 {dimension_numbers = #tpu.dot_dimension_numbers<[1], [0], [0], [1], [0, 0, 1, 1], [], []>} : vector<2x32xf32>, vector<32x32xf32>, vector<2x32xf32> -> vector<2x32xf32>
    %425 = vector.broadcast %28 : vector<1x32xf32> to vector<2x32xf32>
    %426 = arith.addf %424, %425 : vector<2x32xf32>
    %427 = arith.negf %426 : vector<2x32xf32>
    %428 = math.exp %427 : vector<2x32xf32>
    %cst_140 = arith.constant 1.000000e+00 : f32
    %429 = vector.broadcast %cst_140 : f32 to vector<2x32xf32>
    %430 = arith.addf %429, %428 : vector<2x32xf32>
    %431 = arith.divf %429, %430 : vector<2x32xf32>
    %432 = arith.mulf %431, %423 : vector<2x32xf32>
    %c4 = arith.constant 4 : index
    %c0_141 = arith.constant 0 : index
    %c0_142 = arith.constant 0 : index
    %433 = vector.load %arg1[%c4, %c0_141, %c0_142] : memref<7x2x16xf32, #tpu.memory_space<vmem>>, vector<1x2x16xf32>
    %434 = vector.shape_cast %433 : vector<1x2x16xf32> to vector<2x16xf32>
    %435 = tpu.concatenate %434, %432, %394 in 1 : vector<2x16xf32>, vector<2x32xf32>, vector<2x32xf32> -> vector<2x80xf32>
    %cst_143 = arith.constant dense<0.000000e+00> : vector<2x128xf32>
    %436 = tpu.matmul %435, %29, %cst_143 {dimension_numbers = #tpu.dot_dimension_numbers<[1], [0], [0], [1], [0, 0, 1, 1], [], []>} : vector<2x80xf32>, vector<80x128xf32>, vector<2x128xf32> -> vector<2x128xf32>
    %437 = vector.broadcast %30 : vector<1x128xf32> to vector<2x128xf32>
    %438 = arith.addf %436, %437 : vector<2x128xf32>
    %439 = vector.extract_strided_slice %438 {offsets = [0, 0], sizes = [2, 32], strides = [1, 1]} : vector<2x128xf32> to vector<2x32xf32>
    %440 = arith.negf %439 : vector<2x32xf32>
    %441 = math.exp %440 : vector<2x32xf32>
    %cst_144 = arith.constant 1.000000e+00 : f32
    %442 = vector.broadcast %cst_144 : f32 to vector<2x32xf32>
    %443 = arith.addf %442, %441 : vector<2x32xf32>
    %444 = arith.divf %442, %443 : vector<2x32xf32>
    %445 = vector.extract_strided_slice %438 {offsets = [0, 32], sizes = [2, 32], strides = [1, 1]} : vector<2x128xf32> to vector<2x32xf32>
    %446 = arith.negf %445 : vector<2x32xf32>
    %447 = math.exp %446 : vector<2x32xf32>
    %cst_145 = arith.constant 1.000000e+00 : f32
    %448 = vector.broadcast %cst_145 : f32 to vector<2x32xf32>
    %449 = arith.addf %448, %447 : vector<2x32xf32>
    %450 = arith.divf %448, %449 : vector<2x32xf32>
    %451 = vector.extract_strided_slice %438 {offsets = [0, 64], sizes = [2, 32], strides = [1, 1]} : vector<2x128xf32> to vector<2x32xf32>
    %452 = math.tanh %451 : vector<2x32xf32>
    %453 = vector.extract_strided_slice %438 {offsets = [0, 96], sizes = [2, 32], strides = [1, 1]} : vector<2x128xf32> to vector<2x32xf32>
    %454 = arith.negf %453 : vector<2x32xf32>
    %455 = math.exp %454 : vector<2x32xf32>
    %cst_146 = arith.constant 1.000000e+00 : f32
    %456 = vector.broadcast %cst_146 : f32 to vector<2x32xf32>
    %457 = arith.addf %456, %455 : vector<2x32xf32>
    %458 = arith.divf %456, %457 : vector<2x32xf32>
    %459 = arith.mulf %450, %397 : vector<2x32xf32>
    %460 = arith.mulf %444, %452 : vector<2x32xf32>
    %461 = arith.addf %459, %460 : vector<2x32xf32>
    %462 = math.tanh %461 : vector<2x32xf32>
    %463 = arith.mulf %458, %462 : vector<2x32xf32>
    %cst_147 = arith.constant dense<0.000000e+00> : vector<2x128xf32>
    %464 = tpu.matmul %463, %31, %cst_147 {dimension_numbers = #tpu.dot_dimension_numbers<[1], [0], [0], [1], [0, 0, 1, 1], [], []>} : vector<2x32xf32>, vector<32x128xf32>, vector<2x128xf32> -> vector<2x128xf32>
    %465 = vector.broadcast %32 : vector<1x128xf32> to vector<2x128xf32>
    %466 = arith.addf %464, %465 : vector<2x128xf32>
    %c4_i32 = arith.constant 4 : i32
    %467 = vector.broadcast %c4_i32 : i32 to vector<2x1xi32>
    %468 = arith.cmpi sgt, %33, %467 : vector<2x1xi32>
    %cst_148 = arith.constant 0.000000e+00 : f32
    %469 = vector.shape_cast %468 : vector<2x1xi1> to vector<2x1xi1>
    %470 = vector.broadcast %469 : vector<2x1xi1> to vector<2x128xi1>
    %471 = vector.broadcast %cst_148 : f32 to vector<2x128xf32>
    %472 = arith.select %470, %466, %471 : vector<2x128xi1>, vector<2x128xf32>
    %c4_149 = arith.constant 4 : index
    %c0_150 = arith.constant 0 : index
    %c0_151 = arith.constant 0 : index
    %473 = vector.load %arg19[%c4_149, %c0_150, %c0_151] : memref<7x2x128xf32, #tpu.memory_space<vmem>>, vector<1x2x128xf32>
    %474 = vector.shape_cast %473 : vector<1x2x128xf32> to vector<2x128xf32>
    %475 = vector.shape_cast %472 : vector<2x128xf32> to vector<1x2x128xf32>
    tpu.vector_store %arg19[%c4_149, %c0_150, %c0_151], %475 {strides = array<i32>} : memref<7x2x128xf32, #tpu.memory_space<vmem>>, vector<1x2x128xf32>,
    %cst_152 = arith.constant 0.000000e+00 : f32
    %476 = vector.shape_cast %468 : vector<2x1xi1> to vector<2x1xi1>
    %477 = vector.broadcast %476 : vector<2x1xi1> to vector<2x16xi1>
    %478 = vector.broadcast %cst_152 : f32 to vector<2x16xf32>
    %479 = arith.select %477, %419, %478 : vector<2x16xi1>, vector<2x16xf32>
    %c4_153 = arith.constant 4 : index
    %c0_154 = arith.constant 0 : index
    %c0_155 = arith.constant 0 : index
    %480 = vector.load %arg20[%c4_153, %c0_154, %c0_155] : memref<7x2x16xf32, #tpu.memory_space<vmem>>, vector<1x2x16xf32>
    %481 = vector.shape_cast %480 : vector<1x2x16xf32> to vector<2x16xf32>
    %482 = vector.shape_cast %479 : vector<2x16xf32> to vector<1x2x16xf32>
    tpu.vector_store %arg20[%c4_153, %c0_154, %c0_155], %482 {strides = array<i32>} : memref<7x2x16xf32, #tpu.memory_space<vmem>>, vector<1x2x16xf32>,
    %483 = vector.shape_cast %468 : vector<2x1xi1> to vector<2x1xi1>
    %484 = vector.broadcast %483 : vector<2x1xi1> to vector<2x32xi1>
    %485 = arith.select %484, %463, %394 : vector<2x32xi1>, vector<2x32xf32>
    %486 = vector.shape_cast %468 : vector<2x1xi1> to vector<2x1xi1>
    %487 = vector.broadcast %486 : vector<2x1xi1> to vector<2x32xi1>
    %488 = arith.select %487, %461, %397 : vector<2x32xi1>, vector<2x32xf32>
    %cst_156 = arith.constant dense<0.000000e+00> : vector<2x32xf32>
    %489 = tpu.matmul %485, %21, %cst_156 {dimension_numbers = #tpu.dot_dimension_numbers<[1], [0], [0], [1], [0, 0, 1, 1], [], []>} : vector<2x32xf32>, vector<32x32xf32>, vector<2x32xf32> -> vector<2x32xf32>
    %490 = vector.broadcast %22 : vector<1x32xf32> to vector<2x32xf32>
    %491 = arith.addf %489, %490 : vector<2x32xf32>
    %492 = vector.shape_cast %491 : vector<2x32xf32> to vector<2x1x32xf32>
    %493 = vector.broadcast %492 : vector<2x1x32xf32> to vector<2x16x32xf32>
    %494 = arith.addf %7, %493 : vector<2x16x32xf32>
    %cst_157 = arith.constant 0.000000e+00 : f32
    %495 = vector.broadcast %cst_157 : f32 to vector<2x16x32xf32>
    %496 = arith.maximumf %494, %495 : vector<2x16x32xf32>
    %497 = vector.broadcast %24 : vector<1x1x32xf32> to vector<2x16x32xf32>
    %498 = arith.mulf %496, %497 : vector<2x16x32xf32>
    %cst_158 = arith.constant dense<0.000000e+00> : vector<2x16xf32>
    %499 = vector.multi_reduction <add>, %498, %cst_158 [2] : vector<2x16x32xf32> to vector<2x16xf32>
    %500 = vector.broadcast %26 : f32 to vector<2x16xf32>
    %501 = arith.addf %499, %500 : vector<2x16xf32>
    %cst_159 = arith.constant dense<0xFF800000> : vector<2xf32>
    %502 = vector.multi_reduction <maximumf>, %501, %cst_159 [1] : vector<2x16xf32> to vector<2xf32>
    %503 = vector.shape_cast %502 : vector<2xf32> to vector<2x1xf32>
    %504 = vector.broadcast %503 : vector<2x1xf32> to vector<2x16xf32>
    %505 = arith.subf %501, %504 : vector<2x16xf32>
    %506 = math.exp %505 : vector<2x16xf32>
    %cst_160 = arith.constant dense<0.000000e+00> : vector<2xf32>
    %507 = vector.multi_reduction <add>, %506, %cst_160 [1] : vector<2x16xf32> to vector<2xf32>
    %508 = vector.shape_cast %507 : vector<2xf32> to vector<2x1xf32>
    %509 = vector.broadcast %508 : vector<2x1xf32> to vector<2x16xf32>
    %510 = arith.divf %506, %509 : vector<2x16xf32>
    %511 = vector.shape_cast %510 : vector<2x16xf32> to vector<2x16x1xf32>
    %512 = vector.broadcast %511 : vector<2x16x1xf32> to vector<2x16x32xf32>
    %513 = arith.mulf %0, %512 : vector<2x16x32xf32>
    %cst_161 = arith.constant dense<0.000000e+00> : vector<2x32xf32>
    %514 = vector.multi_reduction <add>, %513, %cst_161 [1] : vector<2x16x32xf32> to vector<2x32xf32>
    %cst_162 = arith.constant dense<0.000000e+00> : vector<2x32xf32>
    %515 = tpu.matmul %485, %27, %cst_162 {dimension_numbers = #tpu.dot_dimension_numbers<[1], [0], [0], [1], [0, 0, 1, 1], [], []>} : vector<2x32xf32>, vector<32x32xf32>, vector<2x32xf32> -> vector<2x32xf32>
    %516 = vector.broadcast %28 : vector<1x32xf32> to vector<2x32xf32>
    %517 = arith.addf %515, %516 : vector<2x32xf32>
    %518 = arith.negf %517 : vector<2x32xf32>
    %519 = math.exp %518 : vector<2x32xf32>
    %cst_163 = arith.constant 1.000000e+00 : f32
    %520 = vector.broadcast %cst_163 : f32 to vector<2x32xf32>
    %521 = arith.addf %520, %519 : vector<2x32xf32>
    %522 = arith.divf %520, %521 : vector<2x32xf32>
    %523 = arith.mulf %522, %514 : vector<2x32xf32>
    %c5 = arith.constant 5 : index
    %c0_164 = arith.constant 0 : index
    %c0_165 = arith.constant 0 : index
    %524 = vector.load %arg1[%c5, %c0_164, %c0_165] : memref<7x2x16xf32, #tpu.memory_space<vmem>>, vector<1x2x16xf32>
    %525 = vector.shape_cast %524 : vector<1x2x16xf32> to vector<2x16xf32>
    %526 = tpu.concatenate %525, %523, %485 in 1 : vector<2x16xf32>, vector<2x32xf32>, vector<2x32xf32> -> vector<2x80xf32>
    %cst_166 = arith.constant dense<0.000000e+00> : vector<2x128xf32>
    %527 = tpu.matmul %526, %29, %cst_166 {dimension_numbers = #tpu.dot_dimension_numbers<[1], [0], [0], [1], [0, 0, 1, 1], [], []>} : vector<2x80xf32>, vector<80x128xf32>, vector<2x128xf32> -> vector<2x128xf32>
    %528 = vector.broadcast %30 : vector<1x128xf32> to vector<2x128xf32>
    %529 = arith.addf %527, %528 : vector<2x128xf32>
    %530 = vector.extract_strided_slice %529 {offsets = [0, 0], sizes = [2, 32], strides = [1, 1]} : vector<2x128xf32> to vector<2x32xf32>
    %531 = arith.negf %530 : vector<2x32xf32>
    %532 = math.exp %531 : vector<2x32xf32>
    %cst_167 = arith.constant 1.000000e+00 : f32
    %533 = vector.broadcast %cst_167 : f32 to vector<2x32xf32>
    %534 = arith.addf %533, %532 : vector<2x32xf32>
    %535 = arith.divf %533, %534 : vector<2x32xf32>
    %536 = vector.extract_strided_slice %529 {offsets = [0, 32], sizes = [2, 32], strides = [1, 1]} : vector<2x128xf32> to vector<2x32xf32>
    %537 = arith.negf %536 : vector<2x32xf32>
    %538 = math.exp %537 : vector<2x32xf32>
    %cst_168 = arith.constant 1.000000e+00 : f32
    %539 = vector.broadcast %cst_168 : f32 to vector<2x32xf32>
    %540 = arith.addf %539, %538 : vector<2x32xf32>
    %541 = arith.divf %539, %540 : vector<2x32xf32>
    %542 = vector.extract_strided_slice %529 {offsets = [0, 64], sizes = [2, 32], strides = [1, 1]} : vector<2x128xf32> to vector<2x32xf32>
    %543 = math.tanh %542 : vector<2x32xf32>
    %544 = vector.extract_strided_slice %529 {offsets = [0, 96], sizes = [2, 32], strides = [1, 1]} : vector<2x128xf32> to vector<2x32xf32>
    %545 = arith.negf %544 : vector<2x32xf32>
    %546 = math.exp %545 : vector<2x32xf32>
    %cst_169 = arith.constant 1.000000e+00 : f32
    %547 = vector.broadcast %cst_169 : f32 to vector<2x32xf32>
    %548 = arith.addf %547, %546 : vector<2x32xf32>
    %549 = arith.divf %547, %548 : vector<2x32xf32>
    %550 = arith.mulf %541, %488 : vector<2x32xf32>
    %551 = arith.mulf %535, %543 : vector<2x32xf32>
    %552 = arith.addf %550, %551 : vector<2x32xf32>
    %553 = math.tanh %552 : vector<2x32xf32>
    %554 = arith.mulf %549, %553 : vector<2x32xf32>
    %cst_170 = arith.constant dense<0.000000e+00> : vector<2x128xf32>
    %555 = tpu.matmul %554, %31, %cst_170 {dimension_numbers = #tpu.dot_dimension_numbers<[1], [0], [0], [1], [0, 0, 1, 1], [], []>} : vector<2x32xf32>, vector<32x128xf32>, vector<2x128xf32> -> vector<2x128xf32>
    %556 = vector.broadcast %32 : vector<1x128xf32> to vector<2x128xf32>
    %557 = arith.addf %555, %556 : vector<2x128xf32>
    %c5_i32 = arith.constant 5 : i32
    %558 = vector.broadcast %c5_i32 : i32 to vector<2x1xi32>
    %559 = arith.cmpi sgt, %33, %558 : vector<2x1xi32>
    %cst_171 = arith.constant 0.000000e+00 : f32
    %560 = vector.shape_cast %559 : vector<2x1xi1> to vector<2x1xi1>
    %561 = vector.broadcast %560 : vector<2x1xi1> to vector<2x128xi1>
    %562 = vector.broadcast %cst_171 : f32 to vector<2x128xf32>
    %563 = arith.select %561, %557, %562 : vector<2x128xi1>, vector<2x128xf32>
    %c5_172 = arith.constant 5 : index
    %c0_173 = arith.constant 0 : index
    %c0_174 = arith.constant 0 : index
    %564 = vector.load %arg19[%c5_172, %c0_173, %c0_174] : memref<7x2x128xf32, #tpu.memory_space<vmem>>, vector<1x2x128xf32>
    %565 = vector.shape_cast %564 : vector<1x2x128xf32> to vector<2x128xf32>
    %566 = vector.shape_cast %563 : vector<2x128xf32> to vector<1x2x128xf32>
    tpu.vector_store %arg19[%c5_172, %c0_173, %c0_174], %566 {strides = array<i32>} : memref<7x2x128xf32, #tpu.memory_space<vmem>>, vector<1x2x128xf32>,
    %cst_175 = arith.constant 0.000000e+00 : f32
    %567 = vector.shape_cast %559 : vector<2x1xi1> to vector<2x1xi1>
    %568 = vector.broadcast %567 : vector<2x1xi1> to vector<2x16xi1>
    %569 = vector.broadcast %cst_175 : f32 to vector<2x16xf32>
    %570 = arith.select %568, %510, %569 : vector<2x16xi1>, vector<2x16xf32>
    %c5_176 = arith.constant 5 : index
    %c0_177 = arith.constant 0 : index
    %c0_178 = arith.constant 0 : index
    %571 = vector.load %arg20[%c5_176, %c0_177, %c0_178] : memref<7x2x16xf32, #tpu.memory_space<vmem>>, vector<1x2x16xf32>
    %572 = vector.shape_cast %571 : vector<1x2x16xf32> to vector<2x16xf32>
    %573 = vector.shape_cast %570 : vector<2x16xf32> to vector<1x2x16xf32>
    tpu.vector_store %arg20[%c5_176, %c0_177, %c0_178], %573 {strides = array<i32>} : memref<7x2x16xf32, #tpu.memory_space<vmem>>, vector<1x2x16xf32>,
    %574 = vector.shape_cast %559 : vector<2x1xi1> to vector<2x1xi1>
    %575 = vector.broadcast %574 : vector<2x1xi1> to vector<2x32xi1>
    %576 = arith.select %575, %554, %485 : vector<2x32xi1>, vector<2x32xf32>
    %577 = vector.shape_cast %559 : vector<2x1xi1> to vector<2x1xi1>
    %578 = vector.broadcast %577 : vector<2x1xi1> to vector<2x32xi1>
    %579 = arith.select %578, %552, %488 : vector<2x32xi1>, vector<2x32xf32>
    %cst_179 = arith.constant dense<0.000000e+00> : vector<2x32xf32>
    %580 = tpu.matmul %576, %21, %cst_179 {dimension_numbers = #tpu.dot_dimension_numbers<[1], [0], [0], [1], [0, 0, 1, 1], [], []>} : vector<2x32xf32>, vector<32x32xf32>, vector<2x32xf32> -> vector<2x32xf32>
    %581 = vector.broadcast %22 : vector<1x32xf32> to vector<2x32xf32>
    %582 = arith.addf %580, %581 : vector<2x32xf32>
    %583 = vector.shape_cast %582 : vector<2x32xf32> to vector<2x1x32xf32>
    %584 = vector.broadcast %583 : vector<2x1x32xf32> to vector<2x16x32xf32>
    %585 = arith.addf %7, %584 : vector<2x16x32xf32>
    %cst_180 = arith.constant 0.000000e+00 : f32
    %586 = vector.broadcast %cst_180 : f32 to vector<2x16x32xf32>
    %587 = arith.maximumf %585, %586 : vector<2x16x32xf32>
    %588 = vector.broadcast %24 : vector<1x1x32xf32> to vector<2x16x32xf32>
    %589 = arith.mulf %587, %588 : vector<2x16x32xf32>
    %cst_181 = arith.constant dense<0.000000e+00> : vector<2x16xf32>
    %590 = vector.multi_reduction <add>, %589, %cst_181 [2] : vector<2x16x32xf32> to vector<2x16xf32>
    %591 = vector.broadcast %26 : f32 to vector<2x16xf32>
    %592 = arith.addf %590, %591 : vector<2x16xf32>
    %cst_182 = arith.constant dense<0xFF800000> : vector<2xf32>
    %593 = vector.multi_reduction <maximumf>, %592, %cst_182 [1] : vector<2x16xf32> to vector<2xf32>
    %594 = vector.shape_cast %593 : vector<2xf32> to vector<2x1xf32>
    %595 = vector.broadcast %594 : vector<2x1xf32> to vector<2x16xf32>
    %596 = arith.subf %592, %595 : vector<2x16xf32>
    %597 = math.exp %596 : vector<2x16xf32>
    %cst_183 = arith.constant dense<0.000000e+00> : vector<2xf32>
    %598 = vector.multi_reduction <add>, %597, %cst_183 [1] : vector<2x16xf32> to vector<2xf32>
    %599 = vector.shape_cast %598 : vector<2xf32> to vector<2x1xf32>
    %600 = vector.broadcast %599 : vector<2x1xf32> to vector<2x16xf32>
    %601 = arith.divf %597, %600 : vector<2x16xf32>
    %602 = vector.shape_cast %601 : vector<2x16xf32> to vector<2x16x1xf32>
    %603 = vector.broadcast %602 : vector<2x16x1xf32> to vector<2x16x32xf32>
    %604 = arith.mulf %0, %603 : vector<2x16x32xf32>
    %cst_184 = arith.constant dense<0.000000e+00> : vector<2x32xf32>
    %605 = vector.multi_reduction <add>, %604, %cst_184 [1] : vector<2x16x32xf32> to vector<2x32xf32>
    %cst_185 = arith.constant dense<0.000000e+00> : vector<2x32xf32>
    %606 = tpu.matmul %576, %27, %cst_185 {dimension_numbers = #tpu.dot_dimension_numbers<[1], [0], [0], [1], [0, 0, 1, 1], [], []>} : vector<2x32xf32>, vector<32x32xf32>, vector<2x32xf32> -> vector<2x32xf32>
    %607 = vector.broadcast %28 : vector<1x32xf32> to vector<2x32xf32>
    %608 = arith.addf %606, %607 : vector<2x32xf32>
    %609 = arith.negf %608 : vector<2x32xf32>
    %610 = math.exp %609 : vector<2x32xf32>
    %cst_186 = arith.constant 1.000000e+00 : f32
    %611 = vector.broadcast %cst_186 : f32 to vector<2x32xf32>
    %612 = arith.addf %611, %610 : vector<2x32xf32>
    %613 = arith.divf %611, %612 : vector<2x32xf32>
    %614 = arith.mulf %613, %605 : vector<2x32xf32>
    %c6 = arith.constant 6 : index
    %c0_187 = arith.constant 0 : index
    %c0_188 = arith.constant 0 : index
    %615 = vector.load %arg1[%c6, %c0_187, %c0_188] : memref<7x2x16xf32, #tpu.memory_space<vmem>>, vector<1x2x16xf32>
    %616 = vector.shape_cast %615 : vector<1x2x16xf32> to vector<2x16xf32>
    %617 = tpu.concatenate %616, %614, %576 in 1 : vector<2x16xf32>, vector<2x32xf32>, vector<2x32xf32> -> vector<2x80xf32>
    %cst_189 = arith.constant dense<0.000000e+00> : vector<2x128xf32>
    %618 = tpu.matmul %617, %29, %cst_189 {dimension_numbers = #tpu.dot_dimension_numbers<[1], [0], [0], [1], [0, 0, 1, 1], [], []>} : vector<2x80xf32>, vector<80x128xf32>, vector<2x128xf32> -> vector<2x128xf32>
    %619 = vector.broadcast %30 : vector<1x128xf32> to vector<2x128xf32>
    %620 = arith.addf %618, %619 : vector<2x128xf32>
    %621 = vector.extract_strided_slice %620 {offsets = [0, 0], sizes = [2, 32], strides = [1, 1]} : vector<2x128xf32> to vector<2x32xf32>
    %622 = arith.negf %621 : vector<2x32xf32>
    %623 = math.exp %622 : vector<2x32xf32>
    %cst_190 = arith.constant 1.000000e+00 : f32
    %624 = vector.broadcast %cst_190 : f32 to vector<2x32xf32>
    %625 = arith.addf %624, %623 : vector<2x32xf32>
    %626 = arith.divf %624, %625 : vector<2x32xf32>
    %627 = vector.extract_strided_slice %620 {offsets = [0, 32], sizes = [2, 32], strides = [1, 1]} : vector<2x128xf32> to vector<2x32xf32>
    %628 = arith.negf %627 : vector<2x32xf32>
    %629 = math.exp %628 : vector<2x32xf32>
    %cst_191 = arith.constant 1.000000e+00 : f32
    %630 = vector.broadcast %cst_191 : f32 to vector<2x32xf32>
    %631 = arith.addf %630, %629 : vector<2x32xf32>
    %632 = arith.divf %630, %631 : vector<2x32xf32>
    %633 = vector.extract_strided_slice %620 {offsets = [0, 64], sizes = [2, 32], strides = [1, 1]} : vector<2x128xf32> to vector<2x32xf32>
    %634 = math.tanh %633 : vector<2x32xf32>
    %635 = vector.extract_strided_slice %620 {offsets = [0, 96], sizes = [2, 32], strides = [1, 1]} : vector<2x128xf32> to vector<2x32xf32>
    %636 = arith.negf %635 : vector<2x32xf32>
    %637 = math.exp %636 : vector<2x32xf32>
    %cst_192 = arith.constant 1.000000e+00 : f32
    %638 = vector.broadcast %cst_192 : f32 to vector<2x32xf32>
    %639 = arith.addf %638, %637 : vector<2x32xf32>
    %640 = arith.divf %638, %639 : vector<2x32xf32>
    %641 = arith.mulf %632, %579 : vector<2x32xf32>
    %642 = arith.mulf %626, %634 : vector<2x32xf32>
    %643 = arith.addf %641, %642 : vector<2x32xf32>
    %644 = math.tanh %643 : vector<2x32xf32>
    %645 = arith.mulf %640, %644 : vector<2x32xf32>
    %cst_193 = arith.constant dense<0.000000e+00> : vector<2x128xf32>
    %646 = tpu.matmul %645, %31, %cst_193 {dimension_numbers = #tpu.dot_dimension_numbers<[1], [0], [0], [1], [0, 0, 1, 1], [], []>} : vector<2x32xf32>, vector<32x128xf32>, vector<2x128xf32> -> vector<2x128xf32>
    %647 = vector.broadcast %32 : vector<1x128xf32> to vector<2x128xf32>
    %648 = arith.addf %646, %647 : vector<2x128xf32>
    %c6_i32 = arith.constant 6 : i32
    %649 = vector.broadcast %c6_i32 : i32 to vector<2x1xi32>
    %650 = arith.cmpi sgt, %33, %649 : vector<2x1xi32>
    %cst_194 = arith.constant 0.000000e+00 : f32
    %651 = vector.shape_cast %650 : vector<2x1xi1> to vector<2x1xi1>
    %652 = vector.broadcast %651 : vector<2x1xi1> to vector<2x128xi1>
    %653 = vector.broadcast %cst_194 : f32 to vector<2x128xf32>
    %654 = arith.select %652, %648, %653 : vector<2x128xi1>, vector<2x128xf32>
    %c6_195 = arith.constant 6 : index
    %c0_196 = arith.constant 0 : index
    %c0_197 = arith.constant 0 : index
    %655 = vector.load %arg19[%c6_195, %c0_196, %c0_197] : memref<7x2x128xf32, #tpu.memory_space<vmem>>, vector<1x2x128xf32>
    %656 = vector.shape_cast %655 : vector<1x2x128xf32> to vector<2x128xf32>
    %657 = vector.shape_cast %654 : vector<2x128xf32> to vector<1x2x128xf32>
    tpu.vector_store %arg19[%c6_195, %c0_196, %c0_197], %657 {strides = array<i32>} : memref<7x2x128xf32, #tpu.memory_space<vmem>>, vector<1x2x128xf32>,
    %cst_198 = arith.constant 0.000000e+00 : f32
    %658 = vector.shape_cast %650 : vector<2x1xi1> to vector<2x1xi1>
    %659 = vector.broadcast %658 : vector<2x1xi1> to vector<2x16xi1>
    %660 = vector.broadcast %cst_198 : f32 to vector<2x16xf32>
    %661 = arith.select %659, %601, %660 : vector<2x16xi1>, vector<2x16xf32>
    %c6_199 = arith.constant 6 : index
    %c0_200 = arith.constant 0 : index
    %c0_201 = arith.constant 0 : index
    %662 = vector.load %arg20[%c6_199, %c0_200, %c0_201] : memref<7x2x16xf32, #tpu.memory_space<vmem>>, vector<1x2x16xf32>
    %663 = vector.shape_cast %662 : vector<1x2x16xf32> to vector<2x16xf32>
    %664 = vector.shape_cast %661 : vector<2x16xf32> to vector<1x2x16xf32>
    tpu.vector_store %arg20[%c6_199, %c0_200, %c0_201], %664 {strides = array<i32>} : memref<7x2x16xf32, #tpu.memory_space<vmem>>, vector<1x2x16xf32>,
    return
  }
}

</mosaic_0001>

<bundles_post_ra>
// kernel: tpu_custom_call.1
= control target key start
LH: loop header
LB: loop body
LE: loop exit
PB: predicated region body
PF: predicated region fallthrough
CT: control target
= control target key end

     0   :  { %s7738_s0 = inlined_call_operand.hbm [shape: f32[2,16,32], index: 0, kind: input, shape index: {}]   ;;  %s7739_s1 = inlined_call_operand.hbm [shape: f32[7,2,16], index: 1, kind: input, shape index: {}]   ;;  %s7740_s2 = inlined_call_operand.vmem [shape: s32[2,1], index: 2, kind: input, shape index: {}]   ;;  %s7741_s3 = inlined_call_operand.hbm [shape: f32[32,32], index: 3, kind: input, shape index: {}]   ;;  %s7742_s4 = inlined_call_operand.hbm [shape: f32[1,32], index: 4, kind: input, shape index: {}]   ;;  %s7743_s5 = inlined_call_operand.hbm [shape: f32[32,32], index: 5, kind: input, shape index: {}]   ;;  %s7744_s6 = inlined_call_operand.hbm [shape: f32[1,32], index: 6, kind: input, shape index: {}]   ;;  %s7745_s7 = inlined_call_operand.vmem [shape: f32[32,32], index: 7, kind: input, shape index: {}]   ;;  %s7746_s8 = inlined_call_operand.hbm [shape: f32[1,32], index: 8, kind: input, shape index: {}]   ;;  %s7747_s9 = inlined_call_operand.hbm [shape: f32[32,32], index: 9, kind: input, shape index: {}]   ;;  %s7748_s10 = inlined_call_operand.hbm [shape: f32[1,32], index: 10, kind: input, shape index: {}]   ;;  %s7749_s11 = inlined_call_operand.hbm [shape: f32[1,32], index: 11, kind: input, shape index: {}]   ;;  %s7750_s12 = inlined_call_operand.<no memory space> [shape: f32[1,1], index: 12, kind: input, shape index: {}]   ;;  %s7751_s13 = inlined_call_operand.hbm [shape: f32[32,32], index: 13, kind: input, shape index: {}]   ;;  %s7752_s14 = inlined_call_operand.hbm [shape: f32[1,32], index: 14, kind: input, shape index: {}]   ;;  %s7753_s15 = inlined_call_operand.hbm [shape: f32[80,128], index: 15, kind: input, shape index: {}]   ;;  %s7754_s16 = inlined_call_operand.hbm [shape: f32[1,128], index: 16, kind: input, shape index: {}]   ;;  %s7755_s17 = inlined_call_operand.vmem [shape: f32[32,128], index: 17, kind: input, shape index: {}]   ;;  %s7756_s18 = inlined_call_operand.vmem [shape: f32[1,128], index: 18, kind: input, shape index: {}]   ;;  %s7757_s19 = inlined_call_operand.hbm [shape: f32[7,2,128], index: 19, kind: output, shape index: {0}]   ;;  %s7758_s20 = inlined_call_operand.hbm [shape: f32[7,2,16], index: 20, kind: output, shape index: {1}]  }
   0x1   :  { %7766 = sst [smem:[#allocation39_spill]] %s7738_s0  ;;  %v26_v0 = vstv %s7750_s12 }
   0x2   :  { %7767 = sst [smem:[#allocation40_spill]] %s7739_s1  ;;  %27 = vst [vmem:[#allocation2] sm:$0x1] %v26_v0 }
   0x3   :  { %7768 = sst [smem:[#allocation41_spill]] %s7740_s2 }
   0x4   :  { %7769 = sst [smem:[#allocation42_spill]] %s7741_s3 }
   0x5   :  { %7770 = sst [smem:[#allocation43_spill]] %s7742_s4 }
   0x6   :  { %7771 = sst [smem:[#allocation44_spill]] %s7757_s19 }
   0x7   :  { %7772 = sst [smem:[#allocation45_spill]] %s7758_s20 }
   0x8   :  { %28 = vsyncpa [#allocation4], 0 }
   0x9   :  { %29 = vsyncpa [#allocation7], 0 }
   0xa   :  { %30 = vsyncpa [#allocation10], 0 }
   0xb   :  { %31 = vsyncpa [#allocation13], 0 }
   0xc   :  { %32 = vsyncpa [#allocation16], 0 }
   0xd   :  { %33 = vsyncpa [#allocation19], 0 }
   0xe   :  { %34 = vsyncpa [#allocation22], 0 }
   0xf   :  { %35 = vsyncpa [#allocation25], 0 }
  0x10   :  { %36 = vsyncpa [#allocation5], 0 }
  0x11   :  { %37 = vsyncpa [#allocation28], 0  ;;  %s6258_s23 = smov [#allocation6]   ;;  %s7773_s3 = sld [smem:[#allocation40_spill]] }
  0x12   :  { %s55_s24 = sshll.u32 %s6258_s23, 4  ;;  %s56_s24 = int_to_ptr.vmem [resolvable:$true] %s55_s24 }
  0x17   :  { %s5886_s26 = scalar_lea.hbm %s7773_s3, 224 }
  0x18   :  { %p5887_p0 = scmp.ne.s32.totalorder %s7773_s3, %s5886_s26  ;;  %p5890_p1 = scmp.lt.u32.totalorder %s5886_s26, %s7773_s3 }
  0x1a   :  { %p5892_p2 = pnand %p5890_p1, %p5887_p0 }
  0x1c   :  { %5895 = shalt.err (!%p5892_p2)
}
  0x1d   :  { %s5896_s29 = scalar_lea.vmem %s56_s24, 224  ;;  %p5901_p4 = scmp.lt.s32.totalorder %s56_s24, %s56_s24 }
  0x1e   :  { %p5897_p3 = scmp.ne.s32.totalorder %s56_s24, %s5896_s29  ;;  %p5902_p5 = scmp.lt.s32.totalorder %s5896_s29, %s5896_s29 }
  0x20   :  { %p5903_p6 = por %p5902_p5, %p5901_p4 }
  0x22   :  { %p5904_p7 = pnand %p5903_p6, %p5897_p3 }
  0x24   :  { %5907 = shalt.err (!%p5904_p7)
}
  0x25   :  { %s6259_s30 = smov 32   ;;  %s6260_s0 = smov 2  }
  0x26   :  { %61 = dma.hbm_to_vmem [thread:$0]  %s7773_s3, 224, %s56_s24, [#allocation7], %s6259_s30, %s6259_s30, %s6260_s0  }
  0x27   :  { %s6261_s22 = smov [#allocation9]   ;;  %s6262_s2 = smov [#allocation12]  }
  0x28   :  { %s82_s23 = sshll.u32 %s6261_s22, 4  ;;  %s104_s25 = sshll.u32 %s6262_s2, 4  ;;  %s83_s23 = int_to_ptr.vmem [resolvable:$true] %s82_s23  ;;  %s105_s25 = int_to_ptr.vmem [resolvable:$true] %s104_s25 }
  0x29   :  { %s7774_s12 = sld [smem:[#allocation43_spill]] }
  0x2f   :  { %s5908_s28 = scalar_lea.hbm %s7774_s12, 16 }
  0x30   :  { %p5909_p8 = scmp.ne.s32.totalorder %s7774_s12, %s5908_s28  ;;  %p5912_p9 = scmp.lt.u32.totalorder %s5908_s28, %s7774_s12 }
  0x32   :  { %p5914_p10 = pnand %p5912_p9, %p5909_p8 }
  0x34   :  { %5917 = shalt.err (!%p5914_p10)
}
  0x35   :  { %s5918_s24 = scalar_lea.vmem %s83_s23, 16  ;;  %s5922_s3 = scalar_lea.vmem %s83_s23, 32 }
  0x36   :  { %p5919_p11 = scmp.ne.s32.totalorder %s83_s23, %s5918_s24  ;;  %p5923_p12 = scmp.lt.s32.totalorder %s83_s23, %s83_s23 }
  0x37   :  { %p5924_p13 = scmp.lt.s32.totalorder %s5922_s3, %s5918_s24 }
  0x39   :  { %p5925_p0 = por %p5924_p13, %p5923_p12 }
  0x3b   :  { %p5926_p1 = pnand %p5925_p0, %p5919_p11 }
  0x3d   :  { %5929 = shalt.err (!%p5926_p1)
}
  0x3e   :  { %85 = dma.hbm_to_vmem [thread:$0]  %s7774_s12, 16, %s83_s23, [#allocation10]  }
  0x3f   :  { %s5930_s19 = scalar_lea.hbm %s7744_s6, 16 }
  0x40   :  { %p5931_p2 = scmp.ne.s32.totalorder %s7744_s6, %s5930_s19  ;;  %p5934_p3 = scmp.lt.u32.totalorder %s5930_s19, %s7744_s6 }
  0x42   :  { %p5936_p4 = pnand %p5934_p3, %p5931_p2 }
  0x44   :  { %5939 = shalt.err (!%p5936_p4)
}
  0x45   :  { %s5940_s4 = scalar_lea.vmem %s105_s25, 16  ;;  %s5944_s29 = scalar_lea.vmem %s105_s25, 32 }
  0x46   :  { %p5941_p5 = scmp.ne.s32.totalorder %s105_s25, %s5940_s4  ;;  %p5945_p6 = scmp.lt.s32.totalorder %s105_s25, %s105_s25 }
  0x47   :  { %p5946_p7 = scmp.lt.s32.totalorder %s5944_s29, %s5940_s4 }
  0x49   :  { %p5947_p8 = por %p5946_p7, %p5945_p6 }
  0x4b   :  { %p5948_p9 = pnand %p5947_p8, %p5941_p5 }
  0x4d   :  { %5951 = shalt.err (!%p5948_p9)
}
  0x4e   :  { %107 = dma.hbm_to_vmem [thread:$0]  %s7744_s6, 16, %s105_s25, [#allocation13]  }
  0x4f   :  { %s6263_s24 = smov [#allocation15]   ;;  %s6264_s21 = smov [#allocation18]  }
  0x50   :  { %s125_s3 = sshll.u32 %s6263_s24, 4  ;;  %s148_s1 = sshll.u32 %s6264_s21, 4  ;;  %s126_s3 = int_to_ptr.vmem [resolvable:$true] %s125_s3  ;;  %s149_s1 = int_to_ptr.vmem [resolvable:$true] %s148_s1 }
  0x51   :  { %s5952_s19 = scalar_lea.hbm %s7747_s9, 512 }
  0x52   :  { %p5953_p10 = scmp.ne.s32.totalorder %s7747_s9, %s5952_s19  ;;  %p5956_p11 = scmp.lt.u32.totalorder %s5952_s19, %s7747_s9 }
  0x54   :  { %p5958_p12 = pnand %p5956_p11, %p5953_p10 }
  0x56   :  { %5961 = shalt.err (!%p5958_p12)
}
  0x57   :  { %s5962_s6 = scalar_lea.vmem %s126_s3, 512  ;;  %p5967_p0 = scmp.lt.s32.totalorder %s126_s3, %s126_s3 }
  0x58   :  { %p5963_p13 = scmp.ne.s32.totalorder %s126_s3, %s5962_s6  ;;  %p5968_p1 = scmp.lt.s32.totalorder %s5962_s6, %s5962_s6 }
  0x5a   :  { %p5969_p2 = por %p5968_p1, %p5967_p0 }
  0x5c   :  { %p5970_p3 = pnand %p5969_p2, %p5963_p13 }
  0x5e   :  { %5973 = shalt.err (!%p5970_p3)
}
  0x5f   :  { %s6265_s25 = smov 128   ;;  %s6266_s4 = smov 8  }
  0x60   :  { %131 = dma.hbm_to_vmem [thread:$0]  %s7747_s9, 512, %s126_s3, [#allocation16], %s6265_s25, %s6265_s25, %s6266_s4  }
  0x61   :  { %s5974_s21 = scalar_lea.hbm %s7749_s11, 16 }
  0x62   :  { %p5975_p4 = scmp.ne.s32.totalorder %s7749_s11, %s5974_s21  ;;  %p5978_p5 = scmp.lt.u32.totalorder %s5974_s21, %s7749_s11 }
  0x64   :  { %p5980_p6 = pnand %p5978_p5, %p5975_p4 }
  0x66   :  { %5983 = shalt.err (!%p5980_p6)
}
  0x67   :  { %s5984_s26 = scalar_lea.vmem %s149_s1, 16  ;;  %s5988_s27 = scalar_lea.vmem %s149_s1, 32 }
  0x68   :  { %p5985_p7 = scmp.ne.s32.totalorder %s149_s1, %s5984_s26  ;;  %p5989_p8 = scmp.lt.s32.totalorder %s149_s1, %s149_s1 }
  0x69   :  { %p5990_p9 = scmp.lt.s32.totalorder %s5988_s27, %s5984_s26 }
  0x6b   :  { %p5991_p10 = por %p5990_p9, %p5989_p8 }
  0x6d   :  { %p5992_p11 = pnand %p5991_p10, %p5985_p7 }
  0x6f   :  { %5995 = shalt.err (!%p5992_p11)
}
  0x70   :  { %151 = dma.hbm_to_vmem [thread:$0]  %s7749_s11, 16, %s149_s1, [#allocation19]  }
  0x71   :  { %s6267_s28 = smov [#allocation21]   ;;  %s6268_s29 = smov [#allocation3]  }
  0x72   :  { %s172_s6 = sshll.u32 %s6267_s28, 4  ;;  %s43_s23 = sshll.u32 %s6268_s29, 4  ;;  %s173_s6 = int_to_ptr.vmem [resolvable:$true] %s172_s6  ;;  %s44_s23 = int_to_ptr.vmem [resolvable:$true] %s43_s23 }
  0x73   :  { %s5996_s21 = scalar_lea.hbm %s7752_s14, 16 }
  0x74   :  { %p5997_p12 = scmp.ne.s32.totalorder %s7752_s14, %s5996_s21  ;;  %p6000_p13 = scmp.lt.u32.totalorder %s5996_s21, %s7752_s14 }
  0x76   :  { %p6002_p0 = pnand %p6000_p13, %p5997_p12 }
  0x78   :  { %6005 = shalt.err (!%p6002_p0)
}
  0x79   :  { %s6006_s11 = scalar_lea.vmem %s173_s6, 16  ;;  %s6010_s1 = scalar_lea.vmem %s173_s6, 32 }
  0x7a   :  { %p6007_p1 = scmp.ne.s32.totalorder %s173_s6, %s6006_s11  ;;  %p6011_p2 = scmp.lt.s32.totalorder %s173_s6, %s173_s6 }
  0x7b   :  { %p6012_p3 = scmp.lt.s32.totalorder %s6010_s1, %s6006_s11 }
  0x7d   :  { %p6013_p4 = por %p6012_p3, %p6011_p2 }
  0x7f   :  { %p6014_p5 = pnand %p6013_p4, %p6007_p1 }
  0x81   :  { %6017 = shalt.err (!%p6014_p5)
}
  0x82   :  { %175 = dma.hbm_to_vmem [thread:$0]  %s7752_s14, 16, %s173_s6, [#allocation22]  }
  0x83   :  { %s7775_s28 = sld [smem:[#allocation39_spill]] }
  0x89   :  { %s6018_s29 = scalar_lea.hbm %s7775_s28, 512 }
  0x8a   :  { %p6019_p6 = scmp.ne.s32.totalorder %s7775_s28, %s6018_s29  ;;  %p6022_p7 = scmp.lt.u32.totalorder %s6018_s29, %s7775_s28 }
  0x8c   :  { %p6024_p8 = pnand %p6022_p7, %p6019_p6 }
  0x8e   :  { %6027 = shalt.err (!%p6024_p8)
}
  0x8f   :  { %s6028_s2 = scalar_lea.vmem %s44_s23, 512  ;;  %p6033_p10 = scmp.lt.s32.totalorder %s44_s23, %s44_s23 }
  0x90   :  { %p6029_p9 = scmp.ne.s32.totalorder %s44_s23, %s6028_s2  ;;  %p6034_p11 = scmp.lt.s32.totalorder %s6028_s2, %s6028_s2 }
  0x92   :  { %p6035_p12 = por %p6034_p11, %p6033_p10 }
  0x94   :  { %p6036_p13 = pnand %p6035_p12, %p6029_p9 }
  0x96   :  { %6039 = shalt.err (!%p6036_p13)
}
  0x97   :  { %49 = dma.hbm_to_vmem [thread:$0]  %s7775_s28, 512, %s44_s23, [#allocation4], %s6265_s25, %s6265_s25, %s6266_s4  }
  0x98   :  { %s6269_s19 = smov [#allocation8]   ;;  %s6270_s11 = smov [#allocation11]  }
  0x99   :  { %s69_s20 = sshll.u32 %s6269_s19, 4  ;;  %s91_s1 = sshll.u32 %s6270_s11, 4  ;;  %s70_s20 = int_to_ptr.vmem [resolvable:$true] %s69_s20  ;;  %s92_s1 = int_to_ptr.vmem [resolvable:$true] %s91_s1 }
  0x9a   :  { %s7776_s9 = sld [smem:[#allocation42_spill]] }
  0xa0   :  { %s6040_s3 = scalar_lea.hbm %s7776_s9, 512 }
  0xa1   :  { %p6041_p0 = scmp.ne.s32.totalorder %s7776_s9, %s6040_s3  ;;  %p6044_p1 = scmp.lt.u32.totalorder %s6040_s3, %s7776_s9 }
  0xa3   :  { %p6046_p2 = pnand %p6044_p1, %p6041_p0 }
  0xa5   :  { %6049 = shalt.err (!%p6046_p2)
}
  0xa6   :  { %s6050_s23 = scalar_lea.vmem %s70_s20, 512  ;;  %p6055_p4 = scmp.lt.s32.totalorder %s70_s20, %s70_s20 }
  0xa7   :  { %p6051_p3 = scmp.ne.s32.totalorder %s70_s20, %s6050_s23  ;;  %p6056_p5 = scmp.lt.s32.totalorder %s6050_s23, %s6050_s23 }
  0xa9   :  { %p6057_p6 = por %p6056_p5, %p6055_p4 }
  0xab   :  { %p6058_p7 = pnand %p6057_p6, %p6051_p3 }
  0xad   :  { %6061 = shalt.err (!%p6058_p7)
}
  0xae   :  { %75 = dma.hbm_to_vmem [thread:$0]  %s7776_s9, 512, %s70_s20, [#allocation7], %s6265_s25, %s6265_s25, %s6266_s4  }
  0xaf   :  { %s6062_s6 = scalar_lea.hbm %s7743_s5, 512 }
  0xb0   :  { %p6063_p8 = scmp.ne.s32.totalorder %s7743_s5, %s6062_s6  ;;  %p6066_p9 = scmp.lt.u32.totalorder %s6062_s6, %s7743_s5 }
  0xb2   :  { %p6068_p10 = pnand %p6066_p9, %p6063_p8 }
  0xb4   :  { %6071 = shalt.err (!%p6068_p10)
}
  0xb5   :  { %s6072_s3 = scalar_lea.vmem %s92_s1, 512  ;;  %p6077_p12 = scmp.lt.s32.totalorder %s92_s1, %s92_s1 }
  0xb6   :  { %p6073_p11 = scmp.ne.s32.totalorder %s92_s1, %s6072_s3  ;;  %p6078_p13 = scmp.lt.s32.totalorder %s6072_s3, %s6072_s3 }
  0xb8   :  { %p6079_p0 = por %p6078_p13, %p6077_p12 }
  0xba   :  { %p6080_p1 = pnand %p6079_p0, %p6073_p11 }
  0xbc   :  { %6083 = shalt.err (!%p6080_p1)
}
  0xbd   :  { %97 = dma.hbm_to_vmem [thread:$0]  %s7743_s5, 512, %s92_s1, [#allocation10], %s6265_s25, %s6265_s25, %s6266_s4  }
  0xbe   :  { %s6271_s29 = smov [#allocation14]   ;;  %s6272_s24 = smov [#allocation17]  }
  0xbf   :  { %s116_s12 = sshll.u32 %s6271_s29, 4  ;;  %s138_s21 = sshll.u32 %s6272_s24, 4  ;;  %s117_s12 = int_to_ptr.vmem [resolvable:$true] %s116_s12  ;;  %s139_s21 = int_to_ptr.vmem [resolvable:$true] %s138_s21 }
  0xc0   :  { %s6084_s22 = scalar_lea.hbm %s7746_s8, 16 }
  0xc1   :  { %p6085_p2 = scmp.ne.s32.totalorder %s7746_s8, %s6084_s22  ;;  %p6088_p3 = scmp.lt.u32.totalorder %s6084_s22, %s7746_s8 }
  0xc3   :  { %p6090_p4 = pnand %p6088_p3, %p6085_p2 }
  0xc5   :  { %6093 = shalt.err (!%p6090_p4)
}
  0xc6   :  { %s6094_s5 = scalar_lea.vmem %s117_s12, 16  ;;  %s6098_s1 = scalar_lea.vmem %s117_s12, 32 }
  0xc7   :  { %p6095_p5 = scmp.ne.s32.totalorder %s117_s12, %s6094_s5  ;;  %p6099_p6 = scmp.lt.s32.totalorder %s117_s12, %s117_s12 }
  0xc8   :  { %p6100_p7 = scmp.lt.s32.totalorder %s6098_s1, %s6094_s5 }
  0xca   :  { %p6101_p8 = por %p6100_p7, %p6099_p6 }
  0xcc   :  { %p6102_p9 = pnand %p6101_p8, %p6095_p5 }
  0xce   :  { %6105 = shalt.err (!%p6102_p9)
}
  0xcf   :  { %119 = dma.hbm_to_vmem [thread:$0]  %s7746_s8, 16, %s117_s12, [#allocation13]  }
  0xd0   :  { %s6106_s20 = scalar_lea.hbm %s7748_s10, 16 }
  0xd1   :  { %p6107_p10 = scmp.ne.s32.totalorder %s7748_s10, %s6106_s20  ;;  %p6110_p11 = scmp.lt.u32.totalorder %s6106_s20, %s7748_s10 }
  0xd3   :  { %p6112_p12 = pnand %p6110_p11, %p6107_p10 }
  0xd5   :  { %6115 = shalt.err (!%p6112_p12)
}
  0xd6   :  { %s6116_s28 = scalar_lea.vmem %s139_s21, 16  ;;  %s6120_s22 = scalar_lea.vmem %s139_s21, 32 }
  0xd7   :  { %p6117_p13 = scmp.ne.s32.totalorder %s139_s21, %s6116_s28  ;;  %p6121_p0 = scmp.lt.s32.totalorder %s139_s21, %s139_s21 }
  0xd8   :  { %p6122_p1 = scmp.lt.s32.totalorder %s6120_s22, %s6116_s28 }
  0xda   :  { %p6123_p2 = por %p6122_p1, %p6121_p0 }
  0xdc   :  { %p6124_p3 = pnand %p6123_p2, %p6117_p13 }
  0xde   :  { %6127 = shalt.err (!%p6124_p3)
}
  0xdf   :  { %141 = dma.hbm_to_vmem [thread:$0]  %s7748_s10, 16, %s139_s21, [#allocation16]  }
  0xe0   :  { %s6273_s2 = smov [#allocation20]   ;;  %s6274_s6 = smov [#allocation23]  }
  0xe1   :  { %s159_s14 = sshll.u32 %s6273_s2, 4  ;;  %s181_s19 = sshll.u32 %s6274_s6, 4  ;;  %s160_s14 = int_to_ptr.vmem [resolvable:$true] %s159_s14  ;;  %s182_s19 = int_to_ptr.vmem [resolvable:$true] %s181_s19 }
  0xe2   :  { %s6128_s11 = scalar_lea.hbm %s7751_s13, 512 }
  0xe3   :  { %p6129_p4 = scmp.ne.s32.totalorder %s7751_s13, %s6128_s11  ;;  %p6132_p5 = scmp.lt.u32.totalorder %s6128_s11, %s7751_s13 }
  0xe5   :  { %p6134_p6 = pnand %p6132_p5, %p6129_p4 }
  0xe7   :  { %6137 = shalt.err (!%p6134_p6)
}
  0xe8   :  { %s6138_s10 = scalar_lea.vmem %s160_s14, 512  ;;  %p6143_p8 = scmp.lt.s32.totalorder %s160_s14, %s160_s14 }
  0xe9   :  { %p6139_p7 = scmp.ne.s32.totalorder %s160_s14, %s6138_s10  ;;  %p6144_p9 = scmp.lt.s32.totalorder %s6138_s10, %s6138_s10 }
  0xeb   :  { %p6145_p10 = por %p6144_p9, %p6143_p8 }
  0xed   :  { %p6146_p11 = pnand %p6145_p10, %p6139_p7 }
  0xef   :  { %6149 = shalt.err (!%p6146_p11)
}
  0xf0   :  { %165 = dma.hbm_to_vmem [thread:$0]  %s7751_s13, 512, %s160_s14, [#allocation19], %s6265_s25, %s6265_s25, %s6266_s4  }
  0xf1   :  { %s6150_s23 = scalar_lea.hbm %s7753_s15, 1280 }
  0xf2   :  { %p6151_p12 = scmp.ne.s32.totalorder %s7753_s15, %s6150_s23  ;;  %p6154_p13 = scmp.lt.u32.totalorder %s6150_s23, %s7753_s15 }
  0xf4   :  { %p6156_p0 = pnand %p6154_p13, %p6151_p12 }
  0xf6   :  { %6159 = shalt.err (!%p6156_p0)
}
  0xf7   :  { %s6160_s2 = scalar_lea.vmem %s182_s19, 1280  ;;  %p6165_p2 = scmp.lt.s32.totalorder %s182_s19, %s182_s19 }
  0xf8   :  { %p6161_p1 = scmp.ne.s32.totalorder %s182_s19, %s6160_s2  ;;  %p6166_p3 = scmp.lt.s32.totalorder %s6160_s2, %s6160_s2 }
  0xfa   :  { %p6167_p4 = por %p6166_p3, %p6165_p2 }
  0xfc   :  { %p6168_p5 = pnand %p6167_p4, %p6161_p1 }
  0xfe   :  { %6171 = shalt.err (!%p6168_p5)
}
  0xff   :  { %187 = dma.hbm_to_vmem [thread:$0]  %s7753_s15, 1280, %s182_s19, [#allocation22], %s6265_s25, %s6265_s25, %s6266_s4  }
 0x100   :  { %s6275_s6 = smov [#allocation24]   ;;  %s6172_s26 = scalar_lea.hbm %s7754_s16, 16 }
 0x101   :  { %s194_s5 = sshll.u32 %s6275_s6, 4  ;;  %p6173_p6 = scmp.ne.s32.totalorder %s7754_s16, %s6172_s26  ;;  %s195_s5 = int_to_ptr.vmem [resolvable:$true] %s194_s5 }
 0x102   :  { %p6176_p7 = scmp.lt.u32.totalorder %s6172_s26, %s7754_s16 }
 0x104   :  { %p6178_p8 = pnand %p6176_p7, %p6173_p6 }
 0x106   :  { %6181 = shalt.err (!%p6178_p8)
}
 0x107   :  { %s6182_s21 = scalar_lea.vmem %s195_s5, 16  ;;  %s6186_s15 = scalar_lea.vmem %s195_s5, 32 }
 0x108   :  { %p6183_p9 = scmp.ne.s32.totalorder %s195_s5, %s6182_s21  ;;  %p6187_p10 = scmp.lt.s32.totalorder %s195_s5, %s195_s5 }
 0x109   :  { %p6188_p11 = scmp.lt.s32.totalorder %s6186_s15, %s6182_s21 }
 0x10b   :  { %p6189_p12 = por %p6188_p11, %p6187_p10 }
 0x10d   :  { %p6190_p13 = pnand %p6189_p12, %p6183_p9 }
 0x10f   :  { %6193 = shalt.err (!%p6190_p13)
}
 0x110   :  { %197 = dma.hbm_to_vmem [thread:$0]  %s7754_s16, 16, %s195_s5, [#allocation25]  }
 0x111   :  { %6238 = dma.done.wait [#allocation4], 512  }
 0x112   :  { %6239 = vsyncadd [#allocation4], 4294966784 }
 0x113   :  { %6240 = dma.done.wait [#allocation7], 736  }
 0x114   :  { %6241 = vsyncadd [#allocation7], 4294966560 }
 0x115   :  { %6242 = dma.done.wait [#allocation10], 528  }
 0x116   :  { %6243 = vsyncadd [#allocation10], 4294966768 }
 0x117   :  { %6244 = dma.done.wait [#allocation13], 32  }
 0x118   :  { %6245 = vsyncadd [#allocation13], 4294967264 }
 0x119   :  { %6246 = dma.done.wait [#allocation16], 528  }
 0x11a   :  { %6247 = vsyncadd [#allocation16], 4294966768 }
 0x11b   :  { %6248 = dma.done.wait [#allocation19], 528  }
 0x11c   :  { %6249 = vsyncadd [#allocation19], 4294966768 }
 0x11d   :  { %6250 = dma.done.wait [#allocation22], 1296  }
 0x11e   :  { %6251 = vsyncadd [#allocation22], 4294966000 }
 0x11f   :  { %6252 = dma.done.wait [#allocation25], 16  }
 0x120   :  { %6253 = vsyncadd [#allocation25], 4294967280  ;;  %v6276_v1 = vmov 0.0|0.0   ;;  %vm6277_vm0 = vmmov 0   ;;  %v6278_v2 = vmov 0.0   ;;  %vm259_vm1 = vcmask 261120  }
 0x121   :  { %5421 = vmatprep.subr.bf16.mxu1 %v6276_v1  ;;  %5007 = vmatprep.mubr.msk.f32.mxu1 %vm6277_vm0, %v6278_v2  ;;  %v378_v3 = vld [vmem:[#allocation11] sm:$0xff]  ;;  %v379_v4 = vld [vmem:[#allocation11 + $0x8] sm:$0xff]  ;;  %v380_v5 = vld [vmem:[#allocation11 + $0x10] sm:$0xff]  ;;  %vm391_vm2 = vcmask 1041409   ;;  %vm738_vm3 = vcmask 130112   ;;  %vm751_vm4 = vcmask 123904  }
 0x122   :  { %v5422_v6 = vpack.c.bf16 %v379_v4, %v378_v3  ;;  %v381_v7 = vld [vmem:[#allocation11 + $0x18] sm:$0xff]  ;;  %v6588_v8 = vld [vmem:[#allocation3] sm:$0xff]  ;;  %v6592_v10 = vld [vmem:[#allocation3 + $0x10] sm:$0xff]  ;;  %s6281_s8 = smov 48   ;;  %s6282_s12 = smov 16   ;;  %vm971_vm5 = vcmask 130048  }
 0x123   :  { %v6590_v9 = vld [vmem:[#allocation3 + $0x8] sm:$0xff]  ;;  %v6594_v11 = vld [vmem:[#allocation3 + $0x18] sm:$0xff]  ;;  %v357_v12 = vsel %vm259_vm1, %v6588_v8, 0.0  ;;  %4993 = vmatprep.mubr.msk.f32.mxu0 %vm259_vm1, %v6588_v8  ;;  %v5425_v15 = vpack.c.bf16 %v381_v7, %v380_v5  ;;  %v366_v17 = vsel %vm259_vm1, %v6592_v10, 0.0  ;;  %v555_v46 = vld [vmem:[#allocation20 + $0x8] sm:$0xff]  ;;  %vm973_vm6 = vcmask 392192  }
 0x124   :  { %v358_v13 = vsel %vm259_vm1, %v6590_v9, 0.0  ;;  %v248_v14 = vld [vmem:[#allocation8] sm:$0xff]  ;;  %5423 = vmatpush3.bf16.msra.mxu1 %v5422_v6  ;;  %v367_v18 = vsel %vm259_vm1, %v6594_v11, 0.0  ;;  %v249_v19 = vld [vmem:[#allocation8 + $0x8] sm:$0xff]  ;;  %v250_v20 = vld [vmem:[#allocation8 + $0x10] sm:$0xff]  ;;  %vm981_vm7 = vcmask 654336  }
 0x125   :  { %v359_v16 = vadd.f32 %v358_v13, %v357_v12  ;;  %v251_v21 = vld [vmem:[#allocation8 + $0x18] sm:$0xff]  ;;  %5424 = vmatprep.subr.bf16.mxu1 %v6276_v1  ;;  %v368_v22 = vadd.f32 %v367_v18, %v366_v17  ;;  %v5413_v23 = vpack.c.bf16 %v249_v19, %v248_v14  ;;  %v467_v36 = vld [vmem:[%s7745_s7 + $0x10] sm:$0xff]  ;;  %v468_v37 = vld [vmem:[%s7745_s7 + $0x18] sm:$0xff]  ;;  %v6279_v7 = vmov 1966171168   ;;  %s6283_s2 = smov 64  }
 0x126   :  { %v5417_v24 = vpack.c.bf16 %v251_v21, %v250_v20  ;;  %v465_v29 = vld [vmem:[%s7745_s7] sm:$0xff]  ;;  %v466_v30 = vld [vmem:[%s7745_s7 + $0x8] sm:$0xff]  ;;  %v5431_v41 = vpack.c.bf16 %v468_v37, %v467_v36  ;;  %v546_v42 = vld [vmem:[#allocation15] sm:$0xff]  ;;  %v657_v12 = vunpack.c.l.s4 %v6279_v7  ;;  %v659_v13 = vlaneseq  ;;  %s7777_s6 = sld [smem:[#allocation41_spill]]  ;;  %s6285_s25 = smov 80  }
 0x127   :  { %v360_v25 = vrot.slane %v359_v16, 4  ;;  %v369_v26 = vrot.slane %v368_v22, 4  ;;  %5414 = vmatprep.subr.bf16.mxu0 %v5413_v23  ;;  %v5428_v34 = vpack.c.bf16 %v466_v30, %v465_v29  ;;  %v547_v43 = vld [vmem:[#allocation15 + $0x8] sm:$0xff]  ;;  %v548_v52 = vld [vmem:[#allocation15 + $0x10] sm:$0xff]  ;;  %v549_v53 = vld [vmem:[#allocation15 + $0x18] sm:$0xff]  ;;  %s6286_s23 = smov [#allocation27]  }
 0x128   :  { %5426 = vmatpush3.bf16.msra.mxu1 %v5425_v15  ;;  %5416 = vmatpush3.bf16.msra.mxu0 %v5413_v23  ;;  %v554_v45 = vld [vmem:[#allocation20] sm:$0xff]  ;;  %v6628_v49 = vpack.c.bf16 %v547_v43, %v546_v42  ;;  %v556_v54 = vld [vmem:[#allocation20 + $0x10] sm:$0xff]  ;;  %v6646_v55 = vpack.c.bf16 %v549_v53, %v548_v52  ;;  %v557_v56 = vld [vmem:[#allocation20 + $0x18] sm:$0xff]  ;;  %v658_v14 = vunpack.c.0.s8 %v657_v12  ;;  %v6666_v15 = vshrl.u32 %v659_v13, 7  ;;  %s4706_s28 = sshll.u32 %s6286_s23, 4  ;;  %s4707_s28 = int_to_ptr.vmem [resolvable:$true] %s4706_s28 }
 0x129   :  { %v361_v27 = vadd.f32 %v360_v25, %v359_v16  ;;  %v370_v28 = vadd.f32 %v369_v26, %v368_v22  ;;  %5418 = vmatprep.subr.bf16.mxu0 %v5417_v24  ;;  %5433 = vmatprep.subr.bf16.mxu1 %v6276_v1  ;;  %v6632_v50 = vpack.c.bf16 %v555_v46, %v554_v45  ;;  %v4734_v61 = vld [vmem:[#allocation12] ss:$0 sm:$0xff]  ;;  %v552_v6 = vld [vmem:[#allocation2] sm:$0x1]  ;;  %v6668_v16 = vld [vmem:[#allocation17] ss:$0 sm:$0xff]  ;;  %p6199_p1 = scmp.lt.s32.totalorder %s4707_s28, %s4707_s28 }
 0x12a   :  { %v6648_v57 = vpack.c.bf16 %v557_v56, %v556_v54  ;;  %5664 = vpush %v552_v6  ;;  %v6671_v17 = vsub.s32 %v658_v14, %v6666_v15  ;;  %v4729_v23 = vld [vmem:[#allocation9] ss:$0 sm:$0xff]  ;;  %v6678_v25 = vsub.s32 0, %v6666_v15  ;;  %v6694_v37 = vld [vmem:[#allocation18] ss:$0 sm:$0xff]  ;;  %v728_v54 = vand.u32 127, %v659_v13 }
 0x12b   :  { %v362_v31 = vrot.slane %v361_v27, 2  ;;  %v371_v32 = vrot.slane %v370_v28, 2  ;;  %s6194_s22 = scalar_lea.vmem %s4707_s28, 224 }
 0x12c   :  { %5420 = vmatpush3.bf16.msra.mxu0 %v5417_v24  ;;  %v733_v56 = vadd.s32 4294967288, %v728_v54  ;;  %p6195_p0 = scmp.ne.s32.totalorder %s4707_s28, %s6194_s22  ;;  %p6200_p2 = scmp.lt.s32.totalorder %s6194_s22, %s6194_s22 }
 0x12d   :  { %v363_v33 = vadd.f32 %v362_v31, %v361_v27  ;;  %v372_v35 = vadd.f32 %v371_v32, %v370_v28  ;;  %5427 = vmatprep.subr.bf16.mxu0 %v6276_v1 }
 0x12e   :  { %p6201_p3 = por %p6200_p2, %p6199_p1 }
 0x12f   :  { %v364_v38 = vrot.slane %v363_v33, 1  ;;  %v373_v39 = vrot.slane %v372_v35, 1  ;;  %4994 = vmatmul.mubr.msk.f32.vlgmr.msra.gmra.mrb[0].mxu0 %vm259_vm1, %v6590_v9 }
 0x130   :  { %5429 = vmatpush3.bf16.msra.mxu0 %v5428_v34  ;;  %4996 = vmatprep.mubr.msk.f32.mxu0 %vm259_vm1, %v6592_v10  ;;  %p6202_p4 = pnand %p6201_p3, %p6195_p0 }
 0x131   :  { %v365_v40 = vadd.f32 %v364_v38, %v363_v33  ;;  %v374_v44 = vadd.f32 %v373_v39, %v372_v35  ;;  %5430 = vmatprep.subr.bf16.mxu0 %v6276_v1 }
 0x133   :  { %v376_v47 = vmul.f32 0.0625, %v365_v40  ;;  %v377_v48 = vmul.f32 0.0625, %v374_v44  ;;  %4997 = vmatmul.mubr.msk.f32.gmra.mrb[2].mxu0 %vm259_vm1, %v6594_v11 }
 0x134   :  { %5432 = vmatpush3.bf16.msra.mxu0 %v5431_v41  ;;  %5018 = vmatprep.mubr.msk.f32.mxu0 %vm6277_vm0, %v6278_v2 }
 0x135   :  { %v392_v51 = vsel %vm391_vm2, %v377_v48, %v376_v47  ;;  %5439 = vmatprep.subr.bf16.mxu0 %v6276_v1 }
 0x136   :  { %5008 = vmatmul.mubr.msk.f32.vlgmr.msra.gmra.mrb[0].mxu1 %vm259_vm1, %v392_v51 }
 0x137   :  { %5019 = vmatmul.mubr.msk.f32.vlgmr.msra.gmra.mrb[4].mxu0 %vm259_vm1, %v392_v51  ;;  %5435 = vmatpush3.bf16.msra.mxu1 %v6628_v49 }
 0x138   :  { %5441 = vmatpush3.bf16.msra.mxu0 %v6632_v50  ;;  %5436 = vmatprep.subr.bf16.mxu1 %v6276_v1 }
 0x139   :  { %5442 = vmatprep.subr.bf16.mxu0 %v6276_v1  ;;  %5029 = vmatprep.mubr.msk.f32.mxu1 %vm6277_vm0, %v6278_v2 }
 0x13a   :  { %5040 = vmatprep.mubr.msk.f32.mxu0 %vm6277_vm0, %v6278_v2 }
 0x13b   :  { %5438 = vmatpush3.bf16.msra.mxu1 %v6646_v55 }
 0x13c   :  { %5444 = vmatpush3.bf16.msra.mxu0 %v6648_v57  ;;  %5445 = vmatprep.subr.bf16.mxu1 %v6276_v1 }
 0x13d   :  { %5460 = vmatprep.subr.bf16.mxu0 %v6276_v1 }
 0x15b   :  { %s5665_s7 = spop %5664 }
 0x202   :  { %v4995_v58 = vpop.f32.mrb[0].mxu0 }
 0x203   :  { %v338_v59 = vpop.f32.mrb[1].mxu0  ;;  %v6681_v28 = vadd.f32 %v4995_v58, %v4729_v23 }
 0x204   :  { %v6683_v29 = vadd.f32 %v4729_v23, %v338_v59  ;;  %v6706_v59 = vstv %s5665_s7 }
 0x206   :  { %v4998_v60 = vpop.f32.mrb[2].mxu0 }
 0x207   :  { %v348_v62 = vpop.f32.mrb[3].mxu0  ;;  %v6685_v30 = vadd.f32 %v4998_v60, %v4729_v23 }
 0x208   :  { %v6687_v31 = vadd.f32 %v4729_v23, %v348_v62 }
 0x209   :  { %v461_v63 = vpop.f32.mrb[0].mxu1 }
 0x20a   :  { %v6654_v0 = vadd.f32 %v4734_v61, %v461_v63  ;;  %v5009_v3 = vpop.f32.mrb[1].mxu1  ;;  %v6656_v4 = vpop.f32.mrb[4].mxu0  ;;  %v6709_v61 = vsub.s32 %v733_v56, %v6666_v15  ;;  %v6712_v63 = vsub.s32 %v728_v54, %v6666_v15 }
 0x20b   :  { %v5020_v5 = vpop.f32.mrb[5].mxu0 }
 0x20c   :  { %5030 = vmatmul.mubr.msk.f32.vlgmr.msra.gmra.mrb[2].mxu1 %vm259_vm1, %v6654_v0  ;;  %5041 = vmatmul.mubr.msk.f32.vlgmr.msra.gmra.mrb[6].mxu0 %vm259_vm1, %v6654_v0 }
 0x20d   :  { %5063 = vmatprep.mubr.msk.f32.mxu1 %vm6277_vm0, %v6278_v2  ;;  %5074 = vmatprep.mubr.msk.f32.mxu0 %vm6277_vm0, %v6278_v2 }
 0x2df   :  { %v651_v18 = vpop.f32.mrb[2].mxu1  ;;  %v6673_v19 = vpop.f32.mrb[6].mxu0 }
 0x2e0   :  { %v652_v20 = vadd.f32 %v6668_v16, %v651_v18  ;;  %v5031_v21 = vpop.f32.mrb[3].mxu1  ;;  %v5042_v22 = vpop.f32.mrb[7].mxu0 }
 0x2e2   :  { %v662_v24 = vrot.slane %v652_v20, %v6671_v17 }
 0x2e4   :  { %v663_v26 = vcombine.high %v662_v24, %v662_v24  ;;  %v670_v27 = vrot.slane %v662_v24, %v6671_v17 }
 0x2e6   :  { %v677_v32 = vrot.slane %v663_v26, %v6671_v17  ;;  %v681_v33 = vrot.slane %v670_v27, %v6678_v25  ;;  %v6280_v26 = vmov 0   ;;  %v6729_v27 = vsub.s32 1, %v6666_v15 }
 0x2e7   :  { %5697 = vset.pattern.permute.xlu0 %v6280_v26  ;;  %5696 = vset.pattern.permute.xlu1 %v6280_v26 }
 0x2e8   :  { %v688_v34 = vadd.f32 %v681_v33, %v6683_v29  ;;  %v685_v35 = vrot.slane %v677_v32, %v6678_v25  ;;  %v689_v36 = vadd.f32 %v681_v33, %v6681_v28 }
 0x2ea   :  { %v692_v38 = vmax.f32 %v688_v34, 0.0  ;;  %v690_v39 = vadd.f32 %v685_v35, %v6687_v31  ;;  %v693_v40 = vmax.f32 %v689_v36, 0.0  ;;  %v691_v41 = vadd.f32 %v685_v35, %v6685_v30 }
 0x2ec   :  { %v702_v42 = vmul.f32 %v6694_v37, %v692_v38  ;;  %v694_v43 = vmax.f32 %v690_v39, 0.0  ;;  %v695_v44 = vmax.f32 %v691_v41, 0.0  ;;  %v703_v47 = vmul.f32 %v6694_v37, %v693_v40 }
 0x2ee   :  { %v706_v45 = vsel %vm259_vm1, %v702_v42, 0.0  ;;  %v704_v46 = vmul.f32 %v6694_v37, %v694_v43  ;;  %v705_v51 = vmul.f32 %v6694_v37, %v695_v44  ;;  %v709_v52 = vsel %vm259_vm1, %v703_v47, 0.0 }
 0x2ef   :  { %707 = vadd.xlane.f32.xlu0 %v706_v45 }
 0x2f0   :  { %v712_v48 = vsel %vm259_vm1, %v704_v46, 0.0  ;;  %v715_v53 = vsel %vm259_vm1, %v705_v51, 0.0 }
 0x2f1   :  { %713 = vadd.xlane.f32.xlu1 %v712_v48 }
 0x2f3   :  { %710 = vadd.xlane.f32.xlu0 %v709_v52 }
 0x2f5   :  { %716 = vadd.xlane.f32.xlu1 %v715_v53 }
 0x37c   :  { %v708_v58 = vpop.xlane.xlu0 %707 }
 0x37d   :  { %v719_v3 = vadd.f32 %v6706_v59, %v708_v58 }
 0x37e   :  { %v714_v60 = vpop.xlane.xlu1 %713 }
 0x37f   :  { %v721_v5 = vadd.f32 %v6706_v59, %v714_v60  ;;  %v732_v14 = vrot.slane %v719_v3, %v6712_v63 }
 0x380   :  { %v711_v62 = vpop.xlane.xlu0 %710 }
 0x381   :  { %v720_v6 = vadd.f32 %v6706_v59, %v711_v62  ;;  %v743_v18 = vrot.slane %v721_v5, %v6712_v63 }
 0x382   :  { %v717_v7 = vpop.xlane.xlu1 %716 }
 0x383   :  { %v737_v12 = vrot.slane %v720_v6, %v6709_v61  ;;  %v722_v13 = vadd.f32 %v6706_v59, %v717_v7 }
 0x385   :  { %v747_v20 = vrot.slane %v722_v13, %v6709_v61  ;;  %v739_v21 = vsel %vm738_vm3, %v737_v12, %v732_v14 }
 0x387   :  { %v748_v22 = vsel %vm738_vm3, %v747_v20, %v743_v18 }
 0x388   :  { %v749_v23 = vsel %vm391_vm2, %v748_v22, %v739_v21 }
 0x389   :  { %v752_v24 = vsel %vm751_vm4, %v749_v23, -inf  ;;  %v559_v23 = vld [vmem:[#allocation23] sm:$0xff] }
 0x38a   :  { %753 = vmax.xlane.f32.xlu0 %v752_v24  ;;  %v560_v24 = vld [vmem:[#allocation23 + $0x8] sm:$0xff] }
 0x417   :  { %v754_v32 = vpop.xlane.xlu0 %753 }
 0x418   :  { %v759_v33 = vrot.slane %v754_v32, %v6678_v25  ;;  %v763_v34 = vrot.slane %v754_v32, %v6729_v27  ;;  %v561_v32 = vld [vmem:[#allocation23 + $0x10] sm:$0xff] }
 0x41a   :  { %v766_v35 = vsub.f32 %v719_v3, %v759_v33  ;;  %v767_v36 = vsub.f32 %v720_v6, %v759_v33  ;;  %v768_v38 = vsub.f32 %v721_v5, %v763_v34  ;;  %v769_v41 = vsub.f32 %v722_v13, %v763_v34  ;;  %v562_v34 = vld [vmem:[#allocation23 + $0x18] sm:$0xff] }
 0x41b   :  { %v6744_v33 = vpack.c.bf16 %v560_v24, %v559_v23 }
 0x41c   :  { %v770_v39 = vmul.f32 1.442695, %v766_v35  ;;  %v772_v40 = vmul.f32 1.442695, %v767_v36  ;;  %v774_v42 = vmul.f32 1.442695, %v768_v38  ;;  %v6747_v35 = vpack.c.bf16 %v562_v34, %v561_v32 }
 0x41d   :  { %v776_v43 = vmul.f32 1.442695, %v769_v41  ;;  %5447 = vmatpush3.bf16.msra.mxu1 %v6744_v33  ;;  %v563_v36 = vld [vmem:[#allocation23 + $0x20] sm:$0xff]  ;;  %v564_v38 = vld [vmem:[#allocation23 + $0x28] sm:$0xff]  ;;  %v566_v41 = vld [vmem:[#allocation23 + $0x38] sm:$0xff] }
 0x41e   :  { %5698 = vpow2.f32 %v770_v39  ;;  %5448 = vmatprep.subr.bf16.mxu1 %v6276_v1  ;;  %v6751_v39 = vpack.c.bf16 %v564_v38, %v563_v36 }
 0x41f   :  { %5700 = vpow2.f32 %v772_v40  ;;  %v565_v40 = vld [vmem:[#allocation23 + $0x30] sm:$0xff] }
 0x420   :  { %5702 = vpow2.f32 %v774_v42  ;;  %v6755_v42 = vpack.c.bf16 %v566_v41, %v565_v40 }
 0x421   :  { %5704 = vpow2.f32 %v776_v43  ;;  %5450 = vmatpush3.bf16.msra.mxu1 %v6747_v35  ;;  %v567_v43 = vld [vmem:[#allocation23 + $0x40] sm:$0xff] }
 0x422   :  { %5451 = vmatprep.subr.bf16.mxu1 %v6276_v1 }
 0x425   :  { %5453 = vmatpush3.bf16.msra.mxu1 %v6751_v39 }
 0x426   :  { %5454 = vmatprep.subr.bf16.mxu1 %v6276_v1 }
 0x428   :  { %v5699_v44 = vpop.eup %5698 }
 0x429   :  { %v5701_v15 = vpop.eup %5700  ;;  %783 = vperm.xlu1 %5696, %v5699_v44   ;;  %5456 = vmatpush3.bf16.msra.mxu1 %v6755_v42 }
 0x42a   :  { %786 = vperm.xlu0 %5697, %v5701_v15   ;;  %v5703_v45 = vpop.eup %5702  ;;  %5457 = vmatprep.subr.bf16.mxu1 %v6276_v1 }
 0x42b   :  { %v5705_v46 = vpop.eup %5704 }
 0x42d   :  { %789 = vperm.xlu1 %5696, %v5703_v45  }
 0x431   :  { %792 = vperm.xlu1 %5696, %v5705_v46  }
 0x4a8   :  { %v784_v47 = vpop.permute.xlu1 %783 }
 0x4a9   :  { %v787_v48 = vpop.permute.xlu0 %786  ;;  %v797_v53 = vrot.slane %v784_v47, %v6712_v63 }
 0x4aa   :  { %v801_v52 = vrot.slane %v787_v48, %v6709_v61 }
 0x4ac   :  { %v790_v51 = vpop.permute.xlu1 %789  ;;  %v802_v60 = vsel %vm738_vm3, %v801_v52, %v797_v53 }
 0x4ad   :  { %v806_v56 = vrot.slane %v790_v51, %v6712_v63 }
 0x4b0   :  { %v793_v54 = vpop.permute.xlu1 %792 }
 0x4b1   :  { %v810_v58 = vrot.slane %v793_v54, %v6709_v61 }
 0x4b3   :  { %v811_v62 = vsel %vm738_vm3, %v810_v58, %v806_v56 }
 0x4b4   :  { %v812_v3 = vsel %vm391_vm2, %v811_v62, %v802_v60 }
 0x4b5   :  { %v814_v5 = vsel %vm751_vm4, %v812_v3, 0.0 }
 0x4b6   :  { %815 = vadd.xlane.f32.xlu1 %v814_v5 }
 0x543   :  { %v816_v6 = vpop.xlane.xlu1 %815 }
 0x544   :  { %v821_v7 = vrot.slane %v816_v6, %v6678_v25  ;;  %v825_v12 = vrot.slane %v816_v6, %v6729_v27 }
 0x546   :  { %5706 = vrcp.f32 %v821_v7 }
 0x547   :  { %5708 = vrcp.f32 %v825_v12 }
 0x550   :  { %v5707_v13 = vpop.eup %5706 }
 0x551   :  { %v829_v14 = vmul.f32 %v5707_v13, %v5699_v44  ;;  %v830_v18 = vmul.f32 %v5707_v13, %v5701_v15  ;;  %v5709_v20 = vpop.eup %5708  ;;  %v568_v44 = vld [vmem:[#allocation23 + $0x48] sm:$0xff] }
 0x552   :  { %v832_v21 = vmul.f32 %v5709_v20, %v5703_v45  ;;  %v833_v22 = vmul.f32 %v5709_v20, %v5705_v46  ;;  %v6759_v15 = vpack.c.bf16 %v568_v44, %v567_v43  ;;  %v6764_v45 = vld [vmem:[#allocation21] ss:$0 sm:$0xff]  ;;  %v963_v44 = vld [vmem:[#allocation6] sm:$0x3] }
 0x553   :  { %836 = vperm.xlu0 %5697, %v829_v14   ;;  %v949_v46 = vadd.f32 %v6764_v45, %v6673_v19 }
 0x554   :  { %5459 = vmatpush3.bf16.msra.mxu1 %v6759_v15 }
 0x555   :  { %5472 = vmatprep.subr.bf16.mxu1 %v6276_v1  ;;  %v4743_v47 = vmul.f32 -1.442695, %v949_v46 }
 0x557   :  { %841 = vperm.xlu0 %5697, %v830_v18   ;;  %5710 = vpow2.f32 %v4743_v47 }
 0x55b   :  { %846 = vperm.xlu0 %5697, %v832_v21  }
 0x55f   :  { %851 = vperm.xlu0 %5697, %v833_v22  }
 0x561   :  { %v5711_v6 = vpop.eup %5710 }
 0x562   :  { %v955_v14 = vadd.f32 1.0, %v5711_v6 }
 0x563   :  { %968 = vrot.lane.b32.xlu0 %v6654_v0, %s6281_s8 }
 0x564   :  { %5712 = vrcp.f32 %v955_v14  ;;  %v6808_v14 = vld [vmem:[%s7777_s6] sm:$0x3] }
 0x565   :  { %vm1164_vm8 = vcmp.gt.s32.totalorder %v6808_v14, 0  ;;  %vm1747_vm10 = vcmp.gt.s32.totalorder %v6808_v14, 1  ;;  %vm2329_vm12 = vcmp.gt.s32.totalorder %v6808_v14, 2 }
 0x56e   :  { %v5713_v41 = vpop.eup %5712 }
 0x5d2   :  { %v6768_v48 = vpop.permute.xlu0 %836 }
 0x5d3   :  { %v854_v51 = vmul.f32 %v6768_v48, %v6588_v8 }
 0x5d5   :  { %v858_v54 = vsel %vm259_vm1, %v854_v51, 0.0 }
 0x5d6   :  { %v6772_v52 = vpop.permute.xlu0 %841 }
 0x5d7   :  { %v855_v53 = vmul.f32 %v6772_v52, %v6590_v9 }
 0x5d9   :  { %v859_v56 = vsel %vm259_vm1, %v855_v53, 0.0 }
 0x5da   :  { %v860_v58 = vadd.f32 %v859_v56, %v858_v54  ;;  %v6778_v60 = vpop.permute.xlu0 %846  ;;  %v6799_v54 = vld [vmem:[#allocation24] ss:$0 sm:$0xff] }
 0x5db   :  { %v856_v62 = vmul.f32 %v6778_v60, %v6592_v10 }
 0x5dc   :  { %v861_v19 = vrot.slane %v860_v58, 4 }
 0x5dd   :  { %v867_v12 = vsel %vm259_vm1, %v856_v62, 0.0 }
 0x5de   :  { %v862_v3 = vadd.f32 %v861_v19, %v860_v58  ;;  %v6782_v5 = vpop.permute.xlu0 %851 }
 0x5df   :  { %v857_v7 = vmul.f32 %v6782_v5, %v6594_v11 }
 0x5e0   :  { %v863_v18 = vrot.slane %v862_v3, 2 }
 0x5e1   :  { %v868_v13 = vsel %vm259_vm1, %v857_v7, 0.0 }
 0x5e2   :  { %v869_v20 = vadd.f32 %v868_v13, %v867_v12  ;;  %v864_v22 = vadd.f32 %v863_v18, %v862_v3  ;;  %v969_v47 = vpop.permute.xlu0 %968  ;;  %v4736_v3 = vld [vmem:[#allocation14] ss:$0 sm:$0xff] }
 0x5e3   :  { %v543_v6 = vadd.f32 %v4736_v3, %v6656_v4  ;;  %v1165_v4 = vsel %vm1164_vm8, 1, %v6280_v26 }
 0x5e4   :  { %v870_v21 = vrot.slane %v869_v20, 4  ;;  %v865_v34 = vrot.slane %v864_v22, 1 }
 0x5e6   :  { %v871_v23 = vadd.f32 %v870_v21, %v869_v20  ;;  %v866_v38 = vadd.f32 %v865_v34, %v864_v22  ;;  %v570_v34 = vld [vmem:[%s7755_s17] sm:$0xff] }
 0x5e8   :  { %v872_v24 = vrot.slane %v871_v23, 2 }
 0x5ea   :  { %v873_v32 = vadd.f32 %v872_v24, %v871_v23 }
 0x5ec   :  { %v874_v36 = vrot.slane %v873_v32, 1 }
 0x5ee   :  { %v875_v40 = vadd.f32 %v874_v36, %v873_v32  ;;  %v571_v36 = vld [vmem:[%s7755_s17 + $0x8] sm:$0xff] }
 0x5f0   :  { %v960_v11 = vsel %vm391_vm2, %v875_v40, %v866_v38  ;;  %v572_v38 = vld [vmem:[%s7755_s17 + $0x10] sm:$0xff]  ;;  %v6828_v40 = vpack.c.bf16 %v571_v36, %v570_v34 }
 0x5f1   :  { %v962_v43 = vmul.f32 %v5713_v41, %v960_v11  ;;  %v573_v41 = vld [vmem:[%s7755_s17 + $0x18] sm:$0xff]  ;;  %s6284_s17 = smov 96  }
 0x5f2   :  { %5462 = vmatpush3.bf16.msra.mxu0 %v6828_v40  ;;  %v6834_v11 = vpack.c.bf16 %v573_v41, %v572_v38 }
 0x5f3   :  { %965 = vrot.lane.b32.xlu1 %v962_v43, %s6282_s12  ;;  %5463 = vmatprep.subr.bf16.mxu0 %v6276_v1  ;;  %v1188_v43 = vrot.slane %v6782_v5, %v6709_v61 }
 0x5f6   :  { %5465 = vmatpush3.bf16.msra.mxu0 %v6834_v11 }
 0x5f7   :  { %5466 = vmatprep.subr.bf16.mxu0 %v6276_v1 }
 0x665   :  { %v966_v46 = vpop.permute.xlu1 %965 }
 0x666   :  { %v972_v51 = vsel %vm971_vm5, %v963_v44, %v966_v46  ;;  %v1179_v46 = vrot.slane %v6772_v52, %v6709_v61 }
 0x667   :  { %v974_v53 = vsel %vm973_vm6, %v972_v51, %v969_v47  ;;  %v1184_v47 = vrot.slane %v6778_v60, %v6712_v63  ;;  %v1175_v51 = vrot.slane %v6768_v48, %v6712_v63 }
 0x668   :  { %5064 = vmatmul.mubr.msk.f32.vlgmr.msra.gmra.mrb[4].mxu1 %vm981_vm7, %v974_v53 }
 0x669   :  { %5474 = vmatpush3.bf16.msra.mxu1 %v6632_v50  ;;  %5096 = vmatprep.mubr.msk.f32.mxu1 %vm6277_vm0, %v6278_v2  ;;  %v1189_v53 = vsel %vm738_vm3, %v1188_v43, %v1184_v47  ;;  %v1180_v5 = vsel %vm738_vm3, %v1179_v46, %v1175_v51 }
 0x66a   :  { %5475 = vmatprep.subr.bf16.mxu1 %v6276_v1  ;;  %v1190_v52 = vsel %vm391_vm2, %v1189_v53, %v1180_v5 }
 0x66d   :  { %5477 = vmatpush3.bf16.msra.mxu1 %v6648_v57 }
 0x66e   :  { %5493 = vmatprep.subr.bf16.mxu1 %v6276_v1 }
 0x73b   :  { %v1051_v56 = vpop.f32.mrb[4].mxu1 }
 0x73c   :  { %v1052_v58 = vadd.f32 %v6799_v54, %v1051_v56  ;;  %v5065_v19 = vpop.f32.mrb[5].mxu1 }
 0x73e   :  { %5714 = vtanh.f32 %v1052_v58  ;;  %v4746_v7 = vmul.f32 -1.442695, %v1052_v58 }
 0x740   :  { %5716 = vpow2.f32 %v4746_v7 }
 0x748   :  { %v5715_v62 = vpop.eup %5714 }
 0x749   :  { %1068 = vrot.lane.b32.xlu0 %v5715_v62, %s6283_s2 }
 0x74a   :  { %v5717_v12 = vpop.eup %5716 }
 0x74b   :  { %v1058_v13 = vadd.f32 1.0, %v5717_v12 }
 0x74d   :  { %1063 = vrot.lane.b32.xlu0 %v543_v6, %s6259_s30  ;;  %5718 = vrcp.f32 %v1058_v13  ;;  %v6895_v6 = vld [vmem:[%s7756_s18] ss:$0 sm:$0xff] }
 0x757   :  { %v5719_v18 = vpop.eup %5718 }
 0x7bb   :  { %v1069_v20 = vpop.permute.xlu0 %1068 }
 0x7bc   :  { %v1071_v21 = vmul.f32 %v5719_v18, %v1069_v20 }
 0x7be   :  { %1073 = vrot.lane.b32.xlu0 %v1071_v21, %s6259_s30 }
 0x7bf   :  { %v6813_v22 = vpop.permute.xlu0 %1063 }
 0x7c0   :  { %v1066_v23 = vmul.f32 %v5719_v18, %v6813_v22 }
 0x7c2   :  { %1167 = vperm.xlu0 %5697, %v1165_v4  }
 0x830   :  { %v1074_v24 = vpop.permute.xlu0 %1073 }
 0x831   :  { %v6816_v32 = vadd.f32 %v1074_v24, %v1066_v23 }
 0x833   :  { %5720 = vtanh.f32 %v6816_v32 }
 0x83d   :  { %v5721_v44 = vpop.eup %5720 }
 0x83e   :  { %1079 = vrot.lane.b32.xlu1 %v5721_v44, %s6283_s2 }
 0x841   :  { %v6850_v56 = vpop.permute.xlu0 %1167 }
 0x842   :  { %vm1169_vm9 = vcmp.eq.s32.totalorder %v6850_v56, 1  ;;  %1194 = vrot.lane.b32.xlu1 %v6654_v0, %s6284_s17 }
 0x843   :  { %v1192_v60 = vsel %vm1169_vm9, %v1190_v52, 0.0 }
 0x844   :  { %1193 = vst.msk [vmem:[#allocation27] sm:$0x3] %vm751_vm4, %v1192_v60 }
 0x8b0   :  { %v1080_v58 = vpop.permute.xlu1 %1079 }
 0x8b1   :  { %v1082_v48 = vmul.f32 %v5719_v18, %v1080_v58 }
 0x8b3   :  { %1090 = vrot.lane.b32.xlu0 %v1082_v48, %s6259_s30 }
 0x8b4   :  { %v1195_v19 = vpop.permute.xlu1 %1194 }
 0x8b5   :  { %v6861_v62 = vsel %vm1169_vm9, %v1082_v48, %v1195_v19 }
 0x8b6   :  { %1200 = vrot.lane.b32.xlu1 %v6861_v62, %s6259_s30 }
 0x925   :  { %v1091_v3 = vpop.permute.xlu0 %1090 }
 0x926   :  { %5075 = vmatmul.mubr.msk.f32.vlgmr.msra.gmra.mrb[8].mxu0 %vm259_vm1, %v1091_v3 }
 0x927   :  { %5468 = vmatpush3.bf16.msra.mxu0 %v6628_v49  ;;  %5085 = vmatprep.mubr.msk.f32.mxu0 %vm6277_vm0, %v6278_v2 }
 0x928   :  { %v1201_v0 = vpop.permute.xlu1 %1200  ;;  %5469 = vmatprep.subr.bf16.mxu0 %v6276_v1 }
 0x929   :  { %5097 = vmatmul.mubr.msk.f32.vlgmr.msra.gmra.mrb[6].mxu1 %vm259_vm1, %v1201_v0 }
 0x92a   :  { %5495 = vmatpush3.bf16.msra.mxu1 %v6828_v40  ;;  %5130 = vmatprep.mubr.msk.f32.mxu1 %vm6277_vm0, %v6278_v2 }
 0x92b   :  { %5471 = vmatpush3.bf16.msra.mxu0 %v6646_v55  ;;  %5496 = vmatprep.subr.bf16.mxu1 %v6276_v1 }
 0x92c   :  { %5478 = vmatprep.subr.bf16.mxu0 %v6276_v1 }
 0x92e   :  { %5086 = vmatmul.mubr.msk.f32.vlgmr.msra.gmra.mrb[10].mxu0 %vm259_vm1, %v1201_v0  ;;  %5498 = vmatpush3.bf16.msra.mxu1 %v6834_v11 }
 0x92f   :  { %5480 = vmatpush3.bf16.msra.mxu0 %v6744_v33  ;;  %5119 = vmatprep.mubr.msk.f32.mxu0 %vm6277_vm0, %v6278_v2 }
 0x930   :  { %5481 = vmatprep.subr.bf16.mxu0 %v6276_v1  ;;  %5499 = vmatprep.subr.bf16.mxu1 %v6276_v1 }
 0x933   :  { %5483 = vmatpush3.bf16.msra.mxu0 %v6747_v35 }
 0x934   :  { %5484 = vmatprep.subr.bf16.mxu0 %v6276_v1 }
 0x937   :  { %5486 = vmatpush3.bf16.msra.mxu0 %v6751_v39 }
 0x938   :  { %5487 = vmatprep.subr.bf16.mxu0 %v6276_v1 }
 0x93b   :  { %5489 = vmatpush3.bf16.msra.mxu0 %v6755_v42 }
 0x93c   :  { %5490 = vmatprep.subr.bf16.mxu0 %v6276_v1 }
 0x93f   :  { %5492 = vmatpush3.bf16.msra.mxu0 %v6759_v15 }
 0x940   :  { %5505 = vmatprep.subr.bf16.mxu0 %v6276_v1 }
 0x9f9   :  { %v1160_v7 = vpop.f32.mrb[8].mxu0 }
 0x9fa   :  { %v1161_v12 = vadd.f32 %v6895_v6, %v1160_v7  ;;  %v5076_v13 = vpop.f32.mrb[9].mxu0 }
 0x9fc   :  { %v1170_v18 = vsel %vm1169_vm9, %v1161_v12, 0.0  ;;  %v6900_v20 = vpop.f32.mrb[6].mxu1 }
 0x9fd   :  { %1171 = vst [vmem:[#allocation26] sm:$0x3] %v1170_v18  ;;  %v5098_v21 = vpop.f32.mrb[7].mxu1 }
 0xa01   :  { %v1270_v4 = vpop.f32.mrb[10].mxu0 }
 0xa02   :  { %v1271_v23 = vadd.f32 %v6668_v16, %v1270_v4  ;;  %v5087_v24 = vpop.f32.mrb[11].mxu0 }
 0xa04   :  { %v1281_v34 = vrot.slane %v1271_v23, %v6671_v17 }
 0xa06   :  { %v1282_v36 = vcombine.high %v1281_v34, %v1281_v34  ;;  %v1289_v38 = vrot.slane %v1281_v34, %v6671_v17 }
 0xa08   :  { %v1296_v41 = vrot.slane %v1282_v36, %v6671_v17  ;;  %v1300_v43 = vrot.slane %v1289_v38, %v6678_v25 }
 0xa0a   :  { %v1308_v44 = vadd.f32 %v1300_v43, %v6681_v28  ;;  %v1307_v46 = vadd.f32 %v1300_v43, %v6683_v29  ;;  %v1304_v47 = vrot.slane %v1296_v41, %v6678_v25 }
 0xa0c   :  { %v1312_v51 = vmax.f32 %v1308_v44, 0.0  ;;  %v1311_v53 = vmax.f32 %v1307_v46, 0.0  ;;  %v1309_v16 = vadd.f32 %v1304_v47, %v6687_v31  ;;  %v1310_v5 = vadd.f32 %v1304_v47, %v6685_v30 }
 0xa0e   :  { %v1316_v52 = vmul.f32 %v6694_v37, %v1312_v51  ;;  %v1315_v60 = vmul.f32 %v6694_v37, %v1311_v53  ;;  %v1313_v58 = vmax.f32 %v1309_v16, 0.0  ;;  %v1314_v0 = vmax.f32 %v1310_v5, 0.0 }
 0xa10   :  { %v1322_v48 = vsel %vm259_vm1, %v1316_v52, 0.0  ;;  %v1319_v19 = vsel %vm259_vm1, %v1315_v60, 0.0  ;;  %v1317_v3 = vmul.f32 %v6694_v37, %v1313_v58  ;;  %v1318_v12 = vmul.f32 %v6694_v37, %v1314_v0 }
 0xa11   :  { %1323 = vadd.xlane.f32.xlu1 %v1322_v48  ;;  %1320 = vadd.xlane.f32.xlu0 %v1319_v19 }
 0xa12   :  { %v1325_v7 = vsel %vm259_vm1, %v1317_v3, 0.0  ;;  %v1328_v13 = vsel %vm259_vm1, %v1318_v12, 0.0 }
 0xa15   :  { %1326 = vadd.xlane.f32.xlu0 %v1325_v7 }
 0xa19   :  { %1329 = vadd.xlane.f32.xlu0 %v1328_v13 }
 0xa9e   :  { %v1321_v18 = vpop.xlane.xlu0 %1320  ;;  %v1324_v21 = vpop.xlane.xlu1 %1323 }
 0xa9f   :  { %v1332_v23 = vadd.f32 %v1324_v21, %v6706_v59  ;;  %v1331_v24 = vadd.f32 %v1321_v18, %v6706_v59 }
 0xaa1   :  { %v1346_v38 = vrot.slane %v1332_v23, %v6709_v61  ;;  %v1342_v41 = vrot.slane %v1331_v24, %v6712_v63 }
 0xaa2   :  { %v1327_v4 = vpop.xlane.xlu0 %1326 }
 0xaa3   :  { %v1333_v34 = vadd.f32 %v1327_v4, %v6706_v59  ;;  %v1347_v47 = vsel %vm738_vm3, %v1346_v38, %v1342_v41 }
 0xaa5   :  { %v1351_v44 = vrot.slane %v1333_v34, %v6712_v63 }
 0xaa6   :  { %v1330_v36 = vpop.xlane.xlu0 %1329 }
 0xaa7   :  { %v1334_v43 = vadd.f32 %v1330_v36, %v6706_v59 }
 0xaa9   :  { %v1355_v46 = vrot.slane %v1334_v43, %v6709_v61 }
 0xaab   :  { %v1356_v51 = vsel %vm738_vm3, %v1355_v46, %v1351_v44 }
 0xaac   :  { %v1357_v53 = vsel %vm391_vm2, %v1356_v51, %v1347_v47 }
 0xaad   :  { %v1359_v16 = vsel %vm751_vm4, %v1357_v53, -inf }
 0xaae   :  { %1360 = vmax.xlane.f32.xlu1 %v1359_v16 }
 0xb3b   :  { %v1361_v5 = vpop.xlane.xlu1 %1360 }
 0xb3c   :  { %v1366_v52 = vrot.slane %v1361_v5, %v6678_v25  ;;  %v1370_v60 = vrot.slane %v1361_v5, %v6729_v27  ;;  %v1748_v5 = vsel %vm1747_vm10, 1, %v6280_v26 }
 0xb3e   :  { %v1373_v58 = vsub.f32 %v1331_v24, %v1366_v52  ;;  %v1374_v48 = vsub.f32 %v1332_v23, %v1366_v52  ;;  %v1376_v19 = vsub.f32 %v1334_v43, %v1370_v60  ;;  %v1375_v3 = vsub.f32 %v1333_v34, %v1370_v60 }
 0xb40   :  { %v1377_v0 = vmul.f32 1.442695, %v1373_v58  ;;  %v1379_v7 = vmul.f32 1.442695, %v1374_v48  ;;  %v1383_v12 = vmul.f32 1.442695, %v1376_v19 }
 0xb41   :  { %v1381_v13 = vmul.f32 1.442695, %v1375_v3 }
 0xb42   :  { %5722 = vpow2.f32 %v1377_v0 }
 0xb43   :  { %5724 = vpow2.f32 %v1379_v7 }
 0xb44   :  { %5726 = vpow2.f32 %v1383_v12 }
 0xb45   :  { %5728 = vpow2.f32 %v1381_v13  ;;  %v1550_v13 = vadd.f32 %v6764_v45, %v6900_v20 }
 0xb4c   :  { %v5723_v18 = vpop.eup %5722 }
 0xb4d   :  { %v5725_v21 = vpop.eup %5724  ;;  %1390 = vperm.xlu0 %5697, %v5723_v18  }
 0xb4e   :  { %1393 = vperm.xlu1 %5696, %v5725_v21   ;;  %v5727_v4 = vpop.eup %5726 }
 0xb4f   :  { %v5729_v36 = vpop.eup %5728 }
 0xb51   :  { %1399 = vperm.xlu0 %5697, %v5727_v4  }
 0xb52   :  { %1396 = vperm.xlu1 %5696, %v5729_v36  }
 0xbcc   :  { %v1391_v24 = vpop.permute.xlu0 %1390 }
 0xbcd   :  { %v1394_v23 = vpop.permute.xlu1 %1393  ;;  %v1404_v38 = vrot.slane %v1391_v24, %v6712_v63  ;;  %v4751_v24 = vmul.f32 -1.442695, %v1550_v13 }
 0xbce   :  { %v1408_v34 = vrot.slane %v1394_v23, %v6709_v61 }
 0xbd0   :  { %v1400_v41 = vpop.permute.xlu0 %1399  ;;  %v1409_v47 = vsel %vm738_vm3, %v1408_v34, %v1404_v38 }
 0xbd1   :  { %v1397_v43 = vpop.permute.xlu1 %1396  ;;  %v1417_v44 = vrot.slane %v1400_v41, %v6709_v61 }
 0xbd2   :  { %v1413_v46 = vrot.slane %v1397_v43, %v6712_v63 }
 0xbd4   :  { %v1418_v51 = vsel %vm738_vm3, %v1417_v44, %v1413_v46 }
 0xbd5   :  { %v1419_v53 = vsel %vm391_vm2, %v1418_v51, %v1409_v47 }
 0xbd6   :  { %v1421_v16 = vsel %vm751_vm4, %v1419_v53, 0.0 }
 0xbd7   :  { %1422 = vadd.xlane.f32.xlu1 %v1421_v16  ;;  %v6958_v16 = vld [vmem:[#allocation3 + $0x18] sm:$0xff] }
 0xbe8   :  { %1750 = vperm.xlu1 %5696, %v1748_v5  }
 0xc64   :  { %v1423_v52 = vpop.xlane.xlu1 %1422 }
 0xc65   :  { %v1428_v60 = vrot.slane %v1423_v52, %v6678_v25  ;;  %v1432_v58 = vrot.slane %v1423_v52, %v6729_v27 }
 0xc67   :  { %5730 = vrcp.f32 %v1428_v60 }
 0xc68   :  { %5732 = vrcp.f32 %v1432_v58  ;;  %v6954_v53 = vpop.permute.xlu1 %1750 }
 0xc69   :  { %5734 = vpow2.f32 %v4751_v24  ;;  %vm1752_vm11 = vcmp.eq.s32.totalorder %v6954_v53, 1 }
 0xc71   :  { %v5731_v48 = vpop.eup %5730 }
 0xc72   :  { %v1436_v19 = vmul.f32 %v5731_v48, %v5723_v18  ;;  %v1437_v3 = vmul.f32 %v5731_v48, %v5725_v21  ;;  %v5733_v0 = vpop.eup %5732 }
 0xc73   :  { %v1439_v7 = vmul.f32 %v5733_v0, %v5729_v36  ;;  %v1440_v12 = vmul.f32 %v5733_v0, %v5727_v4  ;;  %v5735_v4 = vpop.eup %5734 }
 0xc74   :  { %1443 = vperm.xlu0 %5697, %v1436_v19   ;;  %v1556_v60 = vadd.f32 1.0, %v5735_v4 }
 0xc76   :  { %5736 = vrcp.f32 %v1556_v60 }
 0xc78   :  { %1448 = vperm.xlu0 %5697, %v1437_v3  }
 0xc7c   :  { %1453 = vperm.xlu0 %5697, %v1439_v7  }
 0xc80   :  { %1458 = vperm.xlu0 %5697, %v1440_v12  }
 0xcf3   :  { %v1444_v23 = vpop.permute.xlu0 %1443 }
 0xcf4   :  { %v1461_v34 = vmul.f32 %v1444_v23, %v6588_v8  ;;  %v1759_v8 = vrot.slane %v1444_v23, %v6712_v63 }
 0xcf6   :  { %v1465_v18 = vsel %vm259_vm1, %v1461_v34, 0.0 }
 0xcf7   :  { %v1449_v38 = vpop.permute.xlu0 %1448 }
 0xcf8   :  { %v1462_v41 = vmul.f32 %v1449_v38, %v6590_v9  ;;  %v1763_v46 = vrot.slane %v1449_v38, %v6709_v61 }
 0xcfa   :  { %v1466_v21 = vsel %vm259_vm1, %v1462_v41, 0.0  ;;  %v1764_v58 = vsel %vm738_vm3, %v1763_v46, %v1759_v8 }
 0xcfb   :  { %v1467_v43 = vadd.f32 %v1466_v21, %v1465_v18  ;;  %v1454_v36 = vpop.permute.xlu0 %1453 }
 0xcfc   :  { %v1463_v20 = vmul.f32 %v1454_v36, %v6592_v10  ;;  %v1768_v9 = vrot.slane %v1454_v36, %v6712_v63  ;;  %v5737_v36 = vpop.eup %5736 }
 0xcfd   :  { %v1468_v44 = vrot.slane %v1467_v43, 4 }
 0xcfe   :  { %v1474_v48 = vsel %vm259_vm1, %v1463_v20, 0.0  ;;  %v1565_v20 = vld [vmem:[#allocation6 + $0x2] sm:$0x3] }
 0xcff   :  { %v1469_v47 = vadd.f32 %v1468_v44, %v1467_v43  ;;  %v1459_v51 = vpop.permute.xlu0 %1458 }
 0xd00   :  { %v1464_v5 = vmul.f32 %v6958_v16, %v1459_v51  ;;  %v1772_v52 = vrot.slane %v1459_v51, %v6709_v61 }
 0xd01   :  { %v1470_v3 = vrot.slane %v1469_v47, 2 }
 0xd02   :  { %v1475_v10 = vsel %vm259_vm1, %v1464_v5, 0.0  ;;  %v1773_v19 = vsel %vm738_vm3, %v1772_v52, %v1768_v9 }
 0xd03   :  { %v1476_v0 = vadd.f32 %v1475_v10, %v1474_v48  ;;  %v1774_v7 = vsel %vm391_vm2, %v1773_v19, %v1764_v58  ;;  %v1471_v24 = vadd.f32 %v1470_v3, %v1469_v47 }
 0xd04   :  { %v1776_v12 = vsel %vm1752_vm11, %v1774_v7, 0.0  ;;  %v6991_v7 = vsel %vm1169_vm9, %v6816_v32, %v6813_v22 }
 0xd05   :  { %v1477_v13 = vrot.slane %v1476_v0, 4  ;;  %1778 = vst.msk [vmem:[#allocation27 + $0x2] sm:$0x3] %vm751_vm4, %v1776_v12  ;;  %v1472_v41 = vrot.slane %v1471_v24, 1 }
 0xd07   :  { %v1478_v23 = vadd.f32 %v1477_v13, %v1476_v0  ;;  %v1473_v21 = vadd.f32 %v1472_v41, %v1471_v24 }
 0xd09   :  { %v1479_v34 = vrot.slane %v1478_v23, 2 }
 0xd0b   :  { %v1480_v38 = vadd.f32 %v1479_v34, %v1478_v23 }
 0xd0d   :  { %v1481_v18 = vrot.slane %v1480_v38, 1 }
 0xd0f   :  { %v1482_v43 = vadd.f32 %v1481_v18, %v1480_v38 }
 0xd11   :  { %v1561_v44 = vsel %vm391_vm2, %v1482_v43, %v1473_v21 }
 0xd12   :  { %v1563_v4 = vmul.f32 %v5737_v36, %v1561_v44 }
 0xd14   :  { %1567 = vrot.lane.b32.xlu0 %v1563_v4, %s6282_s12  ;;  %v7038_v4 = vld [vmem:[#allocation17] ss:$0 sm:$0xff] }
 0xd18   :  { %1570 = vrot.lane.b32.xlu0 %v6861_v62, %s6285_s25 }
 0xd86   :  { %v1568_v46 = vpop.permute.xlu0 %1567 }
 0xd87   :  { %v1573_v47 = vsel %vm971_vm5, %v1565_v20, %v1568_v46 }
 0xd8a   :  { %v1571_v51 = vpop.permute.xlu0 %1570 }
 0xd8b   :  { %v1574_v8 = vsel %vm973_vm6, %v1573_v47, %v1571_v51 }
 0xd8c   :  { %5120 = vmatmul.mubr.msk.f32.vlgmr.msra.gmra.mrb[12].mxu0 %vm981_vm7, %v1574_v8 }
 0xd8d   :  { %5507 = vmatpush3.bf16.msra.mxu0 %v6632_v50  ;;  %5152 = vmatprep.mubr.msk.f32.mxu0 %vm6277_vm0, %v6278_v2 }
 0xd8e   :  { %5508 = vmatprep.subr.bf16.mxu0 %v6276_v1 }
 0xd91   :  { %5510 = vmatpush3.bf16.msra.mxu0 %v6648_v57 }
 0xd92   :  { %5526 = vmatprep.subr.bf16.mxu0 %v6276_v1 }
 0xe5f   :  { %v1644_v9 = vpop.f32.mrb[12].mxu0 }
 0xe60   :  { %v1645_v5 = vadd.f32 %v6799_v54, %v1644_v9  ;;  %v5121_v52 = vpop.f32.mrb[13].mxu0 }
 0xe62   :  { %5738 = vtanh.f32 %v1645_v5  ;;  %v4753_v58 = vmul.f32 -1.442695, %v1645_v5 }
 0xe64   :  { %5740 = vpow2.f32 %v4753_v58 }
 0xe6c   :  { %v5739_v60 = vpop.eup %5738 }
 0xe6d   :  { %1657 = vrot.lane.b32.xlu0 %v5739_v60, %s6283_s2 }
 0xe6e   :  { %v5741_v48 = vpop.eup %5740 }
 0xe6f   :  { %v1651_v10 = vadd.f32 1.0, %v5741_v48 }
 0xe71   :  { %5742 = vrcp.f32 %v1651_v10 }
 0xe7b   :  { %v5743_v19 = vpop.eup %5742 }
 0xe7c   :  { %v1655_v12 = vmul.f32 %v5743_v19, %v6991_v7 }
 0xedf   :  { %v1658_v3 = vpop.permute.xlu0 %1657 }
 0xee0   :  { %v1660_v0 = vmul.f32 %v5743_v19, %v1658_v3 }
 0xee2   :  { %1662 = vrot.lane.b32.xlu0 %v1660_v0, %s6259_s30 }
 0xf54   :  { %v1663_v13 = vpop.permute.xlu0 %1662 }
 0xf55   :  { %v6994_v24 = vadd.f32 %v1663_v13, %v1655_v12 }
 0xf57   :  { %5744 = vtanh.f32 %v6994_v24 }
 0xf61   :  { %v5745_v23 = vpop.eup %5744 }
 0xf62   :  { %1668 = vrot.lane.b32.xlu0 %v5745_v23, %s6283_s2 }
 0xfd4   :  { %v1669_v34 = vpop.permute.xlu0 %1668 }
 0xfd5   :  { %v1671_v38 = vmul.f32 %v5743_v19, %v1669_v34 }
 0xfd7   :  { %1673 = vrot.lane.b32.xlu0 %v1671_v38, %s6259_s30  ;;  %v7002_v56 = vsel %vm1752_vm11, %v1671_v38, %v6861_v62  ;;  %v7054_v38 = vld [vmem:[#allocation18] ss:$0 sm:$0xff] }
 0xfdb   :  { %1782 = vrot.lane.b32.xlu0 %v7002_v56, %s6259_s30 }
0x1049   :  { %v1674_v22 = vpop.permute.xlu0 %1673 }
0x104a   :  { %5131 = vmatmul.mubr.msk.f32.vlgmr.msra.gmra.mrb[8].mxu1 %vm259_vm1, %v1674_v22 }
0x104b   :  { %5501 = vmatpush3.bf16.msra.mxu1 %v6628_v49  ;;  %5141 = vmatprep.mubr.msk.f32.mxu1 %vm6277_vm0, %v6278_v2 }
0x104c   :  { %5502 = vmatprep.subr.bf16.mxu1 %v6276_v1 }
0x104d   :  { %v1783_v32 = vpop.permute.xlu0 %1782 }
0x104e   :  { %5153 = vmatmul.mubr.msk.f32.vlgmr.msra.gmra.mrb[14].mxu0 %vm259_vm1, %v1783_v32 }
0x104f   :  { %5504 = vmatpush3.bf16.msra.mxu1 %v6646_v55  ;;  %5528 = vmatpush3.bf16.msra.mxu0 %v6828_v40 }
0x1050   :  { %5511 = vmatprep.subr.bf16.mxu1 %v6276_v1  ;;  %5529 = vmatprep.subr.bf16.mxu0 %v6276_v1 }
0x1051   :  { %5186 = vmatprep.mubr.msk.f32.mxu0 %vm6277_vm0, %v6278_v2 }
0x1052   :  { %5142 = vmatmul.mubr.msk.f32.vlgmr.msra.gmra.mrb[10].mxu1 %vm259_vm1, %v1783_v32 }
0x1053   :  { %5513 = vmatpush3.bf16.msra.mxu1 %v6744_v33  ;;  %5175 = vmatprep.mubr.msk.f32.mxu1 %vm6277_vm0, %v6278_v2 }
0x1054   :  { %5514 = vmatprep.subr.bf16.mxu1 %v6276_v1  ;;  %5531 = vmatpush3.bf16.msra.mxu0 %v6834_v11 }
0x1055   :  { %5532 = vmatprep.subr.bf16.mxu0 %v6276_v1 }
0x1057   :  { %5516 = vmatpush3.bf16.msra.mxu1 %v6747_v35 }
0x1058   :  { %5517 = vmatprep.subr.bf16.mxu1 %v6276_v1 }
0x105b   :  { %5519 = vmatpush3.bf16.msra.mxu1 %v6751_v39 }
0x105c   :  { %5520 = vmatprep.subr.bf16.mxu1 %v6276_v1 }
0x105f   :  { %5522 = vmatpush3.bf16.msra.mxu1 %v6755_v42 }
0x1060   :  { %5523 = vmatprep.subr.bf16.mxu1 %v6276_v1 }
0x1063   :  { %5525 = vmatpush3.bf16.msra.mxu1 %v6759_v15 }
0x1064   :  { %5538 = vmatprep.subr.bf16.mxu1 %v6276_v1 }
0x111d   :  { %v1743_v62 = vpop.f32.mrb[8].mxu1 }
0x111e   :  { %v1744_v41 = vadd.f32 %v6895_v6, %v1743_v62  ;;  %v5132_v18 = vpop.f32.mrb[9].mxu1 }
0x1120   :  { %v1753_v21 = vsel %vm1752_vm11, %v1744_v41, 0.0 }
0x1121   :  { %1755 = vst [vmem:[#allocation26 + $0x2] sm:$0x3] %v1753_v21  ;;  %v7036_v43 = vpop.f32.mrb[14].mxu0 }
0x1122   :  { %v5154_v36 = vpop.f32.mrb[15].mxu0 }
0x1125   :  { %v1852_v44 = vpop.f32.mrb[10].mxu1 }
0x1126   :  { %v1853_v46 = vadd.f32 %v7038_v4, %v1852_v44  ;;  %v5143_v20 = vpop.f32.mrb[11].mxu1 }
0x1128   :  { %v1863_v47 = vrot.slane %v1853_v46, %v6671_v17 }
0x112a   :  { %v1864_v51 = vcombine.high %v1863_v47, %v1863_v47  ;;  %v1871_v8 = vrot.slane %v1863_v47, %v6671_v17 }
0x112c   :  { %v1878_v9 = vrot.slane %v1864_v51, %v6671_v17  ;;  %v1882_v5 = vrot.slane %v1871_v8, %v6678_v25 }
0x112e   :  { %v1890_v52 = vadd.f32 %v1882_v5, %v6681_v28  ;;  %v1889_v60 = vadd.f32 %v1882_v5, %v6683_v29  ;;  %v1886_v58 = vrot.slane %v1878_v9, %v6678_v25 }
0x1130   :  { %v1894_v48 = vmax.f32 %v1890_v52, 0.0  ;;  %v1893_v10 = vmax.f32 %v1889_v60, 0.0  ;;  %v1891_v19 = vadd.f32 %v1886_v58, %v6687_v31  ;;  %v1892_v3 = vadd.f32 %v1886_v58, %v6685_v30 }
0x1132   :  { %v1898_v0 = vmul.f32 %v6694_v37, %v1894_v48  ;;  %v1897_v12 = vmul.f32 %v6694_v37, %v1893_v10  ;;  %v1895_v13 = vmax.f32 %v1891_v19, 0.0  ;;  %v1896_v32 = vmax.f32 %v1892_v3, 0.0 }
0x1134   :  { %v1904_v23 = vsel %vm259_vm1, %v1898_v0, 0.0  ;;  %v1901_v34 = vsel %vm259_vm1, %v1897_v12, 0.0  ;;  %v1899_v22 = vmul.f32 %v7054_v38, %v1895_v13  ;;  %v1900_v41 = vmul.f32 %v7054_v38, %v1896_v32 }
0x1135   :  { %1905 = vadd.xlane.f32.xlu1 %v1904_v23  ;;  %1902 = vadd.xlane.f32.xlu0 %v1901_v34 }
0x1136   :  { %v1907_v62 = vsel %vm259_vm1, %v1899_v22, 0.0  ;;  %v1910_v18 = vsel %vm259_vm1, %v1900_v41, 0.0 }
0x1139   :  { %1908 = vadd.xlane.f32.xlu0 %v1907_v62 }
0x113d   :  { %1911 = vadd.xlane.f32.xlu0 %v1910_v18 }
0x11c2   :  { %v1903_v37 = vpop.xlane.xlu0 %1902  ;;  %v1906_v21 = vpop.xlane.xlu1 %1905 }
0x11c3   :  { %v1914_v44 = vadd.f32 %v1906_v21, %v6706_v59  ;;  %v1913_v46 = vadd.f32 %v1903_v37, %v6706_v59 }
0x11c5   :  { %v1928_v51 = vrot.slane %v1914_v44, %v6709_v61  ;;  %v1924_v8 = vrot.slane %v1913_v46, %v6712_v63 }
0x11c6   :  { %v1909_v36 = vpop.xlane.xlu0 %1908 }
0x11c7   :  { %v1915_v20 = vadd.f32 %v1909_v36, %v6706_v59  ;;  %v1929_v60 = vsel %vm738_vm3, %v1928_v51, %v1924_v8 }
0x11c9   :  { %v1933_v5 = vrot.slane %v1915_v20, %v6712_v63 }
0x11ca   :  { %v1912_v47 = vpop.xlane.xlu0 %1911 }
0x11cb   :  { %v1916_v9 = vadd.f32 %v1912_v47, %v6706_v59 }
0x11cd   :  { %v1937_v52 = vrot.slane %v1916_v9, %v6709_v61 }
0x11cf   :  { %v1938_v58 = vsel %vm738_vm3, %v1937_v52, %v1933_v5 }
0x11d0   :  { %v1939_v48 = vsel %vm391_vm2, %v1938_v58, %v1929_v60 }
0x11d1   :  { %v1941_v10 = vsel %vm751_vm4, %v1939_v48, -inf }
0x11d2   :  { %1942 = vmax.xlane.f32.xlu0 %v1941_v10 }
0x125f   :  { %v1943_v19 = vpop.xlane.xlu0 %1942 }
0x1260   :  { %v1948_v3 = vrot.slane %v1943_v19, %v6678_v25  ;;  %v1952_v0 = vrot.slane %v1943_v19, %v6729_v27 }
0x1262   :  { %v1955_v12 = vsub.f32 %v1913_v46, %v1948_v3  ;;  %v1956_v13 = vsub.f32 %v1914_v44, %v1948_v3  ;;  %v1957_v23 = vsub.f32 %v1915_v20, %v1952_v0  ;;  %v1958_v32 = vsub.f32 %v1916_v9, %v1952_v0 }
0x1264   :  { %v1959_v34 = vmul.f32 1.442695, %v1955_v12  ;;  %v1961_v22 = vmul.f32 1.442695, %v1956_v13  ;;  %v1963_v62 = vmul.f32 1.442695, %v1957_v23 }
0x1265   :  { %v1965_v41 = vmul.f32 1.442695, %v1958_v32  ;;  %v2132_v32 = vadd.f32 %v6764_v45, %v7036_v43 }
0x1266   :  { %5746 = vpow2.f32 %v1959_v34 }
0x1267   :  { %5748 = vpow2.f32 %v1961_v22 }
0x1268   :  { %5750 = vpow2.f32 %v1963_v62  ;;  %v4757_v62 = vmul.f32 -1.442695, %v2132_v32 }
0x1269   :  { %5752 = vpow2.f32 %v1965_v41 }
0x1270   :  { %v5747_v18 = vpop.eup %5746 }
0x1271   :  { %v5749_v37 = vpop.eup %5748  ;;  %1972 = vperm.xlu0 %5697, %v5747_v18  }
0x1272   :  { %1975 = vperm.xlu1 %5696, %v5749_v37   ;;  %v5751_v21 = vpop.eup %5750 }
0x1273   :  { %v5753_v36 = vpop.eup %5752 }
0x1276   :  { %1978 = vperm.xlu1 %5696, %v5751_v21  }
0x127a   :  { %1981 = vperm.xlu1 %5696, %v5753_v36  }
0x12f0   :  { %v1973_v44 = vpop.permute.xlu0 %1972 }
0x12f1   :  { %v1976_v46 = vpop.permute.xlu1 %1975  ;;  %v1986_v51 = vrot.slane %v1973_v44, %v6712_v63 }
0x12f2   :  { %v1990_v47 = vrot.slane %v1976_v46, %v6709_v61  ;;  %v7088_v46 = vld [vmem:[#allocation3] sm:$0xff] }
0x12f4   :  { %v1991_v52 = vsel %vm738_vm3, %v1990_v47, %v1986_v51  ;;  %v7102_v51 = vld [vmem:[#allocation3 + $0x10] sm:$0xff] }
0x12f5   :  { %v1979_v20 = vpop.permute.xlu1 %1978 }
0x12f6   :  { %v1995_v9 = vrot.slane %v1979_v20, %v6712_v63 }
0x12f9   :  { %v1982_v8 = vpop.permute.xlu1 %1981 }
0x12fa   :  { %v1999_v5 = vrot.slane %v1982_v8, %v6709_v61 }
0x12fc   :  { %v2000_v60 = vsel %vm738_vm3, %v1999_v5, %v1995_v9 }
0x12fd   :  { %v2001_v58 = vsel %vm391_vm2, %v2000_v60, %v1991_v52 }
0x12fe   :  { %v2003_v48 = vsel %vm751_vm4, %v2001_v58, 0.0 }
0x12ff   :  { %2004 = vadd.xlane.f32.xlu0 %v2003_v48 }
0x138c   :  { %v2005_v10 = vpop.xlane.xlu0 %2004 }
0x138d   :  { %v2010_v19 = vrot.slane %v2005_v10, %v6678_v25  ;;  %v2014_v3 = vrot.slane %v2005_v10, %v6729_v27 }
0x138f   :  { %5754 = vrcp.f32 %v2010_v19 }
0x1390   :  { %5756 = vrcp.f32 %v2014_v3 }
0x1391   :  { %5758 = vpow2.f32 %v4757_v62 }
0x1399   :  { %v5755_v0 = vpop.eup %5754 }
0x139a   :  { %v2018_v12 = vmul.f32 %v5755_v0, %v5747_v18  ;;  %v2019_v13 = vmul.f32 %v5755_v0, %v5749_v37  ;;  %v5757_v23 = vpop.eup %5756  ;;  %v7094_v37 = vld [vmem:[#allocation3 + $0x8] sm:$0xff] }
0x139b   :  { %v2021_v34 = vmul.f32 %v5757_v23, %v5751_v21  ;;  %v2022_v22 = vmul.f32 %v5757_v23, %v5753_v36  ;;  %v5759_v52 = vpop.eup %5758 }
0x139c   :  { %2025 = vperm.xlu1 %5696, %v2018_v12   ;;  %v2138_v10 = vadd.f32 1.0, %v5759_v52 }
0x139e   :  { %5760 = vrcp.f32 %v2138_v10 }
0x13a0   :  { %2030 = vperm.xlu1 %5696, %v2019_v13  }
0x13a4   :  { %2035 = vperm.xlu1 %5696, %v2021_v34  }
0x13a8   :  { %2040 = vperm.xlu1 %5696, %v2022_v22  }
0x141b   :  { %v7086_v41 = vpop.permute.xlu1 %2025 }
0x141c   :  { %v2043_v18 = vmul.f32 %v7088_v46, %v7086_v41  ;;  %v2341_v14 = vrot.slane %v7086_v41, %v6712_v63 }
0x141e   :  { %v2047_v36 = vsel %vm259_vm1, %v2043_v18, 0.0 }
0x141f   :  { %v7092_v44 = vpop.permute.xlu1 %2030 }
0x1420   :  { %v2044_v21 = vmul.f32 %v7094_v37, %v7092_v44 }
0x1422   :  { %v2048_v45 = vsel %vm259_vm1, %v2044_v21, 0.0  ;;  %v5761_v21 = vpop.eup %5760 }
0x1423   :  { %v2049_v43 = vadd.f32 %v2048_v45, %v2047_v36  ;;  %v7100_v20 = vpop.permute.xlu1 %2035 }
0x1424   :  { %v2045_v8 = vmul.f32 %v7102_v51, %v7100_v20 }
0x1425   :  { %v2050_v47 = vrot.slane %v2049_v43, 4 }
0x1426   :  { %v2056_v58 = vsel %vm259_vm1, %v2045_v8, 0.0 }
0x1427   :  { %v2051_v9 = vadd.f32 %v2050_v47, %v2049_v43  ;;  %v7106_v5 = vpop.permute.xlu1 %2040  ;;  %v2147_v47 = vld [vmem:[#allocation6 + $0x4] sm:$0x3] }
0x1428   :  { %v2046_v60 = vmul.f32 %v6958_v16, %v7106_v5  ;;  %v2354_v53 = vrot.slane %v7106_v5, %v6709_v61 }
0x1429   :  { %v2052_v19 = vrot.slane %v2051_v9, 2 }
0x142a   :  { %v2057_v48 = vsel %vm259_vm1, %v2046_v60, 0.0 }
0x142b   :  { %v2058_v3 = vadd.f32 %v2057_v48, %v2056_v58  ;;  %v2053_v12 = vadd.f32 %v2052_v19, %v2051_v9 }
0x142d   :  { %v2059_v0 = vrot.slane %v2058_v3, 4  ;;  %v2054_v22 = vrot.slane %v2053_v12, 1 }
0x142f   :  { %v2060_v13 = vadd.f32 %v2059_v0, %v2058_v3  ;;  %v2055_v62 = vadd.f32 %v2054_v22, %v2053_v12 }
0x1431   :  { %v2061_v23 = vrot.slane %v2060_v13, 2 }
0x1433   :  { %v2062_v34 = vadd.f32 %v2061_v23, %v2060_v13 }
0x1435   :  { %v2063_v32 = vrot.slane %v2062_v34, 1 }
0x1437   :  { %v2064_v18 = vadd.f32 %v2063_v32, %v2062_v34 }
0x1439   :  { %v2143_v36 = vsel %vm391_vm2, %v2064_v18, %v2055_v62  ;;  %v2330_v18 = vsel %vm2329_vm12, 1, %v6280_v26 }
0x143a   :  { %v2145_v45 = vmul.f32 %v5761_v21, %v2143_v36 }
0x143c   :  { %2149 = vrot.lane.b32.xlu1 %v2145_v45, %s6282_s12 }
0x1440   :  { %2152 = vrot.lane.b32.xlu1 %v7002_v56, %s6285_s25 }
0x14ae   :  { %v2150_v43 = vpop.permute.xlu1 %2149 }
0x14af   :  { %v2155_v8 = vsel %vm971_vm5, %v2147_v47, %v2150_v43 }
0x14b2   :  { %v2153_v9 = vpop.permute.xlu1 %2152 }
0x14b3   :  { %v2156_v52 = vsel %vm973_vm6, %v2155_v8, %v2153_v9 }
0x14b4   :  { %5176 = vmatmul.mubr.msk.f32.vlgmr.msra.gmra.mrb[12].mxu1 %vm981_vm7, %v2156_v52 }
0x14b5   :  { %5540 = vmatpush3.bf16.msra.mxu1 %v6632_v50  ;;  %5208 = vmatprep.mubr.msk.f32.mxu1 %vm6277_vm0, %v6278_v2 }
0x14b6   :  { %5541 = vmatprep.subr.bf16.mxu1 %v6276_v1 }
0x14b9   :  { %5543 = vmatpush3.bf16.msra.mxu1 %v6648_v57 }
0x14ba   :  { %5559 = vmatprep.subr.bf16.mxu1 %v6276_v1 }
0x1587   :  { %v2226_v60 = vpop.f32.mrb[12].mxu1 }
0x1588   :  { %v2227_v58 = vadd.f32 %v6799_v54, %v2226_v60  ;;  %v5177_v48 = vpop.f32.mrb[13].mxu1  ;;  %v7132_v54 = vsel %vm1752_vm11, %v6994_v24, %v6991_v7  ;;  %v2345_v7 = vrot.slane %v7092_v44, %v6709_v61  ;;  %v2350_v24 = vrot.slane %v7100_v20, %v6712_v63 }
0x158a   :  { %5762 = vtanh.f32 %v2227_v58  ;;  %v4759_v19 = vmul.f32 -1.442695, %v2227_v58  ;;  %v2355_v45 = vsel %vm738_vm3, %v2354_v53, %v2350_v24  ;;  %v2346_v43 = vsel %vm738_vm3, %v2345_v7, %v2341_v14 }
0x158b   :  { %v2356_v8 = vsel %vm391_vm2, %v2355_v45, %v2346_v43 }
0x158c   :  { %5764 = vpow2.f32 %v4759_v19 }
0x1594   :  { %v5763_v10 = vpop.eup %5762 }
0x1595   :  { %2239 = vrot.lane.b32.xlu1 %v5763_v10, %s6283_s2 }
0x1596   :  { %v5765_v3 = vpop.eup %5764 }
0x1597   :  { %v2233_v0 = vadd.f32 1.0, %v5765_v3 }
0x1599   :  { %5766 = vrcp.f32 %v2233_v0 }
0x15a3   :  { %v5767_v12 = vpop.eup %5766 }
0x15a4   :  { %v2237_v34 = vmul.f32 %v5767_v12, %v7132_v54 }
0x1607   :  { %v2240_v13 = vpop.permute.xlu1 %2239 }
0x1608   :  { %v2242_v23 = vmul.f32 %v5767_v12, %v2240_v13 }
0x160a   :  { %2244 = vrot.lane.b32.xlu0 %v2242_v23, %s6259_s30 }
0x167c   :  { %v2245_v22 = vpop.permute.xlu0 %2244 }
0x167d   :  { %v7135_v32 = vadd.f32 %v2245_v22, %v2237_v34 }
0x167f   :  { %5768 = vtanh.f32 %v7135_v32 }
0x1689   :  { %v5769_v62 = vpop.eup %5768 }
0x168a   :  { %2250 = vrot.lane.b32.xlu1 %v5769_v62, %s6283_s2 }
0x168e   :  { %2332 = vperm.xlu1 %5696, %v2330_v18  }
0x16fc   :  { %v2251_v21 = vpop.permute.xlu1 %2250 }
0x16fd   :  { %v2253_v36 = vmul.f32 %v5767_v12, %v2251_v21 }
0x16ff   :  { %2255 = vrot.lane.b32.xlu1 %v2253_v36, %s6259_s30 }
0x170d   :  { %v7152_v47 = vpop.permute.xlu1 %2332 }
0x170e   :  { %vm2334_vm13 = vcmp.eq.s32.totalorder %v7152_v47, 1 }
0x170f   :  { %v2358_v5 = vsel %vm2334_vm13, %v2356_v8, 0.0  ;;  %v7161_v44 = vsel %vm2334_vm13, %v2253_v36, %v7002_v56 }
0x1710   :  { %2360 = vst.msk [vmem:[#allocation27 + $0x4] sm:$0x3] %vm751_vm4, %v2358_v5  ;;  %2364 = vrot.lane.b32.xlu1 %v7161_v44, %s6259_s30 }
0x1771   :  { %v2256_v41 = vpop.permute.xlu1 %2255 }
0x1772   :  { %5187 = vmatmul.mubr.msk.f32.vlgmr.msra.gmra.mrb[16].mxu0 %vm259_vm1, %v2256_v41 }
0x1773   :  { %5534 = vmatpush3.bf16.msra.mxu0 %v6628_v49  ;;  %5197 = vmatprep.mubr.msk.f32.mxu0 %vm6277_vm0, %v6278_v2 }
0x1774   :  { %5535 = vmatprep.subr.bf16.mxu0 %v6276_v1 }
0x1777   :  { %5537 = vmatpush3.bf16.msra.mxu0 %v6646_v55 }
0x1778   :  { %5544 = vmatprep.subr.bf16.mxu0 %v6276_v1 }
0x1782   :  { %v2365_v56 = vpop.permute.xlu1 %2364 }
0x1783   :  { %5198 = vmatmul.mubr.msk.f32.vlgmr.msra.gmra.mrb[18].mxu0 %vm259_vm1, %v2365_v56  ;;  %5209 = vmatmul.mubr.msk.f32.vlgmr.msra.gmra.mrb[14].mxu1 %vm259_vm1, %v2365_v56 }
0x1784   :  { %5546 = vmatpush3.bf16.msra.mxu0 %v6744_v33  ;;  %5231 = vmatprep.mubr.msk.f32.mxu0 %vm6277_vm0, %v6278_v2 }
0x1785   :  { %5547 = vmatprep.subr.bf16.mxu0 %v6276_v1  ;;  %5561 = vmatpush3.bf16.msra.mxu1 %v6828_v40 }
0x1786   :  { %5562 = vmatprep.subr.bf16.mxu1 %v6276_v1  ;;  %5242 = vmatprep.mubr.msk.f32.mxu1 %vm6277_vm0, %v6278_v2 }
0x1788   :  { %5549 = vmatpush3.bf16.msra.mxu0 %v6747_v35 }
0x1789   :  { %5550 = vmatprep.subr.bf16.mxu0 %v6276_v1  ;;  %5564 = vmatpush3.bf16.msra.mxu1 %v6834_v11 }
0x178a   :  { %5565 = vmatprep.subr.bf16.mxu1 %v6276_v1 }
0x178c   :  { %5552 = vmatpush3.bf16.msra.mxu0 %v6751_v39 }
0x178d   :  { %5553 = vmatprep.subr.bf16.mxu0 %v6276_v1 }
0x1790   :  { %5555 = vmatpush3.bf16.msra.mxu0 %v6755_v42 }
0x1791   :  { %5556 = vmatprep.subr.bf16.mxu0 %v6276_v1 }
0x1794   :  { %5558 = vmatpush3.bf16.msra.mxu0 %v6759_v15 }
0x1795   :  { %5571 = vmatprep.subr.bf16.mxu0 %v6276_v1 }
0x1845   :  { %v2325_v20 = vpop.f32.mrb[16].mxu0 }
0x1846   :  { %v2326_v9 = vadd.f32 %v6895_v6, %v2325_v20  ;;  %v5188_v52 = vpop.f32.mrb[17].mxu0 }
0x1848   :  { %v2335_v60 = vsel %vm2334_vm13, %v2326_v9, 0.0 }
0x1849   :  { %2337 = vst [vmem:[#allocation26 + $0x4] sm:$0x3] %v2335_v60 }
0x1856   :  { %v2434_v58 = vpop.f32.mrb[18].mxu0  ;;  %v7196_v48 = vpop.f32.mrb[14].mxu1 }
0x1857   :  { %v2435_v10 = vadd.f32 %v7038_v4, %v2434_v58  ;;  %v5199_v19 = vpop.f32.mrb[19].mxu0  ;;  %v5210_v3 = vpop.f32.mrb[15].mxu1 }
0x1859   :  { %v2445_v0 = vrot.slane %v2435_v10, %v6671_v17 }
0x185b   :  { %v2446_v12 = vcombine.high %v2445_v0, %v2445_v0  ;;  %v2453_v13 = vrot.slane %v2445_v0, %v6671_v17 }
0x185d   :  { %v2460_v23 = vrot.slane %v2446_v12, %v6671_v17  ;;  %v2464_v6 = vrot.slane %v2453_v13, %v6678_v25 }
0x185f   :  { %v2472_v34 = vadd.f32 %v2464_v6, %v6681_v28  ;;  %v2471_v22 = vadd.f32 %v2464_v6, %v6683_v29  ;;  %v2468_v62 = vrot.slane %v2460_v23, %v6678_v25 }
0x1861   :  { %v2476_v18 = vmax.f32 %v2472_v34, 0.0  ;;  %v2475_v21 = vmax.f32 %v2471_v22, 0.0  ;;  %v2474_v36 = vadd.f32 %v2468_v62, %v6685_v30  ;;  %v2473_v53 = vadd.f32 %v2468_v62, %v6687_v31 }
0x1863   :  { %v2480_v7 = vmul.f32 %v7054_v38, %v2476_v18  ;;  %v2479_v24 = vmul.f32 %v7054_v38, %v2475_v21  ;;  %v2478_v14 = vmax.f32 %v2474_v36, 0.0  ;;  %v2477_v45 = vmax.f32 %v2473_v53, 0.0 }
0x1865   :  { %v2486_v43 = vsel %vm259_vm1, %v2480_v7, 0.0  ;;  %v2483_v8 = vsel %vm259_vm1, %v2479_v24, 0.0  ;;  %v2482_v5 = vmul.f32 %v7054_v38, %v2478_v14  ;;  %v2481_v41 = vmul.f32 %v7054_v38, %v2477_v45 }
0x1866   :  { %2487 = vadd.xlane.f32.xlu0 %v2486_v43  ;;  %2484 = vadd.xlane.f32.xlu1 %v2483_v8 }
0x1867   :  { %v2492_v56 = vsel %vm259_vm1, %v2482_v5, 0.0  ;;  %v2489_v20 = vsel %vm259_vm1, %v2481_v41, 0.0 }
0x186a   :  { %2493 = vadd.xlane.f32.xlu0 %v2492_v56  ;;  %2490 = vadd.xlane.f32.xlu1 %v2489_v20 }
0x18f3   :  { %v2488_v9 = vpop.xlane.xlu0 %2487  ;;  %v2485_v52 = vpop.xlane.xlu1 %2484 }
0x18f4   :  { %v2496_v60 = vadd.f32 %v2488_v9, %v6706_v59  ;;  %v2495_v58 = vadd.f32 %v2485_v52, %v6706_v59 }
0x18f6   :  { %v2510_v3 = vrot.slane %v2496_v60, %v6709_v61  ;;  %v2506_v0 = vrot.slane %v2495_v58, %v6712_v63 }
0x18f7   :  { %v2494_v10 = vpop.xlane.xlu0 %2493  ;;  %v2491_v19 = vpop.xlane.xlu1 %2490 }
0x18f8   :  { %v2498_v12 = vadd.f32 %v2494_v10, %v6706_v59  ;;  %v2497_v13 = vadd.f32 %v2491_v19, %v6706_v59  ;;  %v2511_v34 = vsel %vm738_vm3, %v2510_v3, %v2506_v0 }
0x18fa   :  { %v2519_v23 = vrot.slane %v2498_v12, %v6709_v61  ;;  %v2515_v6 = vrot.slane %v2497_v13, %v6712_v63 }
0x18fc   :  { %v2520_v22 = vsel %vm738_vm3, %v2519_v23, %v2515_v6 }
0x18fd   :  { %v2521_v62 = vsel %vm391_vm2, %v2520_v22, %v2511_v34 }
0x18fe   :  { %v2523_v18 = vsel %vm751_vm4, %v2521_v62, -inf  ;;  %v7241_v62 = vld [vmem:[%s7777_s6] sm:$0x3] }
0x18ff   :  { %2524 = vmax.xlane.f32.xlu1 %v2523_v18  ;;  %vm2911_vm14 = vcmp.gt.s32.totalorder %v7241_v62, 3  ;;  %vm3493_vm8 = vcmp.gt.s32.totalorder %v7241_v62, 4  ;;  %vm4075_vm10 = vcmp.gt.s32.totalorder %v7241_v62, 5 }
0x1900   :  { %v2912_v18 = vsel %vm2911_vm14, 1, %v6280_v26 }
0x198c   :  { %v2525_v21 = vpop.xlane.xlu1 %2524 }
0x198d   :  { %v2530_v36 = vrot.slane %v2525_v21, %v6678_v25  ;;  %v2534_v53 = vrot.slane %v2525_v21, %v6729_v27 }
0x198f   :  { %v2537_v7 = vsub.f32 %v2495_v58, %v2530_v36  ;;  %v2538_v24 = vsub.f32 %v2496_v60, %v2530_v36  ;;  %v2540_v14 = vsub.f32 %v2498_v12, %v2534_v53  ;;  %v2539_v45 = vsub.f32 %v2497_v13, %v2534_v53 }
0x1991   :  { %v2541_v43 = vmul.f32 1.442695, %v2537_v7  ;;  %v2543_v8 = vmul.f32 1.442695, %v2538_v24  ;;  %v2547_v5 = vmul.f32 1.442695, %v2540_v14 }
0x1992   :  { %v2545_v41 = vmul.f32 1.442695, %v2539_v45 }
0x1993   :  { %5770 = vpow2.f32 %v2541_v43 }
0x1994   :  { %5772 = vpow2.f32 %v2543_v8 }
0x1995   :  { %5774 = vpow2.f32 %v2547_v5  ;;  %v7247_v5 = vld [vmem:[#allocation21] ss:$0 sm:$0xff] }
0x1996   :  { %5776 = vpow2.f32 %v2545_v41  ;;  %v2714_v41 = vadd.f32 %v7247_v5, %v7196_v48 }
0x199d   :  { %v5771_v56 = vpop.eup %5770 }
0x199e   :  { %v5773_v20 = vpop.eup %5772  ;;  %2554 = vperm.xlu0 %5697, %v5771_v56  }
0x199f   :  { %2557 = vperm.xlu1 %5696, %v5773_v20   ;;  %v5775_v9 = vpop.eup %5774 }
0x19a0   :  { %v5777_v52 = vpop.eup %5776 }
0x19a2   :  { %2563 = vperm.xlu0 %5697, %v5775_v9  }
0x19a3   :  { %2560 = vperm.xlu1 %5696, %v5777_v52  }
0x1a1d   :  { %v2555_v58 = vpop.permute.xlu0 %2554 }
0x1a1e   :  { %v2558_v60 = vpop.permute.xlu1 %2557  ;;  %v2568_v19 = vrot.slane %v2555_v58, %v6712_v63  ;;  %v4763_v58 = vmul.f32 -1.442695, %v2714_v41 }
0x1a1f   :  { %v2572_v10 = vrot.slane %v2558_v60, %v6709_v61 }
0x1a21   :  { %v2564_v3 = vpop.permute.xlu0 %2563  ;;  %v2573_v23 = vsel %vm738_vm3, %v2572_v10, %v2568_v19 }
0x1a22   :  { %v2561_v0 = vpop.permute.xlu1 %2560  ;;  %v2581_v12 = vrot.slane %v2564_v3, %v6709_v61 }
0x1a23   :  { %v2577_v13 = vrot.slane %v2561_v0, %v6712_v63 }
0x1a25   :  { %v2582_v6 = vsel %vm738_vm3, %v2581_v12, %v2577_v13 }
0x1a26   :  { %v2583_v34 = vsel %vm391_vm2, %v2582_v6, %v2573_v23 }
0x1a27   :  { %v2585_v22 = vsel %vm751_vm4, %v2583_v34, 0.0 }
0x1a28   :  { %2586 = vadd.xlane.f32.xlu1 %v2585_v22 }
0x1a39   :  { %2914 = vperm.xlu1 %5696, %v2912_v18  }
0x1ab5   :  { %v2587_v21 = vpop.xlane.xlu1 %2586 }
0x1ab6   :  { %v2592_v36 = vrot.slane %v2587_v21, %v6678_v25  ;;  %v2596_v53 = vrot.slane %v2587_v21, %v6729_v27 }
0x1ab8   :  { %5778 = vrcp.f32 %v2592_v36 }
0x1ab9   :  { %5780 = vrcp.f32 %v2596_v53  ;;  %v7257_v34 = vpop.permute.xlu1 %2914 }
0x1aba   :  { %5782 = vpow2.f32 %v4763_v58  ;;  %vm2916_vm15 = vcmp.eq.s32.totalorder %v7257_v34, 1 }
0x1ac2   :  { %v5779_v7 = vpop.eup %5778 }
0x1ac3   :  { %v2600_v24 = vmul.f32 %v5779_v7, %v5771_v56  ;;  %v2601_v14 = vmul.f32 %v5779_v7, %v5773_v20  ;;  %v5781_v45 = vpop.eup %5780 }
0x1ac4   :  { %v2603_v43 = vmul.f32 %v5781_v45, %v5777_v52  ;;  %v2604_v8 = vmul.f32 %v5781_v45, %v5775_v9  ;;  %v5783_v12 = vpop.eup %5782 }
0x1ac5   :  { %2607 = vperm.xlu0 %5697, %v2600_v24   ;;  %v2720_v53 = vadd.f32 1.0, %v5783_v12 }
0x1ac7   :  { %5784 = vrcp.f32 %v2720_v53 }
0x1ac9   :  { %2612 = vperm.xlu0 %5697, %v2601_v14  }
0x1acd   :  { %2617 = vperm.xlu0 %5697, %v2603_v43  }
0x1ad1   :  { %2622 = vperm.xlu0 %5697, %v2604_v8  }
0x1b44   :  { %v2608_v60 = vpop.permute.xlu0 %2607 }
0x1b45   :  { %v2625_v10 = vmul.f32 %v7088_v46, %v2608_v60  ;;  %v2923_v22 = vrot.slane %v2608_v60, %v6712_v63 }
0x1b47   :  { %v2629_v20 = vsel %vm259_vm1, %v2625_v10, 0.0 }
0x1b48   :  { %v2613_v19 = vpop.permute.xlu0 %2612 }
0x1b49   :  { %v2626_v56 = vmul.f32 %v7094_v37, %v2613_v19  ;;  %v2927_v13 = vrot.slane %v2613_v19, %v6709_v61 }
0x1b4b   :  { %v2630_v52 = vsel %vm259_vm1, %v2626_v56, 0.0  ;;  %v2928_v7 = vsel %vm738_vm3, %v2927_v13, %v2923_v22 }
0x1b4c   :  { %v2631_v3 = vadd.f32 %v2630_v52, %v2629_v20  ;;  %v2618_v9 = vpop.permute.xlu0 %2617 }
0x1b4d   :  { %v2627_v48 = vmul.f32 %v7102_v51, %v2618_v9  ;;  %v2932_v18 = vrot.slane %v2618_v9, %v6712_v63 }
0x1b4e   :  { %v2632_v0 = vrot.slane %v2631_v3, 4 }
0x1b4f   :  { %v2638_v24 = vsel %vm259_vm1, %v2627_v48, 0.0 }
0x1b50   :  { %v2633_v23 = vadd.f32 %v2632_v0, %v2631_v3  ;;  %v2623_v6 = vpop.permute.xlu0 %2622  ;;  %v5785_v0 = vpop.eup %5784 }
0x1b51   :  { %v2628_v21 = vmul.f32 %v6958_v16, %v2623_v6  ;;  %v2936_v36 = vrot.slane %v2623_v6, %v6709_v61  ;;  %v2729_v6 = vld [vmem:[#allocation6 + $0x6] sm:$0x3] }
0x1b52   :  { %v2634_v43 = vrot.slane %v2633_v23, 2 }
0x1b53   :  { %v2639_v14 = vsel %vm259_vm1, %v2628_v21, 0.0  ;;  %v2937_v45 = vsel %vm738_vm3, %v2936_v36, %v2932_v18  ;;  %v7285_v36 = vld [vmem:[#allocation24] ss:$0 sm:$0xff] }
0x1b54   :  { %v2640_v8 = vadd.f32 %v2639_v14, %v2638_v24  ;;  %v2938_v41 = vsel %vm391_vm2, %v2937_v45, %v2928_v7  ;;  %v2635_v60 = vadd.f32 %v2634_v43, %v2633_v23 }
0x1b55   :  { %v2940_v16 = vsel %vm2916_vm15, %v2938_v41, 0.0 }
0x1b56   :  { %v2641_v58 = vrot.slane %v2640_v8, 4  ;;  %2942 = vst.msk [vmem:[#allocation27 + $0x6] sm:$0x3] %vm751_vm4, %v2940_v16  ;;  %v2636_v56 = vrot.slane %v2635_v60, 1 }
0x1b58   :  { %v2642_v10 = vadd.f32 %v2641_v58, %v2640_v8  ;;  %v2637_v3 = vadd.f32 %v2636_v56, %v2635_v60  ;;  %v7294_v58 = vsel %vm2334_vm13, %v7135_v32, %v7132_v54 }
0x1b5a   :  { %v2643_v19 = vrot.slane %v2642_v10, 2 }
0x1b5c   :  { %v2644_v20 = vadd.f32 %v2643_v19, %v2642_v10 }
0x1b5e   :  { %v2645_v52 = vrot.slane %v2644_v20, 1 }
0x1b60   :  { %v2646_v9 = vadd.f32 %v2645_v52, %v2644_v20 }
0x1b62   :  { %v2725_v12 = vsel %vm391_vm2, %v2646_v9, %v2637_v3  ;;  %v7339_v3 = vld [vmem:[%s7756_s18] ss:$0 sm:$0xff] }
0x1b63   :  { %v2727_v13 = vmul.f32 %v5785_v0, %v2725_v12 }
0x1b65   :  { %2731 = vrot.lane.b32.xlu0 %v2727_v13, %s6282_s12 }
0x1b69   :  { %2734 = vrot.lane.b32.xlu0 %v7161_v44, %s6285_s25 }
0x1bd7   :  { %v2732_v48 = vpop.permute.xlu0 %2731 }
0x1bd8   :  { %v2737_v23 = vsel %vm971_vm5, %v2729_v6, %v2732_v48 }
0x1bdb   :  { %v2735_v22 = vpop.permute.xlu0 %2734 }
0x1bdc   :  { %v2738_v18 = vsel %vm973_vm6, %v2737_v23, %v2735_v22 }
0x1bdd   :  { %5232 = vmatmul.mubr.msk.f32.vlgmr.msra.gmra.mrb[20].mxu0 %vm981_vm7, %v2738_v18 }
0x1bde   :  { %5573 = vmatpush3.bf16.msra.mxu0 %v6632_v50  ;;  %5264 = vmatprep.mubr.msk.f32.mxu0 %vm6277_vm0, %v6278_v2 }
0x1bdf   :  { %5574 = vmatprep.subr.bf16.mxu0 %v6276_v1 }
0x1be2   :  { %5576 = vmatpush3.bf16.msra.mxu0 %v6648_v57 }
0x1be3   :  { %5592 = vmatprep.subr.bf16.mxu0 %v6276_v1 }
0x1cb0   :  { %v2808_v21 = vpop.f32.mrb[20].mxu0 }
0x1cb1   :  { %v2809_v53 = vadd.f32 %v7285_v36, %v2808_v21  ;;  %v5233_v7 = vpop.f32.mrb[21].mxu0 }
0x1cb3   :  { %5786 = vtanh.f32 %v2809_v53  ;;  %v4765_v14 = vmul.f32 -1.442695, %v2809_v53 }
0x1cb5   :  { %5788 = vpow2.f32 %v4765_v14 }
0x1cbd   :  { %v5787_v24 = vpop.eup %5786 }
0x1cbe   :  { %2821 = vrot.lane.b32.xlu0 %v5787_v24, %s6283_s2 }
0x1cbf   :  { %v5789_v45 = vpop.eup %5788 }
0x1cc0   :  { %v2815_v43 = vadd.f32 1.0, %v5789_v45 }
0x1cc2   :  { %5790 = vrcp.f32 %v2815_v43 }
0x1ccc   :  { %v5791_v8 = vpop.eup %5790 }
0x1ccd   :  { %v2819_v60 = vmul.f32 %v5791_v8, %v7294_v58 }
0x1d30   :  { %v2822_v41 = vpop.permute.xlu0 %2821 }
0x1d31   :  { %v2824_v16 = vmul.f32 %v5791_v8, %v2822_v41 }
0x1d33   :  { %2826 = vrot.lane.b32.xlu0 %v2824_v16, %s6259_s30 }
0x1da5   :  { %v2827_v10 = vpop.permute.xlu0 %2826 }
0x1da6   :  { %v7297_v19 = vadd.f32 %v2827_v10, %v2819_v60 }
0x1da8   :  { %5792 = vtanh.f32 %v7297_v19 }
0x1db2   :  { %v5793_v56 = vpop.eup %5792 }
0x1db3   :  { %2832 = vrot.lane.b32.xlu0 %v5793_v56, %s6283_s2 }
0x1e25   :  { %v2833_v20 = vpop.permute.xlu0 %2832 }
0x1e26   :  { %v2835_v52 = vmul.f32 %v5791_v8, %v2833_v20 }
0x1e28   :  { %2837 = vrot.lane.b32.xlu0 %v2835_v52, %s6259_s30  ;;  %v7305_v47 = vsel %vm2916_vm15, %v2835_v52, %v7161_v44 }
0x1e2c   :  { %2946 = vrot.lane.b32.xlu0 %v7305_v47, %s6259_s30 }
0x1e9a   :  { %v2838_v54 = vpop.permute.xlu0 %2837 }
0x1e9b   :  { %5243 = vmatmul.mubr.msk.f32.vlgmr.msra.gmra.mrb[16].mxu1 %vm259_vm1, %v2838_v54 }
0x1e9c   :  { %5567 = vmatpush3.bf16.msra.mxu1 %v6628_v49  ;;  %5253 = vmatprep.mubr.msk.f32.mxu1 %vm6277_vm0, %v6278_v2 }
0x1e9d   :  { %5568 = vmatprep.subr.bf16.mxu1 %v6276_v1 }
0x1e9e   :  { %v2947_v32 = vpop.permute.xlu0 %2946 }
0x1e9f   :  { %5265 = vmatmul.mubr.msk.f32.vlgmr.msra.gmra.mrb[22].mxu0 %vm259_vm1, %v2947_v32 }
0x1ea0   :  { %5570 = vmatpush3.bf16.msra.mxu1 %v6646_v55  ;;  %5594 = vmatpush3.bf16.msra.mxu0 %v6828_v40 }
0x1ea1   :  { %5577 = vmatprep.subr.bf16.mxu1 %v6276_v1  ;;  %5595 = vmatprep.subr.bf16.mxu0 %v6276_v1 }
0x1ea2   :  { %5298 = vmatprep.mubr.msk.f32.mxu0 %vm6277_vm0, %v6278_v2 }
0x1ea3   :  { %5254 = vmatmul.mubr.msk.f32.vlgmr.msra.gmra.mrb[18].mxu1 %vm259_vm1, %v2947_v32 }
0x1ea4   :  { %5579 = vmatpush3.bf16.msra.mxu1 %v6744_v33  ;;  %5287 = vmatprep.mubr.msk.f32.mxu1 %vm6277_vm0, %v6278_v2 }
0x1ea5   :  { %5580 = vmatprep.subr.bf16.mxu1 %v6276_v1  ;;  %5597 = vmatpush3.bf16.msra.mxu0 %v6834_v11 }
0x1ea6   :  { %5598 = vmatprep.subr.bf16.mxu0 %v6276_v1 }
0x1ea8   :  { %5582 = vmatpush3.bf16.msra.mxu1 %v6747_v35 }
0x1ea9   :  { %5583 = vmatprep.subr.bf16.mxu1 %v6276_v1 }
0x1eac   :  { %5585 = vmatpush3.bf16.msra.mxu1 %v6751_v39 }
0x1ead   :  { %5586 = vmatprep.subr.bf16.mxu1 %v6276_v1 }
0x1eb0   :  { %5588 = vmatpush3.bf16.msra.mxu1 %v6755_v42 }
0x1eb1   :  { %5589 = vmatprep.subr.bf16.mxu1 %v6276_v1 }
0x1eb4   :  { %5591 = vmatpush3.bf16.msra.mxu1 %v6759_v15 }
0x1eb5   :  { %5604 = vmatprep.subr.bf16.mxu1 %v6276_v1 }
0x1f6e   :  { %v2907_v44 = vpop.f32.mrb[16].mxu1 }
0x1f6f   :  { %v2908_v9 = vadd.f32 %v7339_v3, %v2907_v44  ;;  %v5244_v0 = vpop.f32.mrb[17].mxu1 }
0x1f71   :  { %v2917_v12 = vsel %vm2916_vm15, %v2908_v9, 0.0 }
0x1f72   :  { %2919 = vst [vmem:[#allocation26 + $0x6] sm:$0x3] %v2917_v12  ;;  %v7344_v13 = vpop.f32.mrb[22].mxu0 }
0x1f73   :  { %v5266_v48 = vpop.f32.mrb[23].mxu0 }
0x1f76   :  { %v3016_v6 = vpop.f32.mrb[18].mxu1 }
0x1f77   :  { %v3017_v23 = vadd.f32 %v7038_v4, %v3016_v6  ;;  %v5255_v22 = vpop.f32.mrb[19].mxu1 }
0x1f79   :  { %v3027_v18 = vrot.slane %v3017_v23, %v6671_v17 }
0x1f7b   :  { %v3028_v21 = vcombine.high %v3027_v18, %v3027_v18  ;;  %v3035_v53 = vrot.slane %v3027_v18, %v6671_v17 }
0x1f7d   :  { %v3042_v7 = vrot.slane %v3028_v21, %v6671_v17  ;;  %v3046_v24 = vrot.slane %v3035_v53, %v6678_v25 }
0x1f7f   :  { %v3054_v14 = vadd.f32 %v3046_v24, %v6681_v28  ;;  %v3053_v45 = vadd.f32 %v3046_v24, %v6683_v29  ;;  %v3050_v43 = vrot.slane %v3042_v7, %v6678_v25 }
0x1f81   :  { %v3058_v8 = vmax.f32 %v3054_v14, 0.0  ;;  %v3057_v41 = vmax.f32 %v3053_v45, 0.0  ;;  %v3055_v4 = vadd.f32 %v3050_v43, %v6687_v31  ;;  %v3056_v16 = vadd.f32 %v3050_v43, %v6685_v30 }
0x1f83   :  { %v3062_v60 = vmul.f32 %v7054_v38, %v3058_v8  ;;  %v3061_v10 = vmul.f32 %v7054_v38, %v3057_v41  ;;  %v3059_v56 = vmax.f32 %v3055_v4, 0.0  ;;  %v3060_v32 = vmax.f32 %v3056_v16, 0.0 }
0x1f85   :  { %v3068_v20 = vsel %vm259_vm1, %v3062_v60, 0.0  ;;  %v3065_v52 = vsel %vm259_vm1, %v3061_v10, 0.0  ;;  %v3063_v54 = vmul.f32 %v7054_v38, %v3059_v56  ;;  %v3064_v9 = vmul.f32 %v7054_v38, %v3060_v32 }
0x1f86   :  { %3069 = vadd.xlane.f32.xlu1 %v3068_v20  ;;  %3066 = vadd.xlane.f32.xlu0 %v3065_v52 }
0x1f87   :  { %v3071_v44 = vsel %vm259_vm1, %v3063_v54, 0.0  ;;  %v3074_v0 = vsel %vm259_vm1, %v3064_v9, 0.0 }
0x1f8a   :  { %3072 = vadd.xlane.f32.xlu0 %v3071_v44 }
0x1f8e   :  { %3075 = vadd.xlane.f32.xlu0 %v3074_v0 }
0x2013   :  { %v3067_v12 = vpop.xlane.xlu0 %3066  ;;  %v3070_v48 = vpop.xlane.xlu1 %3069 }
0x2014   :  { %v3078_v23 = vadd.f32 %v3070_v48, %v6706_v59  ;;  %v3077_v22 = vadd.f32 %v3067_v12, %v6706_v59 }
0x2016   :  { %v3092_v53 = vrot.slane %v3078_v23, %v6709_v61  ;;  %v3088_v7 = vrot.slane %v3077_v22, %v6712_v63 }
0x2017   :  { %v3073_v6 = vpop.xlane.xlu0 %3072 }
0x2018   :  { %v3079_v18 = vadd.f32 %v3073_v6, %v6706_v59  ;;  %v3093_v45 = vsel %vm738_vm3, %v3092_v53, %v3088_v7 }
0x201a   :  { %v3097_v24 = vrot.slane %v3079_v18, %v6712_v63 }
0x201b   :  { %v3076_v21 = vpop.xlane.xlu0 %3075 }
0x201c   :  { %v3080_v38 = vadd.f32 %v3076_v21, %v6706_v59 }
0x201e   :  { %v3101_v14 = vrot.slane %v3080_v38, %v6709_v61 }
0x2020   :  { %v3102_v43 = vsel %vm738_vm3, %v3101_v14, %v3097_v24 }
0x2021   :  { %v3103_v8 = vsel %vm391_vm2, %v3102_v43, %v3093_v45 }
0x2022   :  { %v3105_v41 = vsel %vm751_vm4, %v3103_v8, -inf }
0x2023   :  { %3106 = vmax.xlane.f32.xlu0 %v3105_v41 }
0x20b0   :  { %v3107_v4 = vpop.xlane.xlu0 %3106 }
0x20b1   :  { %v3112_v16 = vrot.slane %v3107_v4, %v6678_v25  ;;  %v3116_v60 = vrot.slane %v3107_v4, %v6729_v27 }
0x20b3   :  { %v3119_v10 = vsub.f32 %v3077_v22, %v3112_v16  ;;  %v3120_v56 = vsub.f32 %v3078_v23, %v3112_v16  ;;  %v3121_v20 = vsub.f32 %v3079_v18, %v3116_v60  ;;  %v3122_v32 = vsub.f32 %v3080_v38, %v3116_v60 }
0x20b5   :  { %v3123_v52 = vmul.f32 1.442695, %v3119_v10  ;;  %v3125_v54 = vmul.f32 1.442695, %v3120_v56  ;;  %v3127_v44 = vmul.f32 1.442695, %v3121_v20 }
0x20b6   :  { %v3129_v9 = vmul.f32 1.442695, %v3122_v32  ;;  %v3296_v32 = vadd.f32 %v7247_v5, %v7344_v13 }
0x20b7   :  { %5794 = vpow2.f32 %v3123_v52 }
0x20b8   :  { %5796 = vpow2.f32 %v3125_v54 }
0x20b9   :  { %5798 = vpow2.f32 %v3127_v44  ;;  %v4769_v44 = vmul.f32 -1.442695, %v3296_v32 }
0x20ba   :  { %5800 = vpow2.f32 %v3129_v9 }
0x20c1   :  { %v5795_v0 = vpop.eup %5794 }
0x20c2   :  { %v5797_v12 = vpop.eup %5796  ;;  %3136 = vperm.xlu0 %5697, %v5795_v0  }
0x20c3   :  { %3139 = vperm.xlu1 %5696, %v5797_v12   ;;  %v5799_v48 = vpop.eup %5798 }
0x20c4   :  { %v5801_v6 = vpop.eup %5800 }
0x20c7   :  { %3142 = vperm.xlu1 %5696, %v5799_v48  }
0x20cb   :  { %3145 = vperm.xlu1 %5696, %v5801_v6  }
0x2141   :  { %v3137_v23 = vpop.permute.xlu0 %3136 }
0x2142   :  { %v3140_v22 = vpop.permute.xlu1 %3139  ;;  %v3150_v53 = vrot.slane %v3137_v23, %v6712_v63 }
0x2143   :  { %v3154_v21 = vrot.slane %v3140_v22, %v6709_v61 }
0x2145   :  { %v3155_v14 = vsel %vm738_vm3, %v3154_v21, %v3150_v53 }
0x2146   :  { %v3143_v18 = vpop.permute.xlu1 %3142 }
0x2147   :  { %v3159_v38 = vrot.slane %v3143_v18, %v6712_v63 }
0x214a   :  { %v3146_v7 = vpop.permute.xlu1 %3145 }
0x214b   :  { %v3163_v24 = vrot.slane %v3146_v7, %v6709_v61 }
0x214d   :  { %v3164_v45 = vsel %vm738_vm3, %v3163_v24, %v3159_v38 }
0x214e   :  { %v3165_v43 = vsel %vm391_vm2, %v3164_v45, %v3155_v14 }
0x214f   :  { %v3167_v8 = vsel %vm751_vm4, %v3165_v43, 0.0  ;;  %v7399_v43 = vld [vmem:[#allocation3 + $0x18] sm:$0xff] }
0x2150   :  { %3168 = vadd.xlane.f32.xlu0 %v3167_v8 }
0x21dd   :  { %v3169_v41 = vpop.xlane.xlu0 %3168 }
0x21de   :  { %v3174_v4 = vrot.slane %v3169_v41, %v6678_v25  ;;  %v3178_v16 = vrot.slane %v3169_v41, %v6729_v27 }
0x21e0   :  { %5802 = vrcp.f32 %v3174_v4 }
0x21e1   :  { %5804 = vrcp.f32 %v3178_v16 }
0x21e2   :  { %5806 = vpow2.f32 %v4769_v44 }
0x21ea   :  { %v5803_v60 = vpop.eup %5802 }
0x21eb   :  { %v3182_v10 = vmul.f32 %v5803_v60, %v5795_v0  ;;  %v3183_v56 = vmul.f32 %v5803_v60, %v5797_v12  ;;  %v5805_v20 = vpop.eup %5804 }
0x21ec   :  { %v3185_v52 = vmul.f32 %v5805_v20, %v5799_v48  ;;  %v3186_v54 = vmul.f32 %v5805_v20, %v5801_v6  ;;  %v5807_v14 = vpop.eup %5806 }
0x21ed   :  { %3189 = vperm.xlu1 %5696, %v3182_v10   ;;  %v3302_v60 = vadd.f32 1.0, %v5807_v14 }
0x21ef   :  { %5808 = vrcp.f32 %v3302_v60  ;;  %v7427_v60 = vsel %vm2916_vm15, %v7297_v19, %v7294_v58 }
0x21f1   :  { %3194 = vperm.xlu1 %5696, %v3183_v56  }
0x21f5   :  { %3199 = vperm.xlu1 %5696, %v3185_v52  }
0x21f9   :  { %3204 = vperm.xlu1 %5696, %v3186_v54  }
0x226c   :  { %v3190_v9 = vpop.permute.xlu1 %3189 }
0x226d   :  { %v3207_v22 = vmul.f32 %v7088_v46, %v3190_v9  ;;  %v3505_v18 = vrot.slane %v3190_v9, %v6712_v63 }
0x226f   :  { %v3211_v48 = vsel %vm259_vm1, %v3207_v22, 0.0 }
0x2270   :  { %v3195_v23 = vpop.permute.xlu1 %3194 }
0x2271   :  { %v3208_v0 = vmul.f32 %v7094_v37, %v3195_v23  ;;  %v3509_v12 = vrot.slane %v3195_v23, %v6709_v61 }
0x2273   :  { %v3212_v6 = vsel %vm259_vm1, %v3208_v0, 0.0  ;;  %v3510_v21 = vsel %vm738_vm3, %v3509_v12, %v3505_v18  ;;  %v5809_v0 = vpop.eup %5808 }
0x2274   :  { %v3213_v53 = vadd.f32 %v3212_v6, %v3211_v48  ;;  %v3200_v13 = vpop.permute.xlu1 %3199 }
0x2275   :  { %v3209_v38 = vmul.f32 %v7102_v51, %v3200_v13  ;;  %v3514_v45 = vrot.slane %v3200_v13, %v6712_v63 }
0x2276   :  { %v3214_v7 = vrot.slane %v3213_v53, 4 }
0x2277   :  { %v3220_v41 = vsel %vm259_vm1, %v3209_v38, 0.0 }
0x2278   :  { %v3215_v24 = vadd.f32 %v3214_v7, %v3213_v53  ;;  %v3205_v46 = vpop.permute.xlu1 %3204 }
0x2279   :  { %v3210_v37 = vmul.f32 %v7399_v43, %v3205_v46  ;;  %v3518_v8 = vrot.slane %v3205_v46, %v6709_v61 }
0x227a   :  { %v3216_v10 = vrot.slane %v3215_v24, 2 }
0x227b   :  { %v3221_v4 = vsel %vm259_vm1, %v3210_v37, 0.0  ;;  %v3519_v16 = vsel %vm738_vm3, %v3518_v8, %v3514_v45 }
0x227c   :  { %v3222_v51 = vadd.f32 %v3221_v4, %v3220_v41  ;;  %v3520_v56 = vsel %vm391_vm2, %v3519_v16, %v3510_v21  ;;  %v3217_v52 = vadd.f32 %v3216_v10, %v3215_v24  ;;  %v3311_v21 = vld [vmem:[#allocation6 + $0x8] sm:$0x3] }
0x227e   :  { %v3223_v20 = vrot.slane %v3222_v51, 4  ;;  %v3218_v44 = vrot.slane %v3217_v52, 1 }
0x2280   :  { %v3224_v54 = vadd.f32 %v3223_v20, %v3222_v51  ;;  %v3219_v23 = vadd.f32 %v3218_v44, %v3217_v52 }
0x2282   :  { %v3225_v32 = vrot.slane %v3224_v54, 2 }
0x2284   :  { %v3226_v9 = vadd.f32 %v3225_v32, %v3224_v54  ;;  %v3494_v54 = vsel %vm3493_vm8, 1, %v6280_v26 }
0x2286   :  { %v3227_v22 = vrot.slane %v3226_v9, 1 }
0x2288   :  { %v3228_v18 = vadd.f32 %v3227_v22, %v3226_v9 }
0x228a   :  { %v3307_v12 = vsel %vm391_vm2, %v3228_v18, %v3219_v23 }
0x228b   :  { %v3309_v48 = vmul.f32 %v5809_v0, %v3307_v12 }
0x228d   :  { %3313 = vrot.lane.b32.xlu1 %v3309_v48, %s6282_s12  ;;  %v7482_v48 = vld [vmem:[#allocation17] ss:$0 sm:$0xff] }
0x2291   :  { %3316 = vrot.lane.b32.xlu1 %v7305_v47, %s6285_s25 }
0x22ff   :  { %v3314_v6 = vpop.permute.xlu1 %3313 }
0x2300   :  { %v3319_v53 = vsel %vm971_vm5, %v3311_v21, %v3314_v6 }
0x2303   :  { %v3317_v13 = vpop.permute.xlu1 %3316 }
0x2304   :  { %v3320_v7 = vsel %vm973_vm6, %v3319_v53, %v3317_v13 }
0x2305   :  { %5288 = vmatmul.mubr.msk.f32.vlgmr.msra.gmra.mrb[20].mxu1 %vm981_vm7, %v3320_v7 }
0x2306   :  { %5606 = vmatpush3.bf16.msra.mxu1 %v6632_v50  ;;  %5320 = vmatprep.mubr.msk.f32.mxu1 %vm6277_vm0, %v6278_v2 }
0x2307   :  { %5607 = vmatprep.subr.bf16.mxu1 %v6276_v1 }
0x230a   :  { %5609 = vmatpush3.bf16.msra.mxu1 %v6648_v57 }
0x230b   :  { %5625 = vmatprep.subr.bf16.mxu1 %v6276_v1 }
0x23d8   :  { %v3390_v38 = vpop.f32.mrb[20].mxu1 }
0x23d9   :  { %v3391_v24 = vadd.f32 %v7285_v36, %v3390_v38  ;;  %v5289_v46 = vpop.f32.mrb[21].mxu1 }
0x23db   :  { %5810 = vtanh.f32 %v3391_v24  ;;  %v4771_v45 = vmul.f32 -1.442695, %v3391_v24 }
0x23dd   :  { %5812 = vpow2.f32 %v4771_v45 }
0x23e5   :  { %v5811_v14 = vpop.eup %5810 }
0x23e6   :  { %3403 = vrot.lane.b32.xlu1 %v5811_v14, %s6283_s2 }
0x23e7   :  { %v5813_v37 = vpop.eup %5812 }
0x23e8   :  { %v3397_v8 = vadd.f32 1.0, %v5813_v37 }
0x23ea   :  { %5814 = vrcp.f32 %v3397_v8 }
0x23f4   :  { %v5815_v41 = vpop.eup %5814 }
0x23f5   :  { %v3401_v10 = vmul.f32 %v5815_v41, %v7427_v60 }
0x2458   :  { %v3404_v4 = vpop.permute.xlu1 %3403 }
0x2459   :  { %v3406_v16 = vmul.f32 %v5815_v41, %v3404_v4 }
0x245b   :  { %3408 = vrot.lane.b32.xlu0 %v3406_v16, %s6259_s30 }
0x24cd   :  { %v3409_v51 = vpop.permute.xlu0 %3408 }
0x24ce   :  { %v7430_v20 = vadd.f32 %v3409_v51, %v3401_v10  ;;  %v7494_v10 = vld [vmem:[#allocation18] ss:$0 sm:$0xff] }
0x24d0   :  { %5816 = vtanh.f32 %v7430_v20 }
0x24da   :  { %v5817_v52 = vpop.eup %5816 }
0x24db   :  { %3414 = vrot.lane.b32.xlu1 %v5817_v52, %s6283_s2 }
0x24df   :  { %3496 = vperm.xlu1 %5696, %v3494_v54  }
0x254d   :  { %v3415_v32 = vpop.permute.xlu1 %3414 }
0x254e   :  { %v3417_v44 = vmul.f32 %v5815_v41, %v3415_v32 }
0x2550   :  { %3419 = vrot.lane.b32.xlu1 %v3417_v44, %s6259_s30 }
0x255e   :  { %v7437_v34 = vpop.permute.xlu1 %3496 }
0x255f   :  { %vm3498_vm9 = vcmp.eq.s32.totalorder %v7437_v34, 1 }
0x2560   :  { %v3522_v58 = vsel %vm3498_vm9, %v3520_v56, 0.0  ;;  %v7445_v19 = vsel %vm3498_vm9, %v3417_v44, %v7305_v47 }
0x2561   :  { %3524 = vst.msk [vmem:[#allocation27 + $0x8] sm:$0x3] %vm751_vm4, %v3522_v58  ;;  %3528 = vrot.lane.b32.xlu1 %v7445_v19, %s6259_s30 }
0x25c2   :  { %v3420_v9 = vpop.permute.xlu1 %3419 }
0x25c3   :  { %5299 = vmatmul.mubr.msk.f32.vlgmr.msra.gmra.mrb[24].mxu0 %vm259_vm1, %v3420_v9 }
0x25c4   :  { %5600 = vmatpush3.bf16.msra.mxu0 %v6628_v49  ;;  %5309 = vmatprep.mubr.msk.f32.mxu0 %vm6277_vm0, %v6278_v2 }
0x25c5   :  { %5601 = vmatprep.subr.bf16.mxu0 %v6276_v1 }
0x25c8   :  { %5603 = vmatpush3.bf16.msra.mxu0 %v6646_v55 }
0x25c9   :  { %5610 = vmatprep.subr.bf16.mxu0 %v6276_v1 }
0x25d3   :  { %v3529_v47 = vpop.permute.xlu1 %3528 }
0x25d4   :  { %5310 = vmatmul.mubr.msk.f32.vlgmr.msra.gmra.mrb[26].mxu0 %vm259_vm1, %v3529_v47  ;;  %5321 = vmatmul.mubr.msk.f32.vlgmr.msra.gmra.mrb[22].mxu1 %vm259_vm1, %v3529_v47 }
0x25d5   :  { %5612 = vmatpush3.bf16.msra.mxu0 %v6744_v33  ;;  %5343 = vmatprep.mubr.msk.f32.mxu0 %vm6277_vm0, %v6278_v2 }
0x25d6   :  { %5613 = vmatprep.subr.bf16.mxu0 %v6276_v1  ;;  %5627 = vmatpush3.bf16.msra.mxu1 %v6828_v40 }
0x25d7   :  { %5628 = vmatprep.subr.bf16.mxu1 %v6276_v1  ;;  %5354 = vmatprep.mubr.msk.f32.mxu1 %vm6277_vm0, %v6278_v2 }
0x25d9   :  { %5615 = vmatpush3.bf16.msra.mxu0 %v6747_v35 }
0x25da   :  { %5616 = vmatprep.subr.bf16.mxu0 %v6276_v1  ;;  %5630 = vmatpush3.bf16.msra.mxu1 %v6834_v11 }
0x25db   :  { %5631 = vmatprep.subr.bf16.mxu1 %v6276_v1 }
0x25dd   :  { %5618 = vmatpush3.bf16.msra.mxu0 %v6751_v39 }
0x25de   :  { %5619 = vmatprep.subr.bf16.mxu0 %v6276_v1 }
0x25e1   :  { %5621 = vmatpush3.bf16.msra.mxu0 %v6755_v42 }
0x25e2   :  { %5622 = vmatprep.subr.bf16.mxu0 %v6276_v1 }
0x25e5   :  { %5624 = vmatpush3.bf16.msra.mxu0 %v6759_v15 }
0x25e6   :  { %5637 = vmatprep.subr.bf16.mxu0 %v6276_v1 }
0x2696   :  { %v3489_v56 = vpop.f32.mrb[24].mxu0 }
0x2697   :  { %v3490_v22 = vadd.f32 %v7339_v3, %v3489_v56  ;;  %v5300_v23 = vpop.f32.mrb[25].mxu0 }
0x2699   :  { %v3499_v18 = vsel %vm3498_vm9, %v3490_v22, 0.0 }
0x269a   :  { %3501 = vst [vmem:[#allocation26 + $0x8] sm:$0x3] %v3499_v18 }
0x26a7   :  { %v3598_v0 = vpop.f32.mrb[26].mxu0  ;;  %v7480_v12 = vpop.f32.mrb[22].mxu1 }
0x26a8   :  { %v3599_v6 = vadd.f32 %v7482_v48, %v3598_v0  ;;  %v5311_v21 = vpop.f32.mrb[27].mxu0  ;;  %v5322_v53 = vpop.f32.mrb[23].mxu1  ;;  %v3878_v62 = vadd.f32 %v7247_v5, %v7480_v12 }
0x26aa   :  { %v3609_v13 = vrot.slane %v3599_v6, %v6671_v17 }
0x26ac   :  { %v3610_v7 = vcombine.high %v3609_v13, %v3609_v13  ;;  %v3617_v38 = vrot.slane %v3609_v13, %v6671_v17 }
0x26ae   :  { %v3624_v24 = vrot.slane %v3610_v7, %v6671_v17  ;;  %v3628_v46 = vrot.slane %v3617_v38, %v6678_v25 }
0x26b0   :  { %v3636_v14 = vadd.f32 %v3628_v46, %v6681_v28  ;;  %v3635_v45 = vadd.f32 %v3628_v46, %v6683_v29  ;;  %v3632_v37 = vrot.slane %v3624_v24, %v6678_v25 }
0x26b2   :  { %v3640_v8 = vmax.f32 %v3636_v14, 0.0  ;;  %v3639_v41 = vmax.f32 %v3635_v45, 0.0  ;;  %v3638_v4 = vadd.f32 %v3632_v37, %v6685_v30  ;;  %v3637_v16 = vadd.f32 %v3632_v37, %v6687_v31 }
0x26b4   :  { %v3644_v51 = vmul.f32 %v7494_v10, %v3640_v8  ;;  %v3643_v52 = vmul.f32 %v7494_v10, %v3639_v41  ;;  %v3642_v54 = vmax.f32 %v3638_v4, 0.0  ;;  %v3641_v32 = vmax.f32 %v3637_v16, 0.0 }
0x26b6   :  { %v3650_v44 = vsel %vm259_vm1, %v3644_v51, 0.0  ;;  %v3647_v58 = vsel %vm259_vm1, %v3643_v52, 0.0  ;;  %v3646_v9 = vmul.f32 %v7494_v10, %v3642_v54  ;;  %v3645_v47 = vmul.f32 %v7494_v10, %v3641_v32 }
0x26b7   :  { %3651 = vadd.xlane.f32.xlu0 %v3650_v44  ;;  %3648 = vadd.xlane.f32.xlu1 %v3647_v58 }
0x26b8   :  { %v3656_v56 = vsel %vm259_vm1, %v3646_v9, 0.0  ;;  %v3653_v22 = vsel %vm259_vm1, %v3645_v47, 0.0 }
0x26bb   :  { %3657 = vadd.xlane.f32.xlu0 %v3656_v56  ;;  %3654 = vadd.xlane.f32.xlu1 %v3653_v22 }
0x2744   :  { %v3652_v23 = vpop.xlane.xlu0 %3651  ;;  %v3649_v18 = vpop.xlane.xlu1 %3648 }
0x2745   :  { %v3660_v0 = vadd.f32 %v3652_v23, %v6706_v59  ;;  %v3659_v6 = vadd.f32 %v3649_v18, %v6706_v59 }
0x2747   :  { %v3674_v13 = vrot.slane %v3660_v0, %v6709_v61  ;;  %v3670_v7 = vrot.slane %v3659_v6, %v6712_v63 }
0x2748   :  { %v3658_v21 = vpop.xlane.xlu0 %3657  ;;  %v3655_v53 = vpop.xlane.xlu1 %3654 }
0x2749   :  { %v3662_v38 = vadd.f32 %v3658_v21, %v6706_v59  ;;  %v3661_v24 = vadd.f32 %v3655_v53, %v6706_v59  ;;  %v3675_v45 = vsel %vm738_vm3, %v3674_v13, %v3670_v7 }
0x274b   :  { %v3683_v46 = vrot.slane %v3662_v38, %v6709_v61  ;;  %v3679_v14 = vrot.slane %v3661_v24, %v6712_v63 }
0x274d   :  { %v3684_v37 = vsel %vm738_vm3, %v3683_v46, %v3679_v14 }
0x274e   :  { %v3685_v8 = vsel %vm391_vm2, %v3684_v37, %v3675_v45 }
0x274f   :  { %v3687_v41 = vsel %vm751_vm4, %v3685_v8, -inf }
0x2750   :  { %3688 = vmax.xlane.f32.xlu1 %v3687_v41  ;;  %v4076_v41 = vsel %vm4075_vm10, 1, %v6280_v26 }
0x27dd   :  { %v3689_v4 = vpop.xlane.xlu1 %3688 }
0x27de   :  { %v3694_v16 = vrot.slane %v3689_v4, %v6678_v25  ;;  %v3698_v51 = vrot.slane %v3689_v4, %v6729_v27 }
0x27e0   :  { %v3701_v52 = vsub.f32 %v3659_v6, %v3694_v16  ;;  %v3702_v54 = vsub.f32 %v3660_v0, %v3694_v16  ;;  %v3704_v32 = vsub.f32 %v3662_v38, %v3698_v51  ;;  %v3703_v44 = vsub.f32 %v3661_v24, %v3698_v51 }
0x27e2   :  { %v3705_v58 = vmul.f32 1.442695, %v3701_v52  ;;  %v3707_v9 = vmul.f32 1.442695, %v3702_v54  ;;  %v3711_v47 = vmul.f32 1.442695, %v3704_v32 }
0x27e3   :  { %v3709_v56 = vmul.f32 1.442695, %v3703_v44 }
0x27e4   :  { %5818 = vpow2.f32 %v3705_v58 }
0x27e5   :  { %5820 = vpow2.f32 %v3707_v9 }
0x27e6   :  { %5822 = vpow2.f32 %v3711_v47  ;;  %v4775_v47 = vmul.f32 -1.442695, %v3878_v62 }
0x27e7   :  { %5824 = vpow2.f32 %v3709_v56 }
0x27ee   :  { %v5819_v22 = vpop.eup %5818 }
0x27ef   :  { %v5821_v23 = vpop.eup %5820  ;;  %3718 = vperm.xlu0 %5697, %v5819_v22  }
0x27f0   :  { %3721 = vperm.xlu1 %5696, %v5821_v23   ;;  %v5823_v18 = vpop.eup %5822 }
0x27f1   :  { %v5825_v21 = vpop.eup %5824 }
0x27f3   :  { %3727 = vperm.xlu0 %5697, %v5823_v18  }
0x27f4   :  { %3724 = vperm.xlu1 %5696, %v5825_v21  }
0x286e   :  { %v3719_v6 = vpop.permute.xlu0 %3718 }
0x286f   :  { %v3722_v0 = vpop.permute.xlu1 %3721  ;;  %v3732_v13 = vrot.slane %v3719_v6, %v6712_v63  ;;  %v7532_v6 = vld [vmem:[#allocation3] sm:$0xff] }
0x2870   :  { %v3736_v53 = vrot.slane %v3722_v0, %v6709_v61 }
0x2872   :  { %v3728_v7 = vpop.permute.xlu0 %3727  ;;  %v3737_v14 = vsel %vm738_vm3, %v3736_v53, %v3732_v13 }
0x2873   :  { %v3725_v38 = vpop.permute.xlu1 %3724  ;;  %v3745_v24 = vrot.slane %v3728_v7, %v6709_v61 }
0x2874   :  { %v3741_v46 = vrot.slane %v3725_v38, %v6712_v63 }
0x2876   :  { %v3746_v45 = vsel %vm738_vm3, %v3745_v24, %v3741_v46  ;;  %v7541_v24 = vld [vmem:[#allocation3 + $0x10] sm:$0xff] }
0x2877   :  { %v3747_v37 = vsel %vm391_vm2, %v3746_v45, %v3737_v14 }
0x2878   :  { %v3749_v8 = vsel %vm751_vm4, %v3747_v37, 0.0 }
0x2879   :  { %3750 = vadd.xlane.f32.xlu1 %v3749_v8 }
0x288a   :  { %4078 = vperm.xlu1 %5696, %v4076_v41  }
0x2906   :  { %v3751_v4 = vpop.xlane.xlu1 %3750 }
0x2907   :  { %v3756_v16 = vrot.slane %v3751_v4, %v6678_v25  ;;  %v3760_v51 = vrot.slane %v3751_v4, %v6729_v27 }
0x2909   :  { %5826 = vrcp.f32 %v3756_v16 }
0x290a   :  { %5828 = vrcp.f32 %v3760_v51  ;;  %v7544_v37 = vpop.permute.xlu1 %4078 }
0x290b   :  { %5830 = vpow2.f32 %v4775_v47  ;;  %vm4080_vm11 = vcmp.eq.s32.totalorder %v7544_v37, 1 }
0x2913   :  { %v5827_v52 = vpop.eup %5826 }
0x2914   :  { %v3764_v54 = vmul.f32 %v5827_v52, %v5819_v22  ;;  %v3765_v32 = vmul.f32 %v5827_v52, %v5821_v23  ;;  %v5829_v44 = vpop.eup %5828  ;;  %v7535_v22 = vld [vmem:[#allocation3 + $0x8] sm:$0xff] }
0x2915   :  { %v3767_v58 = vmul.f32 %v5829_v44, %v5825_v21  ;;  %v3768_v9 = vmul.f32 %v5829_v44, %v5823_v18  ;;  %v5831_v5 = vpop.eup %5830 }
0x2916   :  { %3771 = vperm.xlu0 %5697, %v3764_v54   ;;  %v3884_v51 = vadd.f32 1.0, %v5831_v5 }
0x2918   :  { %5832 = vrcp.f32 %v3884_v51 }
0x291a   :  { %3776 = vperm.xlu0 %5697, %v3765_v32  }
0x291e   :  { %3781 = vperm.xlu0 %5697, %v3767_v58  }
0x2922   :  { %3786 = vperm.xlu0 %5697, %v3768_v9   ;;  %v5833_v5 = vpop.eup %5832 }
0x2995   :  { %v3772_v56 = vpop.permute.xlu0 %3771 }
0x2996   :  { %v3789_v0 = vmul.f32 %v7532_v6, %v3772_v56  ;;  %v4087_v8 = vrot.slane %v3772_v56, %v6712_v63 }
0x2998   :  { %v3793_v21 = vsel %vm259_vm1, %v3789_v0, 0.0 }
0x2999   :  { %v3777_v53 = vpop.permute.xlu0 %3776 }
0x299a   :  { %v3790_v23 = vmul.f32 %v7535_v22, %v3777_v53  ;;  %v4091_v12 = vrot.slane %v3777_v53, %v6709_v61 }
0x299c   :  { %v3794_v18 = vsel %vm259_vm1, %v3790_v23, 0.0  ;;  %v4092_v52 = vsel %vm738_vm3, %v4091_v12, %v4087_v8  ;;  %v3893_v8 = vld [vmem:[#allocation6 + $0xa] sm:$0x3] }
0x299d   :  { %v3795_v13 = vadd.f32 %v3794_v18, %v3793_v21  ;;  %v3782_v7 = vpop.permute.xlu0 %3781 }
0x299e   :  { %v3791_v46 = vmul.f32 %v7541_v24, %v3782_v7  ;;  %v4096_v41 = vrot.slane %v3782_v7, %v6712_v63 }
0x299f   :  { %v3796_v38 = vrot.slane %v3795_v13, 4 }
0x29a0   :  { %v3802_v54 = vsel %vm259_vm1, %v3791_v46, 0.0 }
0x29a1   :  { %v3797_v14 = vadd.f32 %v3796_v38, %v3795_v13  ;;  %v3787_v45 = vpop.permute.xlu0 %3786 }
0x29a2   :  { %v3792_v4 = vmul.f32 %v7399_v43, %v3787_v45  ;;  %v4100_v16 = vrot.slane %v3787_v45, %v6709_v61 }
0x29a3   :  { %v3798_v58 = vrot.slane %v3797_v14, 2 }
0x29a4   :  { %v3803_v32 = vsel %vm259_vm1, %v3792_v4, 0.0  ;;  %v4101_v44 = vsel %vm738_vm3, %v4100_v16, %v4096_v41 }
0x29a5   :  { %v3804_v9 = vadd.f32 %v3803_v32, %v3802_v54  ;;  %v4102_v62 = vsel %vm391_vm2, %v4101_v44, %v4092_v52  ;;  %v3799_v0 = vadd.f32 %v3798_v58, %v3797_v14 }
0x29a6   :  { %v4104_v47 = vsel %vm4080_vm11, %v4102_v62, 0.0 }
0x29a7   :  { %v3805_v56 = vrot.slane %v3804_v9, 4  ;;  %4106 = vst.msk [vmem:[#allocation27 + $0xa] sm:$0x3] %vm751_vm4, %v4104_v47  ;;  %v3800_v21 = vrot.slane %v3799_v0, 1 }
0x29a9   :  { %v3806_v53 = vadd.f32 %v3805_v56, %v3804_v9  ;;  %v3801_v7 = vadd.f32 %v3800_v21, %v3799_v0 }
0x29ab   :  { %v3807_v23 = vrot.slane %v3806_v53, 2 }
0x29ad   :  { %v3808_v18 = vadd.f32 %v3807_v23, %v3806_v53 }
0x29af   :  { %v3809_v13 = vrot.slane %v3808_v18, 1 }
0x29b1   :  { %v3810_v38 = vadd.f32 %v3809_v13, %v3808_v18 }
0x29b3   :  { %v3889_v12 = vsel %vm391_vm2, %v3810_v38, %v3801_v7 }
0x29b4   :  { %v3891_v46 = vmul.f32 %v5833_v5, %v3889_v12 }
0x29b6   :  { %3895 = vrot.lane.b32.xlu0 %v3891_v46, %s6282_s12 }
0x29ba   :  { %3898 = vrot.lane.b32.xlu0 %v7445_v19, %s6285_s25 }
0x2a28   :  { %v3896_v45 = vpop.permute.xlu0 %3895 }
0x2a29   :  { %v3901_v14 = vsel %vm971_vm5, %v3893_v8, %v3896_v45 }
0x2a2c   :  { %v3899_v41 = vpop.permute.xlu0 %3898 }
0x2a2d   :  { %v3902_v4 = vsel %vm973_vm6, %v3901_v14, %v3899_v41 }
0x2a2e   :  { %5344 = vmatmul.mubr.msk.f32.vlgmr.msra.gmra.mrb[28].mxu0 %vm981_vm7, %v3902_v4 }
0x2a2f   :  { %5639 = vmatpush3.bf16.msra.mxu0 %v6632_v50  ;;  %5376 = vmatprep.mubr.msk.f32.mxu0 %vm6277_vm0, %v6278_v2 }
0x2a30   :  { %5640 = vmatprep.subr.bf16.mxu0 %v6276_v1 }
0x2a33   :  { %5642 = vmatpush3.bf16.msra.mxu0 %v6648_v57  ;;  %v7579_v57 = vsel %vm3498_vm9, %v7430_v20, %v7427_v60 }
0x2a34   :  { %5658 = vmatprep.subr.bf16.mxu0 %v6276_v1 }
0x2b01   :  { %v3972_v16 = vpop.f32.mrb[28].mxu0 }
0x2b02   :  { %v3973_v51 = vadd.f32 %v7285_v36, %v3972_v16  ;;  %v5345_v52 = vpop.f32.mrb[29].mxu0 }
0x2b04   :  { %5834 = vtanh.f32 %v3973_v51  ;;  %v4777_v32 = vmul.f32 -1.442695, %v3973_v51 }
0x2b06   :  { %5836 = vpow2.f32 %v4777_v32 }
0x2b0e   :  { %v5835_v54 = vpop.eup %5834 }
0x2b0f   :  { %3985 = vrot.lane.b32.xlu0 %v5835_v54, %s6283_s2 }
0x2b10   :  { %v5837_v50 = vpop.eup %5836 }
0x2b11   :  { %v3979_v44 = vadd.f32 1.0, %v5837_v50 }
0x2b13   :  { %5838 = vrcp.f32 %v3979_v44 }
0x2b1d   :  { %v5839_v58 = vpop.eup %5838 }
0x2b1e   :  { %v3983_v36 = vmul.f32 %v5839_v58, %v7579_v57 }
0x2b81   :  { %v3986_v9 = vpop.permute.xlu0 %3985 }
0x2b82   :  { %v3988_v62 = vmul.f32 %v5839_v58, %v3986_v9 }
0x2b84   :  { %3990 = vrot.lane.b32.xlu0 %v3988_v62, %s6259_s30 }
0x2bf6   :  { %v3991_v47 = vpop.permute.xlu0 %3990 }
0x2bf7   :  { %v7582_v56 = vadd.f32 %v3991_v47, %v3983_v36 }
0x2bf9   :  { %5840 = vtanh.f32 %v7582_v56 }
0x2c03   :  { %v5841_v0 = vpop.eup %5840 }
0x2c04   :  { %3996 = vrot.lane.b32.xlu0 %v5841_v0, %s6283_s2 }
0x2c76   :  { %v3997_v53 = vpop.permute.xlu0 %3996 }
0x2c77   :  { %v3999_v23 = vmul.f32 %v5839_v58, %v3997_v53 }
0x2c79   :  { %4001 = vrot.lane.b32.xlu0 %v3999_v23, %s6259_s30  ;;  %v7590_v34 = vsel %vm4080_vm11, %v3999_v23, %v7445_v19 }
0x2c7d   :  { %4110 = vrot.lane.b32.xlu0 %v7590_v34, %s6259_s30 }
0x2ceb   :  { %v4002_v60 = vpop.permute.xlu0 %4001 }
0x2cec   :  { %5355 = vmatmul.mubr.msk.f32.vlgmr.msra.gmra.mrb[24].mxu1 %vm259_vm1, %v4002_v60 }
0x2ced   :  { %5633 = vmatpush3.bf16.msra.mxu1 %v6628_v49  ;;  %5365 = vmatprep.mubr.msk.f32.mxu1 %vm6277_vm0, %v6278_v2 }
0x2cee   :  { %5634 = vmatprep.subr.bf16.mxu1 %v6276_v1 }
0x2cef   :  { %v4111_v20 = vpop.permute.xlu0 %4110 }
0x2cf0   :  { %5377 = vmatmul.mubr.msk.f32.vlgmr.msra.gmra.mrb[30].mxu0 %vm259_vm1, %v4111_v20 }
0x2cf1   :  { %5636 = vmatpush3.bf16.msra.mxu1 %v6646_v55  ;;  %5660 = vmatpush3.bf16.msra.mxu0 %v6828_v40 }
0x2cf2   :  { %5643 = vmatprep.subr.bf16.mxu1 %v6276_v1  ;;  %5661 = vmatprep.subr.bf16.mxu0 %v6276_v1 }
0x2cf3   :  { %5410 = vmatprep.mubr.msk.f32.mxu0 %vm6277_vm0, %v6278_v2 }
0x2cf4   :  { %5366 = vmatmul.mubr.msk.f32.vlgmr.msra.gmra.mrb[26].mxu1 %vm259_vm1, %v4111_v20 }
0x2cf5   :  { %5645 = vmatpush3.bf16.msra.mxu1 %v6744_v33  ;;  %5399 = vmatprep.mubr.msk.f32.mxu1 %vm6277_vm0, %v6278_v2 }
0x2cf6   :  { %5646 = vmatprep.subr.bf16.mxu1 %v6276_v1  ;;  %5663 = vmatpush3.bf16.msra.mxu0 %v6834_v11 }
0x2cf9   :  { %5648 = vmatpush3.bf16.msra.mxu1 %v6747_v35 }
0x2cfa   :  { %5649 = vmatprep.subr.bf16.mxu1 %v6276_v1 }
0x2cfd   :  { %5651 = vmatpush3.bf16.msra.mxu1 %v6751_v39 }
0x2cfe   :  { %5652 = vmatprep.subr.bf16.mxu1 %v6276_v1 }
0x2d01   :  { %5654 = vmatpush3.bf16.msra.mxu1 %v6755_v42 }
0x2d02   :  { %5655 = vmatprep.subr.bf16.mxu1 %v6276_v1 }
0x2d05   :  { %5657 = vmatpush3.bf16.msra.mxu1 %v6759_v15 }
0x2dbf   :  { %v4071_v49 = vpop.f32.mrb[24].mxu1 }
0x2dc0   :  { %v4072_v2 = vadd.f32 %v7339_v3, %v4071_v49  ;;  %v5356_v55 = vpop.f32.mrb[25].mxu1 }
0x2dc2   :  { %v4081_v33 = vsel %vm4080_vm11, %v4072_v2, 0.0 }
0x2dc3   :  { %4083 = vst [vmem:[#allocation26 + $0xa] sm:$0x3] %v4081_v33  ;;  %v7622_v35 = vpop.f32.mrb[30].mxu0 }
0x2dc4   :  { %v5378_v40 = vpop.f32.mrb[31].mxu0 }
0x2dc7   :  { %v4180_v39 = vpop.f32.mrb[26].mxu1 }
0x2dc8   :  { %v4181_v11 = vadd.f32 %v7482_v48, %v4180_v39  ;;  %v5367_v19 = vpop.f32.mrb[27].mxu1 }
0x2dca   :  { %v4191_v42 = vrot.slane %v4181_v11, %v6671_v17 }
0x2dcc   :  { %v4192_v1 = vcombine.high %v4191_v42, %v4191_v42  ;;  %v4199_v15 = vrot.slane %v4191_v42, %v6671_v17 }
0x2dce   :  { %v4206_v21 = vrot.slane %v4192_v1, %v6671_v17  ;;  %v4210_v3 = vrot.slane %v4199_v15, %v6678_v25 }
0x2dd0   :  { %v4218_v18 = vadd.f32 %v4210_v3, %v6681_v28  ;;  %v4217_v13 = vadd.f32 %v4210_v3, %v6683_v29  ;;  %v4214_v7 = vrot.slane %v4206_v21, %v6678_v25 }
0x2dd2   :  { %v4222_v38 = vmax.f32 %v4218_v18, 0.0  ;;  %v4221_v5 = vmax.f32 %v4217_v13, 0.0  ;;  %v4219_v48 = vadd.f32 %v4214_v7, %v6687_v31  ;;  %v4220_v12 = vadd.f32 %v4214_v7, %v6685_v30 }
0x2dd4   :  { %v4226_v46 = vmul.f32 %v7494_v10, %v4222_v38  ;;  %v4225_v45 = vmul.f32 %v7494_v10, %v4221_v5  ;;  %v4223_v8 = vmax.f32 %v4219_v48, 0.0  ;;  %v4224_v29 = vmax.f32 %v4220_v12, 0.0 }
0x2dd6   :  { %v4232_v17 = vsel %vm259_vm1, %v4226_v46, 0.0  ;;  %v4229_v14 = vsel %vm259_vm1, %v4225_v45, 0.0  ;;  %v4227_v28 = vmul.f32 %v7494_v10, %v4223_v8  ;;  %v4228_v31 = vmul.f32 %v7494_v10, %v4224_v29 }
0x2dd7   :  { %4233 = vadd.xlane.f32.xlu1 %v4232_v17  ;;  %4230 = vadd.xlane.f32.xlu0 %v4229_v14 }
0x2dd8   :  { %v4235_v41 = vsel %vm259_vm1, %v4227_v28, 0.0  ;;  %v4238_v30 = vsel %vm259_vm1, %v4228_v31, 0.0 }
0x2ddb   :  { %4236 = vadd.xlane.f32.xlu0 %v4235_v41 }
0x2ddf   :  { %4239 = vadd.xlane.f32.xlu0 %v4238_v30 }
0x2e64   :  { %v4231_v4 = vpop.xlane.xlu0 %4230  ;;  %v4234_v16 = vpop.xlane.xlu1 %4233 }
0x2e65   :  { %v4242_v52 = vadd.f32 %v4234_v16, %v6706_v59  ;;  %v4241_v54 = vadd.f32 %v4231_v4, %v6706_v59 }
0x2e67   :  { %v4256_v44 = vrot.slane %v4242_v52, %v6709_v61  ;;  %v4252_v58 = vrot.slane %v4241_v54, %v6712_v63 }
0x2e68   :  { %v4237_v51 = vpop.xlane.xlu0 %4236 }
0x2e69   :  { %v4243_v32 = vadd.f32 %v4237_v51, %v6706_v59  ;;  %v4257_v36 = vsel %vm738_vm3, %v4256_v44, %v4252_v58  ;;  %v5882_v51 = vld [vmem:[#allocation21] ss:$0 sm:$0xff] }
0x2e6b   :  { %v4261_v9 = vrot.slane %v4243_v32, %v6712_v63 }
0x2e6c   :  { %v4240_v50 = vpop.xlane.xlu0 %4239 }
0x2e6d   :  { %v4244_v10 = vadd.f32 %v4240_v50, %v6706_v59 }
0x2e6f   :  { %v4265_v62 = vrot.slane %v4244_v10, %v6709_v61 }
0x2e71   :  { %v4266_v47 = vsel %vm738_vm3, %v4265_v62, %v4261_v9 }
0x2e72   :  { %v4267_v0 = vsel %vm391_vm2, %v4266_v47, %v4257_v36 }
0x2e73   :  { %v4269_v53 = vsel %vm751_vm4, %v4267_v0, -inf }
0x2e74   :  { %4270 = vmax.xlane.f32.xlu0 %v4269_v53 }
0x2f01   :  { %v4271_v23 = vpop.xlane.xlu0 %4270 }
0x2f02   :  { %v4276_v60 = vrot.slane %v4271_v23, %v6678_v25  ;;  %v4280_v20 = vrot.slane %v4271_v23, %v6729_v27 }
0x2f04   :  { %v4283_v49 = vsub.f32 %v4241_v54, %v4276_v60  ;;  %v4284_v59 = vsub.f32 %v4242_v52, %v4276_v60  ;;  %v4285_v2 = vsub.f32 %v4243_v32, %v4280_v20  ;;  %v4286_v40 = vsub.f32 %v4244_v10, %v4280_v20 }
0x2f05   :  { %v4460_v52 = vadd.f32 %v5882_v51, %v7622_v35 }
0x2f06   :  { %v4287_v55 = vmul.f32 1.442695, %v4283_v49  ;;  %v4289_v33 = vmul.f32 1.442695, %v4284_v59  ;;  %v4291_v39 = vmul.f32 1.442695, %v4285_v2 }
0x2f07   :  { %v4293_v11 = vmul.f32 1.442695, %v4286_v40  ;;  %v4781_v54 = vmul.f32 -1.442695, %v4460_v52 }
0x2f08   :  { %5842 = vpow2.f32 %v4287_v55 }
0x2f09   :  { %5844 = vpow2.f32 %v4289_v33 }
0x2f0a   :  { %5846 = vpow2.f32 %v4291_v39 }
0x2f0b   :  { %5848 = vpow2.f32 %v4293_v11 }
0x2f12   :  { %v5843_v19 = vpop.eup %5842 }
0x2f13   :  { %v5845_v42 = vpop.eup %5844  ;;  %4300 = vperm.xlu0 %5697, %v5843_v19  }
0x2f14   :  { %4303 = vperm.xlu1 %5696, %v5845_v42   ;;  %v5847_v1 = vpop.eup %5846 }
0x2f15   :  { %v5849_v15 = vpop.eup %5848 }
0x2f18   :  { %4306 = vperm.xlu1 %5696, %v5847_v1  }
0x2f1c   :  { %4309 = vperm.xlu1 %5696, %v5849_v15  }
0x2f92   :  { %v4301_v3 = vpop.permute.xlu0 %4300 }
0x2f93   :  { %v4304_v21 = vpop.permute.xlu1 %4303  ;;  %v4314_v7 = vrot.slane %v4301_v3, %v6712_v63 }
0x2f94   :  { %v4318_v13 = vrot.slane %v4304_v21, %v6709_v61 }
0x2f96   :  { %v4319_v12 = vsel %vm738_vm3, %v4318_v13, %v4314_v7  ;;  %v4475_v7 = vld [vmem:[#allocation6 + $0xc] sm:$0x3] }
0x2f97   :  { %v4307_v18 = vpop.permute.xlu1 %4306 }
0x2f98   :  { %v4323_v5 = vrot.slane %v4307_v18, %v6712_v63 }
0x2f9b   :  { %v4310_v38 = vpop.permute.xlu1 %4309 }
0x2f9c   :  { %v4327_v48 = vrot.slane %v4310_v38, %v6709_v61 }
0x2f9e   :  { %v4328_v46 = vsel %vm738_vm3, %v4327_v48, %v4323_v5 }
0x2f9f   :  { %v4329_v45 = vsel %vm391_vm2, %v4328_v46, %v4319_v12  ;;  %v5883_v46 = vld [vmem:[#allocation24] ss:$0 sm:$0xff] }
0x2fa0   :  { %v4331_v8 = vsel %vm751_vm4, %v4329_v45, 0.0 }
0x2fa1   :  { %4332 = vadd.xlane.f32.xlu0 %v4331_v8 }
0x302e   :  { %v4333_v17 = vpop.xlane.xlu0 %4332 }
0x302f   :  { %v4338_v14 = vrot.slane %v4333_v17, %v6678_v25  ;;  %v4342_v28 = vrot.slane %v4333_v17, %v6729_v27 }
0x3031   :  { %5850 = vrcp.f32 %v4338_v14 }
0x3032   :  { %5852 = vrcp.f32 %v4342_v28 }
0x3033   :  { %5854 = vpow2.f32 %v4781_v54 }
0x303b   :  { %v5851_v29 = vpop.eup %5850 }
0x303c   :  { %v4346_v41 = vmul.f32 %v5851_v29, %v5843_v19  ;;  %v4347_v31 = vmul.f32 %v5851_v29, %v5845_v42  ;;  %v5853_v30 = vpop.eup %5852 }
0x303d   :  { %v4349_v4 = vmul.f32 %v5853_v30, %v5847_v1  ;;  %v4350_v16 = vmul.f32 %v5853_v30, %v5849_v15  ;;  %v5855_v23 = vpop.eup %5854  ;;  %v4108_v30 = vsel %vm4080_vm11, %v7582_v56, %v7579_v57 }
0x303e   :  { %4353 = vperm.xlu1 %5696, %v4346_v41   ;;  %v4466_v55 = vadd.f32 1.0, %v5855_v23 }
0x3040   :  { %5856 = vrcp.f32 %v4466_v55 }
0x3042   :  { %4358 = vperm.xlu1 %5696, %v4347_v31  }
0x3046   :  { %4363 = vperm.xlu1 %5696, %v4349_v4  }
0x304a   :  { %4368 = vperm.xlu1 %5696, %v4350_v16   ;;  %v5857_v21 = vpop.eup %5856 }
0x30bd   :  { %v4354_v32 = vpop.permute.xlu1 %4353 }
0x30be   :  { %v4371_v25 = vmul.f32 %v7532_v6, %v4354_v32  ;;  %v4669_v50 = vrot.slane %v4354_v32, %v6712_v63 }
0x30c0   :  { %v4375_v10 = vsel %vm259_vm1, %v4371_v25, 0.0  ;;  %v5884_v25 = vld [vmem:[%s7777_s6] sm:$0x3] }
0x30c1   :  { %v4359_v27 = vpop.permute.xlu1 %4358  ;;  %vm4657_vm0 = vcmp.gt.s32.totalorder %v5884_v25, 6 }
0x30c2   :  { %v4372_v44 = vmul.f32 %v7535_v22, %v4359_v27  ;;  %v4673_v58 = vrot.slane %v4359_v27, %v6709_v61  ;;  %v4658_v27 = vsel %vm4657_vm0, 1, %v6280_v26 }
0x30c4   :  { %v4376_v9 = vsel %vm259_vm1, %v4372_v44, 0.0  ;;  %v4674_v62 = vsel %vm738_vm3, %v4673_v58, %v4669_v50 }
0x30c5   :  { %v4377_v36 = vadd.f32 %v4376_v9, %v4375_v10  ;;  %v4364_v35 = vpop.permute.xlu1 %4363 }
0x30c6   :  { %v4373_v0 = vmul.f32 %v7541_v24, %v4364_v35  ;;  %v4678_v60 = vrot.slane %v4364_v35, %v6712_v63 }
0x30c7   :  { %v4378_v47 = vrot.slane %v4377_v36, 4 }
0x30c8   :  { %v4384_v49 = vsel %vm259_vm1, %v4373_v0, 0.0 }
0x30c9   :  { %v4379_v53 = vadd.f32 %v4378_v47, %v4377_v36  ;;  %v4369_v6 = vpop.permute.xlu1 %4368 }
0x30ca   :  { %v4374_v22 = vmul.f32 %v7399_v43, %v4369_v6  ;;  %v4682_v20 = vrot.slane %v4369_v6, %v6709_v61 }
0x30cb   :  { %v4380_v33 = vrot.slane %v4379_v53, 2 }
0x30cc   :  { %v4385_v59 = vsel %vm259_vm1, %v4374_v22, 0.0  ;;  %v4683_v2 = vsel %vm738_vm3, %v4682_v20, %v4678_v60 }
0x30cd   :  { %v4386_v40 = vadd.f32 %v4385_v59, %v4384_v49  ;;  %v4684_v24 = vsel %vm391_vm2, %v4683_v2, %v4674_v62  ;;  %v4381_v11 = vadd.f32 %v4380_v33, %v4379_v53 }
0x30cf   :  { %v4387_v39 = vrot.slane %v4386_v40, 4  ;;  %v4382_v42 = vrot.slane %v4381_v11, 1 }
0x30d1   :  { %v4388_v19 = vadd.f32 %v4387_v39, %v4386_v40  ;;  %v4383_v61 = vadd.f32 %v4382_v42, %v4381_v11 }
0x30d3   :  { %v4389_v63 = vrot.slane %v4388_v19, 2 }
0x30d5   :  { %v4390_v43 = vadd.f32 %v4389_v63, %v4388_v19 }
0x30d7   :  { %v4391_v1 = vrot.slane %v4390_v43, 1 }
0x30d9   :  { %v4392_v15 = vadd.f32 %v4391_v1, %v4390_v43 }
0x30db   :  { %v4471_v3 = vsel %vm391_vm2, %v4392_v15, %v4383_v61 }
0x30dc   :  { %v4473_v18 = vmul.f32 %v5857_v21, %v4471_v3 }
0x30de   :  { %4477 = vrot.lane.b32.xlu1 %v4473_v18, %s6282_s12 }
0x30e2   :  { %4480 = vrot.lane.b32.xlu1 %v7590_v34, %s6285_s25 }
0x3150   :  { %v4478_v13 = vpop.permute.xlu1 %4477 }
0x3151   :  { %v4483_v38 = vsel %vm971_vm5, %v4475_v7, %v4478_v13 }
0x3154   :  { %v4481_v5 = vpop.permute.xlu1 %4480 }
0x3155   :  { %v4484_v48 = vsel %vm973_vm6, %v4483_v38, %v4481_v5 }
0x3156   :  { %5400 = vmatmul.mubr.msk.f32.vlgmr.msra.gmra.mrb[28].mxu1 %vm981_vm7, %v4484_v48 }
0x3229   :  { %v4554_v12 = vpop.f32.mrb[28].mxu1 }
0x322a   :  { %v4555_v45 = vadd.f32 %v5883_v46, %v4554_v12  ;;  %v5401_v8 = vpop.f32.mrb[29].mxu1 }
0x322c   :  { %5858 = vtanh.f32 %v4555_v45  ;;  %v4783_v14 = vmul.f32 -1.442695, %v4555_v45 }
0x322e   :  { %5860 = vpow2.f32 %v4783_v14 }
0x3236   :  { %v5859_v17 = vpop.eup %5858 }
0x3237   :  { %4567 = vrot.lane.b32.xlu1 %v5859_v17, %s6283_s2 }
0x3238   :  { %v5861_v34 = vpop.eup %5860 }
0x3239   :  { %v4561_v28 = vadd.f32 1.0, %v5861_v34 }
0x323b   :  { %5862 = vrcp.f32 %v4561_v28 }
0x3245   :  { %v5863_v29 = vpop.eup %5862 }
0x3246   :  { %v4565_v4 = vmul.f32 %v5863_v29, %v4108_v30 }
0x32a9   :  { %v4568_v41 = vpop.permute.xlu1 %4567 }
0x32aa   :  { %v4570_v31 = vmul.f32 %v5863_v29, %v4568_v41 }
0x32ac   :  { %4572 = vrot.lane.b32.xlu0 %v4570_v31, %s6259_s30 }
0x331e   :  { %v4573_v16 = vpop.permute.xlu0 %4572 }
0x331f   :  { %v4575_v51 = vadd.f32 %v4573_v16, %v4565_v4 }
0x3321   :  { %5864 = vtanh.f32 %v4575_v51 }
0x332b   :  { %v5865_v52 = vpop.eup %5864 }
0x332c   :  { %4578 = vrot.lane.b32.xlu1 %v5865_v52, %s6283_s2 }
0x339e   :  { %v4579_v54 = vpop.permute.xlu1 %4578 }
0x339f   :  { %v4581_v32 = vmul.f32 %v5863_v29, %v4579_v54 }
0x33a1   :  { %4583 = vrot.lane.b32.xlu1 %v4581_v32, %s6259_s30 }
0x33a5   :  { %4660 = vperm.xlu1 %5696, %v4658_v27  }
0x3413   :  { %v4584_v37 = vpop.permute.xlu1 %4583 }
0x3414   :  { %5411 = vmatmul.mubr.msk.f32.vlgmr.msra.gmra.mrb[32].mxu0 %vm259_vm1, %v4584_v37 }
0x3424   :  { %v4661_v57 = vpop.permute.xlu1 %4660 }
0x3425   :  { %vm4662_vm2 = vcmp.eq.s32.totalorder %v4661_v57, 1 }
0x3426   :  { %v4686_v56 = vsel %vm4662_vm2, %v4684_v24, 0.0 }
0x3427   :  { %4688 = vst.msk [vmem:[#allocation27 + $0xc] sm:$0x3] %vm751_vm4, %v4686_v56 }
0x3428   :  { %6205 = shalt.err (!%p6202_p4)
}
0x3429   :  { %s7778_s12 = sld [smem:[#allocation45_spill]] }
0x342f   :  { %s6206_s2 = scalar_lea.hbm %s7778_s12, 224 }
0x3430   :  { %p6207_p5 = scmp.ne.s32.totalorder %s7778_s12, %s6206_s2  ;;  %p6210_p6 = scmp.lt.u32.totalorder %s6206_s2, %s7778_s12 }
0x3432   :  { %p6212_p7 = pnand %p6210_p6, %p6207_p5 }
0x3434   :  { %6215 = shalt.err (!%p6212_p7)
}
0x3435   :  { %4712 = dma.vmem_to_hbm [thread:$0]  %s4707_s28, 224, %s7778_s12, [#allocation28], %s6259_s30, %s6259_s30, %s6260_s0  }
0x3436   :  { %s6287_s26 = smov [#allocation26]   ;;  %v5885_v50 = vld [vmem:[%s7756_s18] ss:$0 sm:$0xff] }
0x3437   :  { %s4694_s27 = sshll.u32 %s6287_s26, 4  ;;  %s4695_s27 = int_to_ptr.vmem [resolvable:$true] %s4694_s27 }
0x3438   :  { %s6216_s10 = scalar_lea.vmem %s4695_s27, 224  ;;  %p6221_p9 = scmp.lt.s32.totalorder %s4695_s27, %s4695_s27 }
0x3439   :  { %p6217_p8 = scmp.ne.s32.totalorder %s4695_s27, %s6216_s10  ;;  %p6222_p10 = scmp.lt.s32.totalorder %s6216_s10, %s6216_s10 }
0x343b   :  { %p6223_p11 = por %p6222_p10, %p6221_p9 }
0x343d   :  { %p6224_p12 = pnand %p6223_p11, %p6217_p8 }
0x34e7   :  { %v4653_v26 = vpop.f32.mrb[32].mxu0 }
0x34e8   :  { %v4654_v44 = vadd.f32 %v5885_v50, %v4653_v26  ;;  %v5412_v58 = vpop.f32.mrb[33].mxu0 }
0x34ea   :  { %v4663_v10 = vsel %vm4662_vm2, %v4654_v44, 0.0 }
0x34eb   :  { %4665 = vst [vmem:[#allocation26 + $0xc] sm:$0x3] %v4663_v10 }
0x34ec   :  { %6227 = shalt.err (!%p6224_p12)
}
0x34ed   :  { %s7779_s15 = sld [smem:[#allocation44_spill]] }
0x34f3   :  { %s6228_s25 = scalar_lea.hbm %s7779_s15, 224 }
0x34f4   :  { %p6229_p13 = scmp.ne.s32.totalorder %s7779_s15, %s6228_s25  ;;  %p6232_p0 = scmp.lt.u32.totalorder %s6228_s25, %s7779_s15 }
0x34f6   :  { %p6234_p1 = pnand %p6232_p0, %p6229_p13 }
0x34f8   :  { %6237 = shalt.err (!%p6234_p1)
}
0x34f9   :  { %4700 = dma.vmem_to_hbm [thread:$0]  %s4695_s27, 224, %s7779_s15, [#allocation5], %s6259_s30, %s6259_s30, %s6260_s0  }
0x34fa   :  { %6254 = dma.done.wait [#allocation5], 224  }
0x34fb   :  { %6255 = vsyncadd [#allocation5], 4294967072 }
0x34fc   :  { %6256 = dma.done.wait [#allocation28], 224  }
0x34fd   :  { %6257 = vsyncadd [#allocation28], 4294967072 }
0x34fe   :  { %4719 = vsyncpa [#allocation4], 1 }
0x34ff   :  { %4720 = vsyncpa [#allocation7], 1 }
0x3500   :  { %4721 = vsyncpa [#allocation10], 1 }
0x3501   :  { %4722 = vsyncpa [#allocation13], 1 }
0x3502   :  { %4723 = vsyncpa [#allocation16], 1 }
0x3503   :  { %4724 = vsyncpa [#allocation19], 1 }
0x3504   :  { %4725 = vsyncpa [#allocation22], 1 }
0x3505   :  { %4726 = vsyncpa [#allocation25], 1 }
0x3506   :  { %4727 = vsyncpa [#allocation5], 1 }
0x3507   :  { %4728 = vsyncpa [#allocation28], 1 }

</bundles_post_ra>
